<compile_context>
chip_gen: v6e
topology: v6e:2x2x1
jax: 0.10.0
libtpu: 0.0.40
codegen_flags: <defaults>
</compile_context>

<pallas_src>
import functools
import math

import jax
import jax.numpy as jnp
from jax import lax
from jax.experimental import pallas as pl
from jax.experimental.pallas import tpu as pltpu


_MASK_VALUE = -1e30      # additive causal mask; score path stays f32
_LANE = 128

# ------------------------- packed parameter layout ---------------------------
# bf16 weight slab per layer type, shape (3d + ff, 128):
#   rows [0,   d)       cols [0, 3d) : fused wqkv   (wq pre-scaled by 1/sqrt(hd))
#   rows [d,   2d)      cols [0, d)  : wo
#   rows [2d,  3d)      cols [0, ff) : w1
#   rows [3d,  3d+ff)   cols [0, d)  : w2
# f32 LN/bias slab, shape (16, 128): rows 0:8 = SA, rows 8:16 = CA, per type:
#   row 0 ln1_w | 1 ln1_b | 2 bqkv (bq pre-scaled) | 3 bo
#   row 4 ln2_w | 5 ln2_b | 6 b1                   | 7 b2


# ----------------------------- in-kernel helpers -----------------------------

def _layer_norm(x, w, b, eps=1e-5):
    # x: (n, d) f32; w, b: (1, d) f32  (biased variance, matches nn.LayerNorm)
    mu = jnp.mean(x, axis=-1, keepdims=True)
    xc = x - mu
    var = jnp.mean(xc * xc, axis=-1, keepdims=True)
    return xc * lax.rsqrt(var + eps) * w + b


def _to_heads(x, tb, n, nh, hd):
    # (tb*n, nh*hd) -> (tb*nh, n, hd); tb is a Python int (static)
    if tb == 1:
        return jnp.swapaxes(x.reshape(n, nh, hd), 0, 1)
    x = x.reshape(tb, n, nh, hd)
    x = jnp.swapaxes(x, 1, 2)
    return x.reshape(tb * nh, n, hd)


def _from_heads(x, tb, n, nh, hd):
    # (tb*nh, n, hd) -> (tb*n, nh*hd)
    if tb == 1:
        return jnp.swapaxes(x, 0, 1).reshape(n, nh * hd)
    x = x.reshape(tb, nh, n, hd)
    x = jnp.swapaxes(x, 1, 2)
    return x.reshape(tb * n, nh * hd)


def _attention(q, k, v, nh, tb, causal_bias):
    # q: (tb*nq, d) f32, k/v: (tb*nk, d) f32  ->  (tb*nq, d) f32
    bf16 = jnp.bfloat16
    f32 = jnp.float32
    nq = q.shape[0] // tb
    nk = k.shape[0] // tb
    d = q.shape[1]
    hd = d // nh

    # head split on f32 (best-supported relayouts), cast right before the MXU
    qh = _to_heads(q, tb, nq, nh, hd).astype(bf16)     # (g, nq, hd)
    kh = _to_heads(k, tb, nk, nh, hd).astype(bf16)     # (g, nk, hd)
    vh = _to_heads(v, tb, nk, nh, hd).astype(bf16)     # (g, nk, hd)

    # scale already folded into wq/bq at pack time
    s = jnp.einsum("gqe,gke->gqk", qh, kh, preferred_element_type=f32)
    if causal_bias is not None:
        s = s + causal_bias[None]
    s = s - jnp.max(s, axis=-1, keepdims=True)
    p = jnp.exp(s)
    p = p / jnp.sum(p, axis=-1, keepdims=True)          # exact softmax

    o = jnp.einsum("gqk,gke->gqe", p.astype(bf16), vh, preferred_element_type=f32)
    return _from_heads(o, tb, nq, nh, hd)


def _block(x, kv, w_ref, b_ref, brow, nh, tb, d, ff, causal_bias):
    """One pre-norm transformer block (MHSA if kv is None, else MHCA) + FF.

    x: (tb*n, d) f32 rows; kv: None or (tb*nc, d) f32 rows.
    Weights/biases are read from the packed slab refs next to their use.
    """
    bf16 = jnp.bfloat16
    f32 = jnp.float32
    d3 = 3 * d

    xn = _layer_norm(x, b_ref[brow + 0:brow + 1, 0:d],
                     b_ref[brow + 1:brow + 2, 0:d])
    if kv is None:
        # self-attention: one fused (d, 3d) QKV projection on the normed input
        qkv = (jnp.dot(xn.astype(bf16), w_ref[0:d, 0:d3],
                       preferred_element_type=f32)
               + b_ref[brow + 2:brow + 3, 0:d3])
        q, k, v = qkv[:, 0:d], qkv[:, d:2 * d], qkv[:, 2 * d:d3]
    else:
        # cross-attention: Q from the normed input, fused KV from the context
        q = (jnp.dot(xn.astype(bf16), w_ref[0:d, 0:d],
                     preferred_element_type=f32)
             + b_ref[brow + 2:brow + 3, 0:d])
        kvp = (jnp.dot(kv.astype(bf16), w_ref[0:d, d:d3],
                       preferred_element_type=f32)
               + b_ref[brow + 2:brow + 3, d:d3])
        k, v = kvp[:, 0:d], kvp[:, d:2 * d]

    attn = _attention(q, k, v, nh, tb, causal_bias)
    # single full-width output projection (no per-head matmuls / head sum)
    x = x + (jnp.dot(attn.astype(bf16), w_ref[d:2 * d, 0:d],
                     preferred_element_type=f32)
             + b_ref[brow + 3:brow + 4, 0:d])

    xn = _layer_norm(x, b_ref[brow + 4:brow + 5, 0:d],
                     b_ref[brow + 5:brow + 6, 0:d])
    h = (jnp.dot(xn.astype(bf16), w_ref[2 * d:3 * d, 0:ff],
                 preferred_element_type=f32)
         + b_ref[brow + 6:brow + 7, 0:ff])
    h = jnp.maximum(h, 0.0)
    y = (jnp.dot(h.astype(bf16), w_ref[3 * d:3 * d + ff, 0:d],
                 preferred_element_type=f32)
         + b_ref[brow + 7:brow + 8, 0:d])
    return x + y


# ------------------------------- fused kernel --------------------------------

def _encoder_kernel(num_layers, num_heads, d, ff,
                    xc_ref, xt_ref, wsa_ref, wca_ref, b_ref, out_ref):
    tb, nc, _ = xc_ref.shape
    _, nt, _ = xt_ref.shape

    # flatten batch-fold: row-wise ops (LN / projections / FF) see (tb*n, d)
    xc = xc_ref[...].reshape(tb * nc, d)
    xt = xt_ref[...].reshape(tb * nt, d)

    # causal additive bias built once, shared by every self-attention layer
    row = lax.broadcasted_iota(jnp.int32, (nc, nc), 0)
    col = lax.broadcasted_iota(jnp.int32, (nc, nc), 1)
    causal_bias = jnp.where(row >= col, 0.0, _MASK_VALUE).astype(jnp.float32)

    def layer(_, carry):
        xc, xt = carry
        xc = _block(xc, None, wsa_ref, b_ref, 0, num_heads, tb, d, ff,
                    causal_bias)
        xt = _block(xt, xc, wca_ref, b_ref, 8, num_heads, tb, d, ff, None)
        return xc, xt

    # all clones share identical params -> plain counted loop over layers
    xc, xt = lax.fori_loop(0, num_layers, layer, (xc, xt),
                           unroll=num_layers <= 4)

    out_ref[...] = xt.reshape(tb, nt, d).astype(out_ref.dtype)


# --------------------------------- wrapper ------------------------------------

def _cost_estimate(m, nc, nt, d, ff, num_layers, num_heads, param_bytes):
    sa = (2 * nc * d * 3 * d          # fused QKV
          + 4 * nc * nc * d           # scores + PV
          + 2 * nc * d * d            # output projection
          + 4 * nc * d * ff)          # feed-forward
    ca = (2 * nt * d * d              # Q projection
          + 2 * nc * d * 2 * d        # fused KV projection
          + 4 * nt * nc * d           # scores + PV
          + 2 * nt * d * d            # output projection
          + 4 * nt * d * ff)          # feed-forward
    flops = m * num_layers * (sa + ca)
    trans = m * num_layers * num_heads * (nc * nc + nt * nc)   # softmax exp
    bytes_accessed = 4 * (m * nc * d + 2 * m * nt * d) + param_bytes
    return pl.CostEstimate(flops=flops, transcendentals=trans,
                           bytes_accessed=bytes_accessed)


def tnp_transformer_masked_encoder(xc, xt, sa_w_slab, ca_w_slab, bias_slab,
                                   num_layers, num_heads, *, batch_block=None):
    # Mirrors: for sa, ca in zip(...): xc = sa(xc, use_causal=True); xt = ca(xt, xc)
    m, nc, d = xc.shape
    _, nt, _ = xt.shape
    assert d % num_heads == 0
    wrows = sa_w_slab.shape[0]
    ff = wrows - 3 * d
    assert ca_w_slab.shape == (wrows, _LANE) and bias_slab.shape == (16, _LANE)

    if batch_block is None:
        # rough per-batch-element f32 working set (activations, FF hidden,
        # scores); budget against v7x's 64 MiB physical / 32 MiB scoped VMEM
        per_elem = 4 * (6 * nc * d + 6 * nt * d + nc * ff + nt * ff
                        + num_heads * (nc * nc + nt * nc))
        tb_cap = max(1, (16 * 1024 * 1024) // max(per_elem, 1))
        batch_block = 1
        for tb in range(min(m, tb_cap), 0, -1):
            # keep >= 2 grid steps so both v7x TensorCores stay busy
            if m % tb == 0 and (m // tb >= 2 or m == 1):
                batch_block = tb
                break
    tb = batch_block
    grid = (m // tb,)

    param_bytes = (sa_w_slab.size * 2 + ca_w_slab.size * 2 + bias_slab.size * 4)

    return pl.pallas_call(
        functools.partial(_encoder_kernel, num_layers, num_heads, d, ff),
        grid=grid,
        in_specs=[
            pl.BlockSpec((tb, nc, d), lambda i: (i, 0, 0)),
            pl.BlockSpec((tb, nt, d), lambda i: (i, 0, 0)),
            # constant block index -> fetched once, VMEM-resident across grid
            pl.BlockSpec((wrows, _LANE), lambda i: (0, 0)),
            pl.BlockSpec((wrows, _LANE), lambda i: (0, 0)),
            pl.BlockSpec((16, _LANE), lambda i: (0, 0)),
        ],
        out_specs=pl.BlockSpec((tb, nt, d), lambda i: (i, 0, 0)),
        out_shape=jax.ShapeDtypeStruct((m, nt, d), jnp.float32),
        compiler_params=pltpu.CompilerParams(
            dimension_semantics=("parallel",),          # batch across TCs (v7x)
            vmem_limit_bytes=32 * 1024 * 1024),         # safe on v7x's 64 MiB
        cost_estimate=_cost_estimate(m, nc, nt, d, ff, num_layers, num_heads,
                                     param_bytes),
    )(xc, xt, sa_w_slab, ca_w_slab, bias_slab)


# ------------------------------ parameter init --------------------------------

def init_layer_params(key, d, ff):
    ks = jax.random.split(key, 6)
    s = 0.02
    return {
        "ln1_w": jnp.ones((1, d), jnp.float32),
        "ln1_b": jnp.zeros((1, d), jnp.float32),
        "wq": s * jax.random.normal(ks[0], (d, d), jnp.float32),
        "bq": jnp.zeros((1, d), jnp.float32),
        "wk": s * jax.random.normal(ks[1], (d, d), jnp.float32),
        "bk": jnp.zeros((1, d), jnp.float32),
        "wv": s * jax.random.normal(ks[2], (d, d), jnp.float32),
        "bv": jnp.zeros((1, d), jnp.float32),
        "wo": s * jax.random.normal(ks[3], (d, d), jnp.float32),
        "bo": jnp.zeros((1, d), jnp.float32),
        "ln2_w": jnp.ones((1, d), jnp.float32),
        "ln2_b": jnp.zeros((1, d), jnp.float32),
        "w1": s * jax.random.normal(ks[4], (d, ff), jnp.float32),
        "b1": jnp.zeros((1, ff), jnp.float32),
        "w2": s * jax.random.normal(ks[5], (ff, d), jnp.float32),
        "b2": jnp.zeros((1, d), jnp.float32),
    }


def pack_layer_params(raw, num_heads):
    """Fuse QKV, fold 1/sqrt(head_dim) into wq/bq, pad every matmul weight to
    128 lanes and stack into ONE bf16 weight slab; LN params and all biases go
    into one f32 (8, 128) slab (kept f32: they live on the accumulation path)."""
    d = raw["wq"].shape[0]
    hd = d // num_heads
    scale = 1.0 / math.sqrt(hd)

    def pad_lane(x):
        return jnp.pad(x, ((0, 0), (0, _LANE - x.shape[1])))

    wqkv = jnp.concatenate([raw["wq"] * scale, raw["wk"], raw["wv"]], axis=1)
    w_slab = jnp.concatenate(
        [pad_lane(wqkv), pad_lane(raw["wo"]),
         pad_lane(raw["w1"]), pad_lane(raw["w2"])],
        axis=0).astype(jnp.bfloat16)                      # (3d + ff, 128)

    bqkv = jnp.concatenate([raw["bq"] * scale, raw["bk"], raw["bv"]], axis=1)
    b_rows = [raw["ln1_w"], raw["ln1_b"], bqkv, raw["bo"],
              raw["ln2_w"], raw["ln2_b"], raw["b1"], raw["b2"]]
    b_slab = jnp.concatenate([pad_lane(r) for r in b_rows],
                             axis=0).astype(jnp.float32)  # (8, 128)
    return w_slab, b_slab


# ----------------------------------- main -------------------------------------

if __name__ == "__main__":
    num_layers = 2
    num_heads = 4
    m, nc, nt, d, ff = 2, 8, 8, 32, 64

    root = jax.random.PRNGKey(0)
    k_xc, k_xt, k_sa, k_ca = jax.random.split(root, 4)

    xc = jax.random.normal(k_xc, (m, nc, d), jnp.float32)
    xt = jax.random.normal(k_xt, (m, nt, d), jnp.float32)

    sa_w, sa_b = pack_layer_params(init_layer_params(k_sa, d, ff), num_heads)
    ca_w, ca_b = pack_layer_params(init_layer_params(k_ca, d, ff), num_heads)
    bias_slab = jnp.concatenate([sa_b, ca_b], axis=0)     # (16, 128) f32

    out = tnp_transformer_masked_encoder(xc, xt, sa_w, ca_w, bias_slab,
                                         num_layers, num_heads)
    out = jax.block_until_ready(out)
    assert out.shape == (m, nt, d), out.shape
    print("KERNEL_OK")
</pallas_src>

<mosaic_0001>
module attributes {stable_mosaic.version = 11 : i64} {
  func.func @_encoder_kernel(%arg0: i32, %arg1: memref<1x8x32xf32, #tpu.memory_space<vmem>>, %arg2: memref<1x8x32xf32, #tpu.memory_space<vmem>>, %arg3: memref<160x128xbf16, #tpu.memory_space<vmem>>, %arg4: memref<160x128xbf16, #tpu.memory_space<vmem>>, %arg5: memref<16x128xf32, #tpu.memory_space<vmem>>, %arg6: memref<1x8x32xf32, #tpu.memory_space<vmem>>) attributes {dimension_semantics = [#tpu.dimension_semantics<parallel>], iteration_bounds = array<i64: 2>, scalar_prefetch = 0 : i64, scratch_operands = 0 : i64, tpu.core_type = #tpu.core_type<tc>, window_params = [{transform_indices = @transform_0, window_bounds = array<i64: 1, 8, 32>}, {transform_indices = @transform_1, window_bounds = array<i64: 1, 8, 32>}, {pipeline_mode = #tpu.pipeline_mode<synchronous>, transform_indices = @transform_2, window_bounds = array<i64: 160, 128>}, {pipeline_mode = #tpu.pipeline_mode<synchronous>, transform_indices = @transform_3, window_bounds = array<i64: 160, 128>}, {pipeline_mode = #tpu.pipeline_mode<synchronous>, transform_indices = @transform_4, window_bounds = array<i64: 16, 128>}, {transform_indices = @transform_5, window_bounds = array<i64: 1, 8, 32>}]} {
    %c0 = arith.constant 0 : index
    %c0_0 = arith.constant 0 : index
    %c0_1 = arith.constant 0 : index
    %0 = vector.load %arg1[%c0, %c0_0, %c0_1] : memref<1x8x32xf32, #tpu.memory_space<vmem>>, vector<1x8x32xf32>
    %1 = vector.shape_cast %0 : vector<1x8x32xf32> to vector<8x32xf32>
    %c0_2 = arith.constant 0 : index
    %c0_3 = arith.constant 0 : index
    %c0_4 = arith.constant 0 : index
    %2 = vector.load %arg2[%c0_2, %c0_3, %c0_4] : memref<1x8x32xf32, #tpu.memory_space<vmem>>, vector<1x8x32xf32>
    %3 = vector.shape_cast %2 : vector<1x8x32xf32> to vector<8x32xf32>
    %4 = tpu.iota {dimensions = array<i32: 0>} : vector<8x8xi32>
    %5 = tpu.iota {dimensions = array<i32: 1>} : vector<8x8xi32>
    %6 = arith.cmpi sge, %4, %5 : vector<8x8xi32>
    %cst = arith.constant 0.000000e+00 : f32
    %cst_5 = arith.constant -1.000000e+30 : f32
    %7 = vector.broadcast %cst : f32 to vector<8x8xf32>
    %8 = vector.broadcast %cst_5 : f32 to vector<8x8xf32>
    %9 = arith.select %6, %7, %8 : vector<8x8xi1>, vector<8x8xf32>
    %c0_i32 = arith.constant 0 : i32
    %c0_6 = arith.constant 0 : index
    %c0_7 = arith.constant 0 : index
    %10 = vector.load %arg5[%c0_6, %c0_7] : memref<16x128xf32, #tpu.memory_space<vmem>>, vector<1x32xf32>
    %c1 = arith.constant 1 : index
    %c0_8 = arith.constant 0 : index
    %11 = vector.load %arg5[%c1, %c0_8] : memref<16x128xf32, #tpu.memory_space<vmem>>, vector<1x32xf32>
    %cst_9 = arith.constant dense<0.000000e+00> : vector<8xf32>
    %12 = vector.multi_reduction <add>, %1, %cst_9 [1] : vector<8x32xf32> to vector<8xf32>
    %13 = vector.shape_cast %12 : vector<8xf32> to vector<8x1xf32>
    %cst_10 = arith.constant 3.200000e+01 : f32
    %14 = vector.broadcast %cst_10 : f32 to vector<8x1xf32>
    %15 = arith.divf %13, %14 : vector<8x1xf32>
    %16 = vector.broadcast %15 : vector<8x1xf32> to vector<8x32xf32>
    %17 = arith.subf %1, %16 : vector<8x32xf32>
    %18 = arith.mulf %17, %17 : vector<8x32xf32>
    %cst_11 = arith.constant dense<0.000000e+00> : vector<8xf32>
    %19 = vector.multi_reduction <add>, %18, %cst_11 [1] : vector<8x32xf32> to vector<8xf32>
    %20 = vector.shape_cast %19 : vector<8xf32> to vector<8x1xf32>
    %cst_12 = arith.constant 3.200000e+01 : f32
    %21 = vector.broadcast %cst_12 : f32 to vector<8x1xf32>
    %22 = arith.divf %20, %21 : vector<8x1xf32>
    %cst_13 = arith.constant 9.99999974E-6 : f32
    %23 = vector.broadcast %cst_13 : f32 to vector<8x1xf32>
    %24 = arith.addf %22, %23 : vector<8x1xf32>
    %25 = math.rsqrt %24 : vector<8x1xf32>
    %26 = vector.broadcast %25 : vector<8x1xf32> to vector<8x32xf32>
    %27 = arith.mulf %17, %26 : vector<8x32xf32>
    %28 = vector.broadcast %10 : vector<1x32xf32> to vector<8x32xf32>
    %29 = arith.mulf %27, %28 : vector<8x32xf32>
    %30 = vector.broadcast %11 : vector<1x32xf32> to vector<8x32xf32>
    %31 = arith.addf %29, %30 : vector<8x32xf32>
    %32 = arith.truncf %31 : vector<8x32xf32> to vector<8x32xbf16>
    %c0_14 = arith.constant 0 : index
    %c0_15 = arith.constant 0 : index
    %33 = vector.load %arg3[%c0_14, %c0_15] : memref<160x128xbf16, #tpu.memory_space<vmem>>, vector<32x96xbf16>
    %cst_16 = arith.constant dense<0.000000e+00> : vector<8x96xf32>
    %34 = tpu.matmul %32, %33, %cst_16 {dimension_numbers = #tpu.dot_dimension_numbers<[1], [0], [0], [1], [0, 0, 1, 1], [], []>} : vector<8x32xbf16>, vector<32x96xbf16>, vector<8x96xf32> -> vector<8x96xf32>
    %c2 = arith.constant 2 : index
    %c0_17 = arith.constant 0 : index
    %35 = vector.load %arg5[%c2, %c0_17] : memref<16x128xf32, #tpu.memory_space<vmem>>, vector<1x96xf32>
    %36 = vector.broadcast %35 : vector<1x96xf32> to vector<8x96xf32>
    %37 = arith.addf %34, %36 : vector<8x96xf32>
    %38 = vector.extract_strided_slice %37 {offsets = [0, 0], sizes = [8, 32], strides = [1, 1]} : vector<8x96xf32> to vector<8x32xf32>
    %39 = vector.extract_strided_slice %37 {offsets = [0, 32], sizes = [8, 32], strides = [1, 1]} : vector<8x96xf32> to vector<8x32xf32>
    %40 = vector.extract_strided_slice %37 {offsets = [0, 64], sizes = [8, 32], strides = [1, 1]} : vector<8x96xf32> to vector<8x32xf32>
    %41 = vector.shape_cast %38 : vector<8x32xf32> to vector<8x4x8xf32>
    %42 = tpu.transpose %41, [1, 0, 2] : vector<8x4x8xf32> -> vector<4x8x8xf32>
    %43 = arith.truncf %42 : vector<4x8x8xf32> to vector<4x8x8xbf16>
    %44 = vector.shape_cast %39 : vector<8x32xf32> to vector<8x4x8xf32>
    %45 = tpu.transpose %44, [1, 0, 2] : vector<8x4x8xf32> -> vector<4x8x8xf32>
    %46 = arith.truncf %45 : vector<4x8x8xf32> to vector<4x8x8xbf16>
    %47 = vector.shape_cast %40 : vector<8x32xf32> to vector<8x4x8xf32>
    %48 = tpu.transpose %47, [1, 0, 2] : vector<8x4x8xf32> -> vector<4x8x8xf32>
    %49 = arith.truncf %48 : vector<4x8x8xf32> to vector<4x8x8xbf16>
    "tpu.trace_start"() <{level = 10 : i32, message = "gqe,gke->gqk"}> : () -> ()
    %cst_18 = arith.constant dense<0.000000e+00> : vector<4x8x8xf32>
    %50 = tpu.matmul %43, %46, %cst_18 {dimension_numbers = #tpu.dot_dimension_numbers<[2], [2], [1], [1], [0, 0, 0, 1, 1, 1], [0], [0]>} : vector<4x8x8xbf16>, vector<4x8x8xbf16>, vector<4x8x8xf32> -> vector<4x8x8xf32>
    "tpu.trace_stop"() : () -> ()
    %51 = vector.shape_cast %9 : vector<8x8xf32> to vector<1x8x8xf32>
    %52 = vector.broadcast %51 : vector<1x8x8xf32> to vector<4x8x8xf32>
    %53 = arith.addf %50, %52 : vector<4x8x8xf32>
    %cst_19 = arith.constant dense<0xFF800000> : vector<4x8xf32>
    %54 = vector.multi_reduction <maximumf>, %53, %cst_19 [2] : vector<4x8x8xf32> to vector<4x8xf32>
    %55 = vector.shape_cast %54 : vector<4x8xf32> to vector<4x8x1xf32>
    %56 = vector.broadcast %55 : vector<4x8x1xf32> to vector<4x8x8xf32>
    %57 = arith.subf %53, %56 : vector<4x8x8xf32>
    %58 = math.exp %57 : vector<4x8x8xf32>
    %cst_20 = arith.constant dense<0.000000e+00> : vector<4x8xf32>
    %59 = vector.multi_reduction <add>, %58, %cst_20 [2] : vector<4x8x8xf32> to vector<4x8xf32>
    %60 = vector.shape_cast %59 : vector<4x8xf32> to vector<4x8x1xf32>
    %61 = vector.broadcast %60 : vector<4x8x1xf32> to vector<4x8x8xf32>
    %62 = arith.divf %58, %61 : vector<4x8x8xf32>
    %63 = arith.truncf %62 : vector<4x8x8xf32> to vector<4x8x8xbf16>
    "tpu.trace_start"() <{level = 10 : i32, message = "gqk,gke->gqe"}> : () -> ()
    %cst_21 = arith.constant dense<0.000000e+00> : vector<4x8x8xf32>
    %64 = tpu.matmul %63, %49, %cst_21 {dimension_numbers = #tpu.dot_dimension_numbers<[2], [1], [1], [2], [0, 0, 0, 1, 1, 2], [0], [0]>} : vector<4x8x8xbf16>, vector<4x8x8xbf16>, vector<4x8x8xf32> -> vector<4x8x8xf32>
    "tpu.trace_stop"() : () -> ()
    %65 = tpu.transpose %64, [1, 0, 2] : vector<4x8x8xf32> -> vector<8x4x8xf32>
    %66 = vector.shape_cast %65 : vector<8x4x8xf32> to vector<8x32xf32>
    %67 = arith.truncf %66 : vector<8x32xf32> to vector<8x32xbf16>
    %c32 = arith.constant 32 : index
    %c0_22 = arith.constant 0 : index
    %68 = vector.load %arg3[%c32, %c0_22] : memref<160x128xbf16, #tpu.memory_space<vmem>>, vector<32x32xbf16>
    %cst_23 = arith.constant dense<0.000000e+00> : vector<8x32xf32>
    %69 = tpu.matmul %67, %68, %cst_23 {dimension_numbers = #tpu.dot_dimension_numbers<[1], [0], [0], [1], [0, 0, 1, 1], [], []>} : vector<8x32xbf16>, vector<32x32xbf16>, vector<8x32xf32> -> vector<8x32xf32>
    %c3 = arith.constant 3 : index
    %c0_24 = arith.constant 0 : index
    %70 = vector.load %arg5[%c3, %c0_24] : memref<16x128xf32, #tpu.memory_space<vmem>>, vector<1x32xf32>
    %71 = vector.broadcast %70 : vector<1x32xf32> to vector<8x32xf32>
    %72 = arith.addf %69, %71 : vector<8x32xf32>
    %73 = arith.addf %1, %72 : vector<8x32xf32>
    %c4 = arith.constant 4 : index
    %c0_25 = arith.constant 0 : index
    %74 = vector.load %arg5[%c4, %c0_25] : memref<16x128xf32, #tpu.memory_space<vmem>>, vector<1x32xf32>
    %c5 = arith.constant 5 : index
    %c0_26 = arith.constant 0 : index
    %75 = vector.load %arg5[%c5, %c0_26] : memref<16x128xf32, #tpu.memory_space<vmem>>, vector<1x32xf32>
    %cst_27 = arith.constant dense<0.000000e+00> : vector<8xf32>
    %76 = vector.multi_reduction <add>, %73, %cst_27 [1] : vector<8x32xf32> to vector<8xf32>
    %77 = vector.shape_cast %76 : vector<8xf32> to vector<8x1xf32>
    %cst_28 = arith.constant 3.200000e+01 : f32
    %78 = vector.broadcast %cst_28 : f32 to vector<8x1xf32>
    %79 = arith.divf %77, %78 : vector<8x1xf32>
    %80 = vector.broadcast %79 : vector<8x1xf32> to vector<8x32xf32>
    %81 = arith.subf %73, %80 : vector<8x32xf32>
    %82 = arith.mulf %81, %81 : vector<8x32xf32>
    %cst_29 = arith.constant dense<0.000000e+00> : vector<8xf32>
    %83 = vector.multi_reduction <add>, %82, %cst_29 [1] : vector<8x32xf32> to vector<8xf32>
    %84 = vector.shape_cast %83 : vector<8xf32> to vector<8x1xf32>
    %cst_30 = arith.constant 3.200000e+01 : f32
    %85 = vector.broadcast %cst_30 : f32 to vector<8x1xf32>
    %86 = arith.divf %84, %85 : vector<8x1xf32>
    %cst_31 = arith.constant 9.99999974E-6 : f32
    %87 = vector.broadcast %cst_31 : f32 to vector<8x1xf32>
    %88 = arith.addf %86, %87 : vector<8x1xf32>
    %89 = math.rsqrt %88 : vector<8x1xf32>
    %90 = vector.broadcast %89 : vector<8x1xf32> to vector<8x32xf32>
    %91 = arith.mulf %81, %90 : vector<8x32xf32>
    %92 = vector.broadcast %74 : vector<1x32xf32> to vector<8x32xf32>
    %93 = arith.mulf %91, %92 : vector<8x32xf32>
    %94 = vector.broadcast %75 : vector<1x32xf32> to vector<8x32xf32>
    %95 = arith.addf %93, %94 : vector<8x32xf32>
    %96 = arith.truncf %95 : vector<8x32xf32> to vector<8x32xbf16>
    %c64 = arith.constant 64 : index
    %c0_32 = arith.constant 0 : index
    %97 = vector.load %arg3[%c64, %c0_32] : memref<160x128xbf16, #tpu.memory_space<vmem>>, vector<32x64xbf16>
    %cst_33 = arith.constant dense<0.000000e+00> : vector<8x64xf32>
    %98 = tpu.matmul %96, %97, %cst_33 {dimension_numbers = #tpu.dot_dimension_numbers<[1], [0], [0], [1], [0, 0, 1, 1], [], []>} : vector<8x32xbf16>, vector<32x64xbf16>, vector<8x64xf32> -> vector<8x64xf32>
    %c6 = arith.constant 6 : index
    %c0_34 = arith.constant 0 : index
    %99 = vector.load %arg5[%c6, %c0_34] : memref<16x128xf32, #tpu.memory_space<vmem>>, vector<1x64xf32>
    %100 = vector.broadcast %99 : vector<1x64xf32> to vector<8x64xf32>
    %101 = arith.addf %98, %100 : vector<8x64xf32>
    %cst_35 = arith.constant 0.000000e+00 : f32
    %102 = vector.broadcast %cst_35 : f32 to vector<8x64xf32>
    %103 = arith.maximumf %101, %102 : vector<8x64xf32>
    %104 = arith.truncf %103 : vector<8x64xf32> to vector<8x64xbf16>
    %c96 = arith.constant 96 : index
    %c0_36 = arith.constant 0 : index
    %105 = vector.load %arg3[%c96, %c0_36] : memref<160x128xbf16, #tpu.memory_space<vmem>>, vector<64x32xbf16>
    %cst_37 = arith.constant dense<0.000000e+00> : vector<8x32xf32>
    %106 = tpu.matmul %104, %105, %cst_37 {dimension_numbers = #tpu.dot_dimension_numbers<[1], [0], [0], [1], [0, 0, 1, 1], [], []>} : vector<8x64xbf16>, vector<64x32xbf16>, vector<8x32xf32> -> vector<8x32xf32>
    %c7 = arith.constant 7 : index
    %c0_38 = arith.constant 0 : index
    %107 = vector.load %arg5[%c7, %c0_38] : memref<16x128xf32, #tpu.memory_space<vmem>>, vector<1x32xf32>
    %108 = vector.broadcast %107 : vector<1x32xf32> to vector<8x32xf32>
    %109 = arith.addf %106, %108 : vector<8x32xf32>
    %110 = arith.addf %73, %109 : vector<8x32xf32>
    %c8 = arith.constant 8 : index
    %c0_39 = arith.constant 0 : index
    %111 = vector.load %arg5[%c8, %c0_39] : memref<16x128xf32, #tpu.memory_space<vmem>>, vector<1x32xf32>
    %c9 = arith.constant 9 : index
    %c0_40 = arith.constant 0 : index
    %112 = vector.load %arg5[%c9, %c0_40] : memref<16x128xf32, #tpu.memory_space<vmem>>, vector<1x32xf32>
    %cst_41 = arith.constant dense<0.000000e+00> : vector<8xf32>
    %113 = vector.multi_reduction <add>, %3, %cst_41 [1] : vector<8x32xf32> to vector<8xf32>
    %114 = vector.shape_cast %113 : vector<8xf32> to vector<8x1xf32>
    %cst_42 = arith.constant 3.200000e+01 : f32
    %115 = vector.broadcast %cst_42 : f32 to vector<8x1xf32>
    %116 = arith.divf %114, %115 : vector<8x1xf32>
    %117 = vector.broadcast %116 : vector<8x1xf32> to vector<8x32xf32>
    %118 = arith.subf %3, %117 : vector<8x32xf32>
    %119 = arith.mulf %118, %118 : vector<8x32xf32>
    %cst_43 = arith.constant dense<0.000000e+00> : vector<8xf32>
    %120 = vector.multi_reduction <add>, %119, %cst_43 [1] : vector<8x32xf32> to vector<8xf32>
    %121 = vector.shape_cast %120 : vector<8xf32> to vector<8x1xf32>
    %cst_44 = arith.constant 3.200000e+01 : f32
    %122 = vector.broadcast %cst_44 : f32 to vector<8x1xf32>
    %123 = arith.divf %121, %122 : vector<8x1xf32>
    %cst_45 = arith.constant 9.99999974E-6 : f32
    %124 = vector.broadcast %cst_45 : f32 to vector<8x1xf32>
    %125 = arith.addf %123, %124 : vector<8x1xf32>
    %126 = math.rsqrt %125 : vector<8x1xf32>
    %127 = vector.broadcast %126 : vector<8x1xf32> to vector<8x32xf32>
    %128 = arith.mulf %118, %127 : vector<8x32xf32>
    %129 = vector.broadcast %111 : vector<1x32xf32> to vector<8x32xf32>
    %130 = arith.mulf %128, %129 : vector<8x32xf32>
    %131 = vector.broadcast %112 : vector<1x32xf32> to vector<8x32xf32>
    %132 = arith.addf %130, %131 : vector<8x32xf32>
    %133 = arith.truncf %132 : vector<8x32xf32> to vector<8x32xbf16>
    %c0_46 = arith.constant 0 : index
    %c0_47 = arith.constant 0 : index
    %134 = vector.load %arg4[%c0_46, %c0_47] : memref<160x128xbf16, #tpu.memory_space<vmem>>, vector<32x32xbf16>
    %cst_48 = arith.constant dense<0.000000e+00> : vector<8x32xf32>
    %135 = tpu.matmul %133, %134, %cst_48 {dimension_numbers = #tpu.dot_dimension_numbers<[1], [0], [0], [1], [0, 0, 1, 1], [], []>} : vector<8x32xbf16>, vector<32x32xbf16>, vector<8x32xf32> -> vector<8x32xf32>
    %c10 = arith.constant 10 : index
    %c0_49 = arith.constant 0 : index
    %136 = vector.load %arg5[%c10, %c0_49] : memref<16x128xf32, #tpu.memory_space<vmem>>, vector<1x32xf32>
    %137 = vector.broadcast %136 : vector<1x32xf32> to vector<8x32xf32>
    %138 = arith.addf %135, %137 : vector<8x32xf32>
    %139 = arith.truncf %110 : vector<8x32xf32> to vector<8x32xbf16>
    %c0_50 = arith.constant 0 : index
    %c32_51 = arith.constant 32 : index
    %140 = vector.load %arg4[%c0_50, %c32_51] : memref<160x128xbf16, #tpu.memory_space<vmem>>, vector<32x64xbf16>
    %cst_52 = arith.constant dense<0.000000e+00> : vector<8x64xf32>
    %141 = tpu.matmul %139, %140, %cst_52 {dimension_numbers = #tpu.dot_dimension_numbers<[1], [0], [0], [1], [0, 0, 1, 1], [], []>} : vector<8x32xbf16>, vector<32x64xbf16>, vector<8x64xf32> -> vector<8x64xf32>
    %c10_53 = arith.constant 10 : index
    %c32_54 = arith.constant 32 : index
    %142 = vector.load %arg5[%c10_53, %c32_54] : memref<16x128xf32, #tpu.memory_space<vmem>>, vector<1x64xf32>
    %143 = vector.broadcast %142 : vector<1x64xf32> to vector<8x64xf32>
    %144 = arith.addf %141, %143 : vector<8x64xf32>
    %145 = vector.extract_strided_slice %144 {offsets = [0, 0], sizes = [8, 32], strides = [1, 1]} : vector<8x64xf32> to vector<8x32xf32>
    %146 = vector.extract_strided_slice %144 {offsets = [0, 32], sizes = [8, 32], strides = [1, 1]} : vector<8x64xf32> to vector<8x32xf32>
    %147 = vector.shape_cast %138 : vector<8x32xf32> to vector<8x4x8xf32>
    %148 = tpu.transpose %147, [1, 0, 2] : vector<8x4x8xf32> -> vector<4x8x8xf32>
    %149 = arith.truncf %148 : vector<4x8x8xf32> to vector<4x8x8xbf16>
    %150 = vector.shape_cast %145 : vector<8x32xf32> to vector<8x4x8xf32>
    %151 = tpu.transpose %150, [1, 0, 2] : vector<8x4x8xf32> -> vector<4x8x8xf32>
    %152 = arith.truncf %151 : vector<4x8x8xf32> to vector<4x8x8xbf16>
    %153 = vector.shape_cast %146 : vector<8x32xf32> to vector<8x4x8xf32>
    %154 = tpu.transpose %153, [1, 0, 2] : vector<8x4x8xf32> -> vector<4x8x8xf32>
    %155 = arith.truncf %154 : vector<4x8x8xf32> to vector<4x8x8xbf16>
    "tpu.trace_start"() <{level = 10 : i32, message = "gqe,gke->gqk"}> : () -> ()
    %cst_55 = arith.constant dense<0.000000e+00> : vector<4x8x8xf32>
    %156 = tpu.matmul %149, %152, %cst_55 {dimension_numbers = #tpu.dot_dimension_numbers<[2], [2], [1], [1], [0, 0, 0, 1, 1, 1], [0], [0]>} : vector<4x8x8xbf16>, vector<4x8x8xbf16>, vector<4x8x8xf32> -> vector<4x8x8xf32>
    "tpu.trace_stop"() : () -> ()
    %cst_56 = arith.constant dense<0xFF800000> : vector<4x8xf32>
    %157 = vector.multi_reduction <maximumf>, %156, %cst_56 [2] : vector<4x8x8xf32> to vector<4x8xf32>
    %158 = vector.shape_cast %157 : vector<4x8xf32> to vector<4x8x1xf32>
    %159 = vector.broadcast %158 : vector<4x8x1xf32> to vector<4x8x8xf32>
    %160 = arith.subf %156, %159 : vector<4x8x8xf32>
    %161 = math.exp %160 : vector<4x8x8xf32>
    %cst_57 = arith.constant dense<0.000000e+00> : vector<4x8xf32>
    %162 = vector.multi_reduction <add>, %161, %cst_57 [2] : vector<4x8x8xf32> to vector<4x8xf32>
    %163 = vector.shape_cast %162 : vector<4x8xf32> to vector<4x8x1xf32>
    %164 = vector.broadcast %163 : vector<4x8x1xf32> to vector<4x8x8xf32>
    %165 = arith.divf %161, %164 : vector<4x8x8xf32>
    %166 = arith.truncf %165 : vector<4x8x8xf32> to vector<4x8x8xbf16>
    "tpu.trace_start"() <{level = 10 : i32, message = "gqk,gke->gqe"}> : () -> ()
    %cst_58 = arith.constant dense<0.000000e+00> : vector<4x8x8xf32>
    %167 = tpu.matmul %166, %155, %cst_58 {dimension_numbers = #tpu.dot_dimension_numbers<[2], [1], [1], [2], [0, 0, 0, 1, 1, 2], [0], [0]>} : vector<4x8x8xbf16>, vector<4x8x8xbf16>, vector<4x8x8xf32> -> vector<4x8x8xf32>
    "tpu.trace_stop"() : () -> ()
    %168 = tpu.transpose %167, [1, 0, 2] : vector<4x8x8xf32> -> vector<8x4x8xf32>
    %169 = vector.shape_cast %168 : vector<8x4x8xf32> to vector<8x32xf32>
    %170 = arith.truncf %169 : vector<8x32xf32> to vector<8x32xbf16>
    %c32_59 = arith.constant 32 : index
    %c0_60 = arith.constant 0 : index
    %171 = vector.load %arg4[%c32_59, %c0_60] : memref<160x128xbf16, #tpu.memory_space<vmem>>, vector<32x32xbf16>
    %cst_61 = arith.constant dense<0.000000e+00> : vector<8x32xf32>
    %172 = tpu.matmul %170, %171, %cst_61 {dimension_numbers = #tpu.dot_dimension_numbers<[1], [0], [0], [1], [0, 0, 1, 1], [], []>} : vector<8x32xbf16>, vector<32x32xbf16>, vector<8x32xf32> -> vector<8x32xf32>
    %c11 = arith.constant 11 : index
    %c0_62 = arith.constant 0 : index
    %173 = vector.load %arg5[%c11, %c0_62] : memref<16x128xf32, #tpu.memory_space<vmem>>, vector<1x32xf32>
    %174 = vector.broadcast %173 : vector<1x32xf32> to vector<8x32xf32>
    %175 = arith.addf %172, %174 : vector<8x32xf32>
    %176 = arith.addf %3, %175 : vector<8x32xf32>
    %c12 = arith.constant 12 : index
    %c0_63 = arith.constant 0 : index
    %177 = vector.load %arg5[%c12, %c0_63] : memref<16x128xf32, #tpu.memory_space<vmem>>, vector<1x32xf32>
    %c13 = arith.constant 13 : index
    %c0_64 = arith.constant 0 : index
    %178 = vector.load %arg5[%c13, %c0_64] : memref<16x128xf32, #tpu.memory_space<vmem>>, vector<1x32xf32>
    %cst_65 = arith.constant dense<0.000000e+00> : vector<8xf32>
    %179 = vector.multi_reduction <add>, %176, %cst_65 [1] : vector<8x32xf32> to vector<8xf32>
    %180 = vector.shape_cast %179 : vector<8xf32> to vector<8x1xf32>
    %cst_66 = arith.constant 3.200000e+01 : f32
    %181 = vector.broadcast %cst_66 : f32 to vector<8x1xf32>
    %182 = arith.divf %180, %181 : vector<8x1xf32>
    %183 = vector.broadcast %182 : vector<8x1xf32> to vector<8x32xf32>
    %184 = arith.subf %176, %183 : vector<8x32xf32>
    %185 = arith.mulf %184, %184 : vector<8x32xf32>
    %cst_67 = arith.constant dense<0.000000e+00> : vector<8xf32>
    %186 = vector.multi_reduction <add>, %185, %cst_67 [1] : vector<8x32xf32> to vector<8xf32>
    %187 = vector.shape_cast %186 : vector<8xf32> to vector<8x1xf32>
    %cst_68 = arith.constant 3.200000e+01 : f32
    %188 = vector.broadcast %cst_68 : f32 to vector<8x1xf32>
    %189 = arith.divf %187, %188 : vector<8x1xf32>
    %cst_69 = arith.constant 9.99999974E-6 : f32
    %190 = vector.broadcast %cst_69 : f32 to vector<8x1xf32>
    %191 = arith.addf %189, %190 : vector<8x1xf32>
    %192 = math.rsqrt %191 : vector<8x1xf32>
    %193 = vector.broadcast %192 : vector<8x1xf32> to vector<8x32xf32>
    %194 = arith.mulf %184, %193 : vector<8x32xf32>
    %195 = vector.broadcast %177 : vector<1x32xf32> to vector<8x32xf32>
    %196 = arith.mulf %194, %195 : vector<8x32xf32>
    %197 = vector.broadcast %178 : vector<1x32xf32> to vector<8x32xf32>
    %198 = arith.addf %196, %197 : vector<8x32xf32>
    %199 = arith.truncf %198 : vector<8x32xf32> to vector<8x32xbf16>
    %c64_70 = arith.constant 64 : index
    %c0_71 = arith.constant 0 : index
    %200 = vector.load %arg4[%c64_70, %c0_71] : memref<160x128xbf16, #tpu.memory_space<vmem>>, vector<32x64xbf16>
    %cst_72 = arith.constant dense<0.000000e+00> : vector<8x64xf32>
    %201 = tpu.matmul %199, %200, %cst_72 {dimension_numbers = #tpu.dot_dimension_numbers<[1], [0], [0], [1], [0, 0, 1, 1], [], []>} : vector<8x32xbf16>, vector<32x64xbf16>, vector<8x64xf32> -> vector<8x64xf32>
    %c14 = arith.constant 14 : index
    %c0_73 = arith.constant 0 : index
    %202 = vector.load %arg5[%c14, %c0_73] : memref<16x128xf32, #tpu.memory_space<vmem>>, vector<1x64xf32>
    %203 = vector.broadcast %202 : vector<1x64xf32> to vector<8x64xf32>
    %204 = arith.addf %201, %203 : vector<8x64xf32>
    %cst_74 = arith.constant 0.000000e+00 : f32
    %205 = vector.broadcast %cst_74 : f32 to vector<8x64xf32>
    %206 = arith.maximumf %204, %205 : vector<8x64xf32>
    %207 = arith.truncf %206 : vector<8x64xf32> to vector<8x64xbf16>
    %c96_75 = arith.constant 96 : index
    %c0_76 = arith.constant 0 : index
    %208 = vector.load %arg4[%c96_75, %c0_76] : memref<160x128xbf16, #tpu.memory_space<vmem>>, vector<64x32xbf16>
    %cst_77 = arith.constant dense<0.000000e+00> : vector<8x32xf32>
    %209 = tpu.matmul %207, %208, %cst_77 {dimension_numbers = #tpu.dot_dimension_numbers<[1], [0], [0], [1], [0, 0, 1, 1], [], []>} : vector<8x64xbf16>, vector<64x32xbf16>, vector<8x32xf32> -> vector<8x32xf32>
    %c15 = arith.constant 15 : index
    %c0_78 = arith.constant 0 : index
    %210 = vector.load %arg5[%c15, %c0_78] : memref<16x128xf32, #tpu.memory_space<vmem>>, vector<1x32xf32>
    %211 = vector.broadcast %210 : vector<1x32xf32> to vector<8x32xf32>
    %212 = arith.addf %209, %211 : vector<8x32xf32>
    %213 = arith.addf %176, %212 : vector<8x32xf32>
    %c1_i32 = arith.constant 1 : i32
    %c0_79 = arith.constant 0 : index
    %c0_80 = arith.constant 0 : index
    %214 = vector.load %arg5[%c0_79, %c0_80] : memref<16x128xf32, #tpu.memory_space<vmem>>, vector<1x32xf32>
    %c1_81 = arith.constant 1 : index
    %c0_82 = arith.constant 0 : index
    %215 = vector.load %arg5[%c1_81, %c0_82] : memref<16x128xf32, #tpu.memory_space<vmem>>, vector<1x32xf32>
    %cst_83 = arith.constant dense<0.000000e+00> : vector<8xf32>
    %216 = vector.multi_reduction <add>, %110, %cst_83 [1] : vector<8x32xf32> to vector<8xf32>
    %217 = vector.shape_cast %216 : vector<8xf32> to vector<8x1xf32>
    %cst_84 = arith.constant 3.200000e+01 : f32
    %218 = vector.broadcast %cst_84 : f32 to vector<8x1xf32>
    %219 = arith.divf %217, %218 : vector<8x1xf32>
    %220 = vector.broadcast %219 : vector<8x1xf32> to vector<8x32xf32>
    %221 = arith.subf %110, %220 : vector<8x32xf32>
    %222 = arith.mulf %221, %221 : vector<8x32xf32>
    %cst_85 = arith.constant dense<0.000000e+00> : vector<8xf32>
    %223 = vector.multi_reduction <add>, %222, %cst_85 [1] : vector<8x32xf32> to vector<8xf32>
    %224 = vector.shape_cast %223 : vector<8xf32> to vector<8x1xf32>
    %cst_86 = arith.constant 3.200000e+01 : f32
    %225 = vector.broadcast %cst_86 : f32 to vector<8x1xf32>
    %226 = arith.divf %224, %225 : vector<8x1xf32>
    %cst_87 = arith.constant 9.99999974E-6 : f32
    %227 = vector.broadcast %cst_87 : f32 to vector<8x1xf32>
    %228 = arith.addf %226, %227 : vector<8x1xf32>
    %229 = math.rsqrt %228 : vector<8x1xf32>
    %230 = vector.broadcast %229 : vector<8x1xf32> to vector<8x32xf32>
    %231 = arith.mulf %221, %230 : vector<8x32xf32>
    %232 = vector.broadcast %214 : vector<1x32xf32> to vector<8x32xf32>
    %233 = arith.mulf %231, %232 : vector<8x32xf32>
    %234 = vector.broadcast %215 : vector<1x32xf32> to vector<8x32xf32>
    %235 = arith.addf %233, %234 : vector<8x32xf32>
    %236 = arith.truncf %235 : vector<8x32xf32> to vector<8x32xbf16>
    %c0_88 = arith.constant 0 : index
    %c0_89 = arith.constant 0 : index
    %237 = vector.load %arg3[%c0_88, %c0_89] : memref<160x128xbf16, #tpu.memory_space<vmem>>, vector<32x96xbf16>
    %cst_90 = arith.constant dense<0.000000e+00> : vector<8x96xf32>
    %238 = tpu.matmul %236, %237, %cst_90 {dimension_numbers = #tpu.dot_dimension_numbers<[1], [0], [0], [1], [0, 0, 1, 1], [], []>} : vector<8x32xbf16>, vector<32x96xbf16>, vector<8x96xf32> -> vector<8x96xf32>
    %c2_91 = arith.constant 2 : index
    %c0_92 = arith.constant 0 : index
    %239 = vector.load %arg5[%c2_91, %c0_92] : memref<16x128xf32, #tpu.memory_space<vmem>>, vector<1x96xf32>
    %240 = vector.broadcast %239 : vector<1x96xf32> to vector<8x96xf32>
    %241 = arith.addf %238, %240 : vector<8x96xf32>
    %242 = vector.extract_strided_slice %241 {offsets = [0, 0], sizes = [8, 32], strides = [1, 1]} : vector<8x96xf32> to vector<8x32xf32>
    %243 = vector.extract_strided_slice %241 {offsets = [0, 32], sizes = [8, 32], strides = [1, 1]} : vector<8x96xf32> to vector<8x32xf32>
    %244 = vector.extract_strided_slice %241 {offsets = [0, 64], sizes = [8, 32], strides = [1, 1]} : vector<8x96xf32> to vector<8x32xf32>
    %245 = vector.shape_cast %242 : vector<8x32xf32> to vector<8x4x8xf32>
    %246 = tpu.transpose %245, [1, 0, 2] : vector<8x4x8xf32> -> vector<4x8x8xf32>
    %247 = arith.truncf %246 : vector<4x8x8xf32> to vector<4x8x8xbf16>
    %248 = vector.shape_cast %243 : vector<8x32xf32> to vector<8x4x8xf32>
    %249 = tpu.transpose %248, [1, 0, 2] : vector<8x4x8xf32> -> vector<4x8x8xf32>
    %250 = arith.truncf %249 : vector<4x8x8xf32> to vector<4x8x8xbf16>
    %251 = vector.shape_cast %244 : vector<8x32xf32> to vector<8x4x8xf32>
    %252 = tpu.transpose %251, [1, 0, 2] : vector<8x4x8xf32> -> vector<4x8x8xf32>
    %253 = arith.truncf %252 : vector<4x8x8xf32> to vector<4x8x8xbf16>
    "tpu.trace_start"() <{level = 10 : i32, message = "gqe,gke->gqk"}> : () -> ()
    %cst_93 = arith.constant dense<0.000000e+00> : vector<4x8x8xf32>
    %254 = tpu.matmul %247, %250, %cst_93 {dimension_numbers = #tpu.dot_dimension_numbers<[2], [2], [1], [1], [0, 0, 0, 1, 1, 1], [0], [0]>} : vector<4x8x8xbf16>, vector<4x8x8xbf16>, vector<4x8x8xf32> -> vector<4x8x8xf32>
    "tpu.trace_stop"() : () -> ()
    %255 = vector.shape_cast %9 : vector<8x8xf32> to vector<1x8x8xf32>
    %256 = vector.broadcast %255 : vector<1x8x8xf32> to vector<4x8x8xf32>
    %257 = arith.addf %254, %256 : vector<4x8x8xf32>
    %cst_94 = arith.constant dense<0xFF800000> : vector<4x8xf32>
    %258 = vector.multi_reduction <maximumf>, %257, %cst_94 [2] : vector<4x8x8xf32> to vector<4x8xf32>
    %259 = vector.shape_cast %258 : vector<4x8xf32> to vector<4x8x1xf32>
    %260 = vector.broadcast %259 : vector<4x8x1xf32> to vector<4x8x8xf32>
    %261 = arith.subf %257, %260 : vector<4x8x8xf32>
    %262 = math.exp %261 : vector<4x8x8xf32>
    %cst_95 = arith.constant dense<0.000000e+00> : vector<4x8xf32>
    %263 = vector.multi_reduction <add>, %262, %cst_95 [2] : vector<4x8x8xf32> to vector<4x8xf32>
    %264 = vector.shape_cast %263 : vector<4x8xf32> to vector<4x8x1xf32>
    %265 = vector.broadcast %264 : vector<4x8x1xf32> to vector<4x8x8xf32>
    %266 = arith.divf %262, %265 : vector<4x8x8xf32>
    %267 = arith.truncf %266 : vector<4x8x8xf32> to vector<4x8x8xbf16>
    "tpu.trace_start"() <{level = 10 : i32, message = "gqk,gke->gqe"}> : () -> ()
    %cst_96 = arith.constant dense<0.000000e+00> : vector<4x8x8xf32>
    %268 = tpu.matmul %267, %253, %cst_96 {dimension_numbers = #tpu.dot_dimension_numbers<[2], [1], [1], [2], [0, 0, 0, 1, 1, 2], [0], [0]>} : vector<4x8x8xbf16>, vector<4x8x8xbf16>, vector<4x8x8xf32> -> vector<4x8x8xf32>
    "tpu.trace_stop"() : () -> ()
    %269 = tpu.transpose %268, [1, 0, 2] : vector<4x8x8xf32> -> vector<8x4x8xf32>
    %270 = vector.shape_cast %269 : vector<8x4x8xf32> to vector<8x32xf32>
    %271 = arith.truncf %270 : vector<8x32xf32> to vector<8x32xbf16>
    %c32_97 = arith.constant 32 : index
    %c0_98 = arith.constant 0 : index
    %272 = vector.load %arg3[%c32_97, %c0_98] : memref<160x128xbf16, #tpu.memory_space<vmem>>, vector<32x32xbf16>
    %cst_99 = arith.constant dense<0.000000e+00> : vector<8x32xf32>
    %273 = tpu.matmul %271, %272, %cst_99 {dimension_numbers = #tpu.dot_dimension_numbers<[1], [0], [0], [1], [0, 0, 1, 1], [], []>} : vector<8x32xbf16>, vector<32x32xbf16>, vector<8x32xf32> -> vector<8x32xf32>
    %c3_100 = arith.constant 3 : index
    %c0_101 = arith.constant 0 : index
    %274 = vector.load %arg5[%c3_100, %c0_101] : memref<16x128xf32, #tpu.memory_space<vmem>>, vector<1x32xf32>
    %275 = vector.broadcast %274 : vector<1x32xf32> to vector<8x32xf32>
    %276 = arith.addf %273, %275 : vector<8x32xf32>
    %277 = arith.addf %110, %276 : vector<8x32xf32>
    %c4_102 = arith.constant 4 : index
    %c0_103 = arith.constant 0 : index
    %278 = vector.load %arg5[%c4_102, %c0_103] : memref<16x128xf32, #tpu.memory_space<vmem>>, vector<1x32xf32>
    %c5_104 = arith.constant 5 : index
    %c0_105 = arith.constant 0 : index
    %279 = vector.load %arg5[%c5_104, %c0_105] : memref<16x128xf32, #tpu.memory_space<vmem>>, vector<1x32xf32>
    %cst_106 = arith.constant dense<0.000000e+00> : vector<8xf32>
    %280 = vector.multi_reduction <add>, %277, %cst_106 [1] : vector<8x32xf32> to vector<8xf32>
    %281 = vector.shape_cast %280 : vector<8xf32> to vector<8x1xf32>
    %cst_107 = arith.constant 3.200000e+01 : f32
    %282 = vector.broadcast %cst_107 : f32 to vector<8x1xf32>
    %283 = arith.divf %281, %282 : vector<8x1xf32>
    %284 = vector.broadcast %283 : vector<8x1xf32> to vector<8x32xf32>
    %285 = arith.subf %277, %284 : vector<8x32xf32>
    %286 = arith.mulf %285, %285 : vector<8x32xf32>
    %cst_108 = arith.constant dense<0.000000e+00> : vector<8xf32>
    %287 = vector.multi_reduction <add>, %286, %cst_108 [1] : vector<8x32xf32> to vector<8xf32>
    %288 = vector.shape_cast %287 : vector<8xf32> to vector<8x1xf32>
    %cst_109 = arith.constant 3.200000e+01 : f32
    %289 = vector.broadcast %cst_109 : f32 to vector<8x1xf32>
    %290 = arith.divf %288, %289 : vector<8x1xf32>
    %cst_110 = arith.constant 9.99999974E-6 : f32
    %291 = vector.broadcast %cst_110 : f32 to vector<8x1xf32>
    %292 = arith.addf %290, %291 : vector<8x1xf32>
    %293 = math.rsqrt %292 : vector<8x1xf32>
    %294 = vector.broadcast %293 : vector<8x1xf32> to vector<8x32xf32>
    %295 = arith.mulf %285, %294 : vector<8x32xf32>
    %296 = vector.broadcast %278 : vector<1x32xf32> to vector<8x32xf32>
    %297 = arith.mulf %295, %296 : vector<8x32xf32>
    %298 = vector.broadcast %279 : vector<1x32xf32> to vector<8x32xf32>
    %299 = arith.addf %297, %298 : vector<8x32xf32>
    %300 = arith.truncf %299 : vector<8x32xf32> to vector<8x32xbf16>
    %c64_111 = arith.constant 64 : index
    %c0_112 = arith.constant 0 : index
    %301 = vector.load %arg3[%c64_111, %c0_112] : memref<160x128xbf16, #tpu.memory_space<vmem>>, vector<32x64xbf16>
    %cst_113 = arith.constant dense<0.000000e+00> : vector<8x64xf32>
    %302 = tpu.matmul %300, %301, %cst_113 {dimension_numbers = #tpu.dot_dimension_numbers<[1], [0], [0], [1], [0, 0, 1, 1], [], []>} : vector<8x32xbf16>, vector<32x64xbf16>, vector<8x64xf32> -> vector<8x64xf32>
    %c6_114 = arith.constant 6 : index
    %c0_115 = arith.constant 0 : index
    %303 = vector.load %arg5[%c6_114, %c0_115] : memref<16x128xf32, #tpu.memory_space<vmem>>, vector<1x64xf32>
    %304 = vector.broadcast %303 : vector<1x64xf32> to vector<8x64xf32>
    %305 = arith.addf %302, %304 : vector<8x64xf32>
    %cst_116 = arith.constant 0.000000e+00 : f32
    %306 = vector.broadcast %cst_116 : f32 to vector<8x64xf32>
    %307 = arith.maximumf %305, %306 : vector<8x64xf32>
    %308 = arith.truncf %307 : vector<8x64xf32> to vector<8x64xbf16>
    %c96_117 = arith.constant 96 : index
    %c0_118 = arith.constant 0 : index
    %309 = vector.load %arg3[%c96_117, %c0_118] : memref<160x128xbf16, #tpu.memory_space<vmem>>, vector<64x32xbf16>
    %cst_119 = arith.constant dense<0.000000e+00> : vector<8x32xf32>
    %310 = tpu.matmul %308, %309, %cst_119 {dimension_numbers = #tpu.dot_dimension_numbers<[1], [0], [0], [1], [0, 0, 1, 1], [], []>} : vector<8x64xbf16>, vector<64x32xbf16>, vector<8x32xf32> -> vector<8x32xf32>
    %c7_120 = arith.constant 7 : index
    %c0_121 = arith.constant 0 : index
    %311 = vector.load %arg5[%c7_120, %c0_121] : memref<16x128xf32, #tpu.memory_space<vmem>>, vector<1x32xf32>
    %312 = vector.broadcast %311 : vector<1x32xf32> to vector<8x32xf32>
    %313 = arith.addf %310, %312 : vector<8x32xf32>
    %314 = arith.addf %277, %313 : vector<8x32xf32>
    %c8_122 = arith.constant 8 : index
    %c0_123 = arith.constant 0 : index
    %315 = vector.load %arg5[%c8_122, %c0_123] : memref<16x128xf32, #tpu.memory_space<vmem>>, vector<1x32xf32>
    %c9_124 = arith.constant 9 : index
    %c0_125 = arith.constant 0 : index
    %316 = vector.load %arg5[%c9_124, %c0_125] : memref<16x128xf32, #tpu.memory_space<vmem>>, vector<1x32xf32>
    %cst_126 = arith.constant dense<0.000000e+00> : vector<8xf32>
    %317 = vector.multi_reduction <add>, %213, %cst_126 [1] : vector<8x32xf32> to vector<8xf32>
    %318 = vector.shape_cast %317 : vector<8xf32> to vector<8x1xf32>
    %cst_127 = arith.constant 3.200000e+01 : f32
    %319 = vector.broadcast %cst_127 : f32 to vector<8x1xf32>
    %320 = arith.divf %318, %319 : vector<8x1xf32>
    %321 = vector.broadcast %320 : vector<8x1xf32> to vector<8x32xf32>
    %322 = arith.subf %213, %321 : vector<8x32xf32>
    %323 = arith.mulf %322, %322 : vector<8x32xf32>
    %cst_128 = arith.constant dense<0.000000e+00> : vector<8xf32>
    %324 = vector.multi_reduction <add>, %323, %cst_128 [1] : vector<8x32xf32> to vector<8xf32>
    %325 = vector.shape_cast %324 : vector<8xf32> to vector<8x1xf32>
    %cst_129 = arith.constant 3.200000e+01 : f32
    %326 = vector.broadcast %cst_129 : f32 to vector<8x1xf32>
    %327 = arith.divf %325, %326 : vector<8x1xf32>
    %cst_130 = arith.constant 9.99999974E-6 : f32
    %328 = vector.broadcast %cst_130 : f32 to vector<8x1xf32>
    %329 = arith.addf %327, %328 : vector<8x1xf32>
    %330 = math.rsqrt %329 : vector<8x1xf32>
    %331 = vector.broadcast %330 : vector<8x1xf32> to vector<8x32xf32>
    %332 = arith.mulf %322, %331 : vector<8x32xf32>
    %333 = vector.broadcast %315 : vector<1x32xf32> to vector<8x32xf32>
    %334 = arith.mulf %332, %333 : vector<8x32xf32>
    %335 = vector.broadcast %316 : vector<1x32xf32> to vector<8x32xf32>
    %336 = arith.addf %334, %335 : vector<8x32xf32>
    %337 = arith.truncf %336 : vector<8x32xf32> to vector<8x32xbf16>
    %c0_131 = arith.constant 0 : index
    %c0_132 = arith.constant 0 : index
    %338 = vector.load %arg4[%c0_131, %c0_132] : memref<160x128xbf16, #tpu.memory_space<vmem>>, vector<32x32xbf16>
    %cst_133 = arith.constant dense<0.000000e+00> : vector<8x32xf32>
    %339 = tpu.matmul %337, %338, %cst_133 {dimension_numbers = #tpu.dot_dimension_numbers<[1], [0], [0], [1], [0, 0, 1, 1], [], []>} : vector<8x32xbf16>, vector<32x32xbf16>, vector<8x32xf32> -> vector<8x32xf32>
    %c10_134 = arith.constant 10 : index
    %c0_135 = arith.constant 0 : index
    %340 = vector.load %arg5[%c10_134, %c0_135] : memref<16x128xf32, #tpu.memory_space<vmem>>, vector<1x32xf32>
    %341 = vector.broadcast %340 : vector<1x32xf32> to vector<8x32xf32>
    %342 = arith.addf %339, %341 : vector<8x32xf32>
    %343 = arith.truncf %314 : vector<8x32xf32> to vector<8x32xbf16>
    %c0_136 = arith.constant 0 : index
    %c32_137 = arith.constant 32 : index
    %344 = vector.load %arg4[%c0_136, %c32_137] : memref<160x128xbf16, #tpu.memory_space<vmem>>, vector<32x64xbf16>
    %cst_138 = arith.constant dense<0.000000e+00> : vector<8x64xf32>
    %345 = tpu.matmul %343, %344, %cst_138 {dimension_numbers = #tpu.dot_dimension_numbers<[1], [0], [0], [1], [0, 0, 1, 1], [], []>} : vector<8x32xbf16>, vector<32x64xbf16>, vector<8x64xf32> -> vector<8x64xf32>
    %c10_139 = arith.constant 10 : index
    %c32_140 = arith.constant 32 : index
    %346 = vector.load %arg5[%c10_139, %c32_140] : memref<16x128xf32, #tpu.memory_space<vmem>>, vector<1x64xf32>
    %347 = vector.broadcast %346 : vector<1x64xf32> to vector<8x64xf32>
    %348 = arith.addf %345, %347 : vector<8x64xf32>
    %349 = vector.extract_strided_slice %348 {offsets = [0, 0], sizes = [8, 32], strides = [1, 1]} : vector<8x64xf32> to vector<8x32xf32>
    %350 = vector.extract_strided_slice %348 {offsets = [0, 32], sizes = [8, 32], strides = [1, 1]} : vector<8x64xf32> to vector<8x32xf32>
    %351 = vector.shape_cast %342 : vector<8x32xf32> to vector<8x4x8xf32>
    %352 = tpu.transpose %351, [1, 0, 2] : vector<8x4x8xf32> -> vector<4x8x8xf32>
    %353 = arith.truncf %352 : vector<4x8x8xf32> to vector<4x8x8xbf16>
    %354 = vector.shape_cast %349 : vector<8x32xf32> to vector<8x4x8xf32>
    %355 = tpu.transpose %354, [1, 0, 2] : vector<8x4x8xf32> -> vector<4x8x8xf32>
    %356 = arith.truncf %355 : vector<4x8x8xf32> to vector<4x8x8xbf16>
    %357 = vector.shape_cast %350 : vector<8x32xf32> to vector<8x4x8xf32>
    %358 = tpu.transpose %357, [1, 0, 2] : vector<8x4x8xf32> -> vector<4x8x8xf32>
    %359 = arith.truncf %358 : vector<4x8x8xf32> to vector<4x8x8xbf16>
    "tpu.trace_start"() <{level = 10 : i32, message = "gqe,gke->gqk"}> : () -> ()
    %cst_141 = arith.constant dense<0.000000e+00> : vector<4x8x8xf32>
    %360 = tpu.matmul %353, %356, %cst_141 {dimension_numbers = #tpu.dot_dimension_numbers<[2], [2], [1], [1], [0, 0, 0, 1, 1, 1], [0], [0]>} : vector<4x8x8xbf16>, vector<4x8x8xbf16>, vector<4x8x8xf32> -> vector<4x8x8xf32>
    "tpu.trace_stop"() : () -> ()
    %cst_142 = arith.constant dense<0xFF800000> : vector<4x8xf32>
    %361 = vector.multi_reduction <maximumf>, %360, %cst_142 [2] : vector<4x8x8xf32> to vector<4x8xf32>
    %362 = vector.shape_cast %361 : vector<4x8xf32> to vector<4x8x1xf32>
    %363 = vector.broadcast %362 : vector<4x8x1xf32> to vector<4x8x8xf32>
    %364 = arith.subf %360, %363 : vector<4x8x8xf32>
    %365 = math.exp %364 : vector<4x8x8xf32>
    %cst_143 = arith.constant dense<0.000000e+00> : vector<4x8xf32>
    %366 = vector.multi_reduction <add>, %365, %cst_143 [2] : vector<4x8x8xf32> to vector<4x8xf32>
    %367 = vector.shape_cast %366 : vector<4x8xf32> to vector<4x8x1xf32>
    %368 = vector.broadcast %367 : vector<4x8x1xf32> to vector<4x8x8xf32>
    %369 = arith.divf %365, %368 : vector<4x8x8xf32>
    %370 = arith.truncf %369 : vector<4x8x8xf32> to vector<4x8x8xbf16>
    "tpu.trace_start"() <{level = 10 : i32, message = "gqk,gke->gqe"}> : () -> ()
    %cst_144 = arith.constant dense<0.000000e+00> : vector<4x8x8xf32>
    %371 = tpu.matmul %370, %359, %cst_144 {dimension_numbers = #tpu.dot_dimension_numbers<[2], [1], [1], [2], [0, 0, 0, 1, 1, 2], [0], [0]>} : vector<4x8x8xbf16>, vector<4x8x8xbf16>, vector<4x8x8xf32> -> vector<4x8x8xf32>
    "tpu.trace_stop"() : () -> ()
    %372 = tpu.transpose %371, [1, 0, 2] : vector<4x8x8xf32> -> vector<8x4x8xf32>
    %373 = vector.shape_cast %372 : vector<8x4x8xf32> to vector<8x32xf32>
    %374 = arith.truncf %373 : vector<8x32xf32> to vector<8x32xbf16>
    %c32_145 = arith.constant 32 : index
    %c0_146 = arith.constant 0 : index
    %375 = vector.load %arg4[%c32_145, %c0_146] : memref<160x128xbf16, #tpu.memory_space<vmem>>, vector<32x32xbf16>
    %cst_147 = arith.constant dense<0.000000e+00> : vector<8x32xf32>
    %376 = tpu.matmul %374, %375, %cst_147 {dimension_numbers = #tpu.dot_dimension_numbers<[1], [0], [0], [1], [0, 0, 1, 1], [], []>} : vector<8x32xbf16>, vector<32x32xbf16>, vector<8x32xf32> -> vector<8x32xf32>
    %c11_148 = arith.constant 11 : index
    %c0_149 = arith.constant 0 : index
    %377 = vector.load %arg5[%c11_148, %c0_149] : memref<16x128xf32, #tpu.memory_space<vmem>>, vector<1x32xf32>
    %378 = vector.broadcast %377 : vector<1x32xf32> to vector<8x32xf32>
    %379 = arith.addf %376, %378 : vector<8x32xf32>
    %380 = arith.addf %213, %379 : vector<8x32xf32>
    %c12_150 = arith.constant 12 : index
    %c0_151 = arith.constant 0 : index
    %381 = vector.load %arg5[%c12_150, %c0_151] : memref<16x128xf32, #tpu.memory_space<vmem>>, vector<1x32xf32>
    %c13_152 = arith.constant 13 : index
    %c0_153 = arith.constant 0 : index
    %382 = vector.load %arg5[%c13_152, %c0_153] : memref<16x128xf32, #tpu.memory_space<vmem>>, vector<1x32xf32>
    %cst_154 = arith.constant dense<0.000000e+00> : vector<8xf32>
    %383 = vector.multi_reduction <add>, %380, %cst_154 [1] : vector<8x32xf32> to vector<8xf32>
    %384 = vector.shape_cast %383 : vector<8xf32> to vector<8x1xf32>
    %cst_155 = arith.constant 3.200000e+01 : f32
    %385 = vector.broadcast %cst_155 : f32 to vector<8x1xf32>
    %386 = arith.divf %384, %385 : vector<8x1xf32>
    %387 = vector.broadcast %386 : vector<8x1xf32> to vector<8x32xf32>
    %388 = arith.subf %380, %387 : vector<8x32xf32>
    %389 = arith.mulf %388, %388 : vector<8x32xf32>
    %cst_156 = arith.constant dense<0.000000e+00> : vector<8xf32>
    %390 = vector.multi_reduction <add>, %389, %cst_156 [1] : vector<8x32xf32> to vector<8xf32>
    %391 = vector.shape_cast %390 : vector<8xf32> to vector<8x1xf32>
    %cst_157 = arith.constant 3.200000e+01 : f32
    %392 = vector.broadcast %cst_157 : f32 to vector<8x1xf32>
    %393 = arith.divf %391, %392 : vector<8x1xf32>
    %cst_158 = arith.constant 9.99999974E-6 : f32
    %394 = vector.broadcast %cst_158 : f32 to vector<8x1xf32>
    %395 = arith.addf %393, %394 : vector<8x1xf32>
    %396 = math.rsqrt %395 : vector<8x1xf32>
    %397 = vector.broadcast %396 : vector<8x1xf32> to vector<8x32xf32>
    %398 = arith.mulf %388, %397 : vector<8x32xf32>
    %399 = vector.broadcast %381 : vector<1x32xf32> to vector<8x32xf32>
    %400 = arith.mulf %398, %399 : vector<8x32xf32>
    %401 = vector.broadcast %382 : vector<1x32xf32> to vector<8x32xf32>
    %402 = arith.addf %400, %401 : vector<8x32xf32>
    %403 = arith.truncf %402 : vector<8x32xf32> to vector<8x32xbf16>
    %c64_159 = arith.constant 64 : index
    %c0_160 = arith.constant 0 : index
    %404 = vector.load %arg4[%c64_159, %c0_160] : memref<160x128xbf16, #tpu.memory_space<vmem>>, vector<32x64xbf16>
    %cst_161 = arith.constant dense<0.000000e+00> : vector<8x64xf32>
    %405 = tpu.matmul %403, %404, %cst_161 {dimension_numbers = #tpu.dot_dimension_numbers<[1], [0], [0], [1], [0, 0, 1, 1], [], []>} : vector<8x32xbf16>, vector<32x64xbf16>, vector<8x64xf32> -> vector<8x64xf32>
    %c14_162 = arith.constant 14 : index
    %c0_163 = arith.constant 0 : index
    %406 = vector.load %arg5[%c14_162, %c0_163] : memref<16x128xf32, #tpu.memory_space<vmem>>, vector<1x64xf32>
    %407 = vector.broadcast %406 : vector<1x64xf32> to vector<8x64xf32>
    %408 = arith.addf %405, %407 : vector<8x64xf32>
    %cst_164 = arith.constant 0.000000e+00 : f32
    %409 = vector.broadcast %cst_164 : f32 to vector<8x64xf32>
    %410 = arith.maximumf %408, %409 : vector<8x64xf32>
    %411 = arith.truncf %410 : vector<8x64xf32> to vector<8x64xbf16>
    %c96_165 = arith.constant 96 : index
    %c0_166 = arith.constant 0 : index
    %412 = vector.load %arg4[%c96_165, %c0_166] : memref<160x128xbf16, #tpu.memory_space<vmem>>, vector<64x32xbf16>
    %cst_167 = arith.constant dense<0.000000e+00> : vector<8x32xf32>
    %413 = tpu.matmul %411, %412, %cst_167 {dimension_numbers = #tpu.dot_dimension_numbers<[1], [0], [0], [1], [0, 0, 1, 1], [], []>} : vector<8x64xbf16>, vector<64x32xbf16>, vector<8x32xf32> -> vector<8x32xf32>
    %c15_168 = arith.constant 15 : index
    %c0_169 = arith.constant 0 : index
    %414 = vector.load %arg5[%c15_168, %c0_169] : memref<16x128xf32, #tpu.memory_space<vmem>>, vector<1x32xf32>
    %415 = vector.broadcast %414 : vector<1x32xf32> to vector<8x32xf32>
    %416 = arith.addf %413, %415 : vector<8x32xf32>
    %417 = arith.addf %380, %416 : vector<8x32xf32>
    %418 = vector.shape_cast %417 : vector<8x32xf32> to vector<1x8x32xf32>
    %c0_170 = arith.constant 0 : index
    %c0_171 = arith.constant 0 : index
    %c0_172 = arith.constant 0 : index
    %419 = vector.load %arg6[%c0_170, %c0_171, %c0_172] : memref<1x8x32xf32, #tpu.memory_space<vmem>>, vector<1x8x32xf32>
    tpu.vector_store %arg6[%c0_170, %c0_171, %c0_172], %418 {strides = array<i32>} : memref<1x8x32xf32, #tpu.memory_space<vmem>>, vector<1x8x32xf32>,
    return
  }
  func.func @transform_0(%arg0: i32) -> (i32, i32, i32) {
    %c0_i32 = arith.constant 0 : i32
    %c0_i32_0 = arith.constant 0 : i32
    %c0_i32_1 = arith.constant 0 : i32
    return %arg0, %c0_i32, %c0_i32_0 : i32, i32, i32
  }
  func.func @transform_1(%arg0: i32) -> (i32, i32, i32) {
    %c0_i32 = arith.constant 0 : i32
    %c0_i32_0 = arith.constant 0 : i32
    %c0_i32_1 = arith.constant 0 : i32
    return %arg0, %c0_i32, %c0_i32_0 : i32, i32, i32
  }
  func.func @transform_2(%arg0: i32) -> (i32, i32) {
    %c0_i32 = arith.constant 0 : i32
    %c0_i32_0 = arith.constant 0 : i32
    %c0_i32_1 = arith.constant 0 : i32
    return %c0_i32, %c0_i32_0 : i32, i32
  }
  func.func @transform_3(%arg0: i32) -> (i32, i32) {
    %c0_i32 = arith.constant 0 : i32
    %c0_i32_0 = arith.constant 0 : i32
    %c0_i32_1 = arith.constant 0 : i32
    return %c0_i32, %c0_i32_0 : i32, i32
  }
  func.func @transform_4(%arg0: i32) -> (i32, i32) {
    %c0_i32 = arith.constant 0 : i32
    %c0_i32_0 = arith.constant 0 : i32
    %c0_i32_1 = arith.constant 0 : i32
    return %c0_i32, %c0_i32_0 : i32, i32
  }
  func.func @transform_5(%arg0: i32) -> (i32, i32, i32) {
    %c0_i32 = arith.constant 0 : i32
    %c0_i32_0 = arith.constant 0 : i32
    %c0_i32_1 = arith.constant 0 : i32
    return %arg0, %c0_i32, %c0_i32_0 : i32, i32, i32
  }
}

</mosaic_0001>

<bundles_post_ra>
// kernel: tpu_custom_call.1
= control target key start
LH: loop header
LB: loop body
LE: loop exit
PB: predicated region body
PF: predicated region fallthrough
CT: control target
= control target key end

     0   :  { %s8208_s0 = inlined_call_operand.hbm [shape: f32[2,8,32], index: 0, kind: input, shape index: {}]   ;;  %s8209_s1 = inlined_call_operand.hbm [shape: f32[2,8,32], index: 1, kind: input, shape index: {}]   ;;  %s8210_s2 = inlined_call_operand.hbm [shape: bf16[160,128], index: 2, kind: input, shape index: {}]   ;;  %s8211_s3 = inlined_call_operand.hbm [shape: bf16[160,128], index: 3, kind: input, shape index: {}]   ;;  %s8212_s4 = inlined_call_operand.hbm [shape: f32[16,128], index: 4, kind: input, shape index: {}]   ;;  %s8213_s5 = inlined_call_operand.hbm [shape: f32[2,8,32], index: 5, kind: output, shape index: {}]  }
   0x1   :  { %8218 = sst [smem:[#allocation17_spill]] %s8210_s2 }
   0x2   :  { %8219 = sst [smem:[#allocation18_spill]] %s8211_s3 }
   0x3   :  { %10 = vsyncpa [#allocation3], 0 }
   0x4   :  { %12 = vsyncpa [#allocation3 + $0x1], 0 }
   0x5   :  { %13 = vsyncpa [#allocation6], 0 }
   0x6   :  { %15 = vsyncpa [#allocation6 + $0x1], 0 }
   0x7   :  { %16 = vsyncpa [#allocation9], 0 }
   0x8   :  { %17 = vsyncpa [#allocation4], 0 }
   0x9   :  { %19 = vsyncpa [#allocation4 + $0x1], 0  ;;  %s7113_s18 = smov 0   ;;  %s7115_s19 = smov 0  }
   0xa   :  { %s7117_s20 = smov 0   ;;  %s7119_s21 = smov 0  }
   0xb LB: > { %s7134_s22 = sadd.s32 4294967295, %s7058_s21   ;;  %s5976_s23 = sadd.s32 4294967294, %s7058_s21   ;;  %s7058_s21 = sphi %s7119_s21, %s8241_s21   ;;  %s7054_s20 = sphi %s7117_s20, %s8240_s20   ;;  %s7050_s19 = sphi %s7115_s19, %s8239_s19   ;;  %s7046_s18 = sphi %s7113_s18, %s8238_s18  }
   0xc   : > { %p45_p0 = scmp.ne.s32.totalorder %s7050_s19, %s7046_s18  ;;  %p8214_p1 = scmp.eq.s32.totalorder %s7134_s22, 0 }
   0xd   : > { %p164_p3 = scmp.eq.s32.totalorder %s5976_s23, 1  ;;  %p5977_p5 = scmp.ge.s32.totalorder %s7058_s21, 1 }
   0xe   : > { %p7143_p4 = por %p8214_p1, %p45_p0  ;;  %p171_p7 = scmp.lt.s32.totalorder %s7058_s21, 3 }
   0xf   : > { %p7148_p6 = por %p164_p3, %p45_p0  ;;  %s7060_s27 = smov [#allocation7]  }
  0x10   : > { %s8220_s24 = scalar_select %p7143_p4, 1, 0 }
  0x11   : > { %s8221_s25 = scalar_select %p7148_p6, 1, 0 }
  0x12   : > { %p7153_p8 = pnand %p5977_p5, %p171_p7  ;;  %s183_s28 = sshll.u32 %s7060_s27, 4  ;;  %s184_s28 = int_to_ptr.vmem [resolvable:$true] %s183_s28 }
  0x13   : > { %s7061_s30 = smov [#allocation8]   ;;  %s7062_s7 = smov [#allocation10]  }
  0x14   : > { %s8222_s26 = scalar_select %p7153_p8, 1, 0 }
  0x15   : > { %p6647_p9 = pneg %p7153_p8  ;;  %s196_s6 = sshll.u32 %s7061_s30, 4  ;;  %s197_s6 = int_to_ptr.vmem [resolvable:$true] %s196_s6 }
  0x16   : > { %s209_s8 = sshll.u32 %s7062_s7, 4  ;;  %s6859_s9 = scalar_lea.vmem %s184_s28, 1280  ;;  %s210_s8 = int_to_ptr.vmem [resolvable:$true] %s209_s8 }
  0x17   : > { %p7162_p11 = pnand %p6647_p9, %p8214_p1  ;;  %p6860_p13 = scmp.ne.s32.totalorder %s184_s28, %s6859_s9 }
  0x18   : > { %p6867_p5 = scmp.lt.s32.totalorder %s184_s28, %s184_s28  ;;  %p6868_p7 = scmp.lt.s32.totalorder %s6859_s9, %s6859_s9 }
  0x19   : > { %p6850_p12 = pneg %p7162_p11 }
  0x1a   : > { %p6869_p9 = por %p6868_p7, %p6867_p5 }
  0x1b   : > { %p6862_p0 = pnand %p6860_p13, %p6850_p12 }
  0x1d   : > { %p6863_p3 = pneg %p6862_p0 }
  0x1f   : > { %p6870_p10 = pnand %p6869_p9, %p6863_p3 }
  0x21   : > { %6873 = shalt.err (!%p6870_p10)
}
  0x22   : > { %s7063_s10 = smov 64   ;;  %s7064_s11 = smov 4  }
  0x23   : > { %s8224_s2 = sld [smem:[#allocation17_spill]]  ;;  %s6885_s14 = scalar_lea.vmem %s197_s6, 1280 }
  0x24   : > { %p6886_p1 = scmp.ne.s32.totalorder %s197_s6, %s6885_s14  ;;  %p6893_p2 = scmp.lt.s32.totalorder %s197_s6, %s197_s6 }
  0x25   : > { %p6894_p6 = scmp.lt.s32.totalorder %s6885_s14, %s6885_s14 }
  0x26   : > { %p6888_p13 = pnand %p6886_p1, %p6850_p12 }
  0x27   : > { %p6895_p5 = por %p6894_p6, %p6893_p2 }
  0x28   : > { %p6889_p0 = pneg %p6888_p13 }
  0x29   : > { %6650 = dma.hbm_to_vmem [thread:$0]  (!%p7162_p11), %s8224_s2, 1280, %s184_s28, [#allocation6], %s7063_s10, %s7063_s10, %s7064_s11  }
  0x2a   : > { %p6896_p3 = pnand %p6895_p5, %p6889_p0 }
  0x2c   : > { %6899 = shalt.err (!%p6896_p3)
}
  0x2d   : > { %s8225_s3 = sld [smem:[#allocation18_spill]]  ;;  %s6911_s17 = scalar_lea.vmem %s210_s8, 256 }
  0x2e   : > { %p6912_p10 = scmp.ne.s32.totalorder %s210_s8, %s6911_s17  ;;  %p6919_p9 = scmp.lt.s32.totalorder %s210_s8, %s210_s8 }
  0x2f   : > { %p6920_p13 = scmp.lt.s32.totalorder %s6911_s17, %s6911_s17 }
  0x30   : > { %p6914_p7 = pnand %p6912_p10, %p6850_p12 }
  0x31   : > { %p6921_p4 = por %p6920_p13, %p6919_p9 }
  0x32   : > { %p6915_p1 = pneg %p6914_p7 }
  0x33   : > { %6653 = dma.hbm_to_vmem [thread:$0]  (!%p7162_p11), %s8225_s3, 1280, %s197_s6, [#allocation9], %s7063_s10, %s7063_s10, %s7064_s11  }
  0x34   : > { %p6922_p2 = pnand %p6921_p4, %p6915_p1 }
  0x36   : > { %6925 = shalt.err (!%p6922_p2)
}
  0x37   : > { %s7065_s23 = smov 128   ;;  %s7066_s27 = smov 8  }
  0x38   : > { %6656 = dma.hbm_to_vmem [thread:$0]  (!%p7162_p11), %s8212_s4, 256, %s210_s8, [#allocation9], %s7065_s23, %s7065_s23, %s7066_s27  }
  0x39   : > { %s7193_s6 = sadd.s32 1, %s7058_s21   ;;  %s32_s9 = sadd.s32 1, %s7054_s20 }
  0x3a   : > { %s29_s7 = ssub.s32 %s7058_s21, %s7193_s6  ;;  %p39_p6 = scmp.ne.s32.totalorder %s7054_s20, %s7050_s19 }
  0x3b   : > { %p30_p4 = scmp.eq.s32.totalorder %s29_s7, 0  ;;  %p40_p12 = scmp.eq.s32.totalorder %s7058_s21, 0 }
  0x3c   : > { %p6671_p0 = scmp.lt.s32.totalorder %s7058_s21, 2  ;;  %p8226_p3 = scmp.eq.s32.totalorder %s7134_s22, 1 }
  0x3d   : > { %s7203_s10 = scalar_select %p30_p4, %s7054_s20, %s32_s9  }
  0x3e   : > { %p41_p5 = por %p40_p12, %p39_p6  ;;  %p7207_p10 = por %p8226_p3, %p39_p6 }
  0x3f   : > { %s223_s29 = sand.u32 1, %s7054_s20   ;;  %s5983_s12 = sshll.u32 %s7058_s21, 7 }
  0x40   : > { %s8227_s11 = scalar_select %p7207_p10, 1, 0 }
  0x41   : > { %s7213_s8 = sshll.u32 %s223_s29, 3  ;;  %s7218_s15 = scalar_lea.hbm %s8208_s0, %s5983_s12 }
  0x42   : > { %s227_s16 = scalar_lea.vmem [#allocation2], %s7213_s8  ;;  %p7221_p11 = pnand %p6671_p0, %p41_p5 }
  0x43   : > { %s234_s17 = sshll.u32 %s227_s16, 4  ;;  %s7228_s30 = scalar_lea.hbm %s8209_s1, %s5983_s12  ;;  %s235_s17 = int_to_ptr.vmem [resolvable:$true] %s234_s17 }
  0x44   : > { %s224_s7 = scalar_lea.sflag [#allocation3], %s223_s29  ;;  %s6926_s9 = scalar_lea.hbm %s7218_s15, 128 }
  0x45   : > { %p6927_p7 = scmp.ne.s32.totalorder %s7218_s15, %s6926_s9  ;;  %p6928_p1 = pneg %p7221_p11 }
  0x46   : > { %s6931_s16 = scalar_lea.hbm %s8208_s0, 256  ;;  %p6932_p2 = scmp.lt.s32.totalorder %s7218_s15, %s8208_s0 }
  0x47   : > { %p6929_p9 = pnand %p6928_p1, %p6927_p7  ;;  %p6933_p4 = scmp.lt.s32.totalorder %s6931_s16, %s6926_s9 }
  0x49   : > { %p6930_p13 = pneg %p6929_p9  ;;  %p6934_p6 = por %p6933_p4, %p6932_p2 }
  0x4b   : > { %p6935_p12 = pnand %p6934_p6, %p6930_p13 }
  0x4d   : > { %6938 = shalt.err (!%p6935_p12)
}
  0x4e   : > { %s6939_s29 = scalar_lea.vmem %s235_s17, 128  ;;  %s7067_s12 = smov [#allocation2]  }
  0x4f   : > { %p6940_p0 = scmp.ne.s32.totalorder %s235_s17, %s6939_s29  ;;  %s6944_s27 = sshll.u32 %s7067_s12, 4  ;;  %s6945_s27 = int_to_ptr.vmem [resolvable:$false] %s6944_s27 }
  0x50   : > { %s6946_s28 = scalar_lea.vmem %s6945_s27, 256  ;;  %p6947_p7 = scmp.lt.s32.totalorder %s235_s17, %s6945_s27 }
  0x51   : > { %p6942_p5 = pnand %p6940_p0, %p6928_p1  ;;  %p6948_p9 = scmp.lt.s32.totalorder %s6946_s28, %s6939_s29 }
  0x53   : > { %p6943_p3 = pneg %p6942_p5  ;;  %p6949_p10 = por %p6948_p9, %p6947_p7 }
  0x55   : > { %p6950_p8 = pnand %p6949_p10, %p6943_p3 }
  0x57   : > { %6953 = shalt.err (!%p6950_p8)
}
  0x58   : > { %6660 = dma.hbm_to_vmem [thread:$0]  (!%p7221_p11), %s7218_s15, 128, %s235_s17, %s224_s7  }
  0x59   : > { %s241_s2 = sand.u32 1, %s7058_s21   ;;  %s245_s3 = scalar_lea.vmem [#allocation5], %s7213_s8 }
  0x5a   : > { %s252_s9 = sshll.u32 %s245_s3, 4  ;;  %s242_s13 = scalar_lea.sflag [#allocation6], %s241_s2  ;;  %s253_s9 = int_to_ptr.vmem [resolvable:$true] %s252_s9 }
  0x5b   : > { %s6954_s14 = scalar_lea.hbm %s7228_s30, 128  ;;  %s6959_s12 = scalar_lea.hbm %s8209_s1, 256 }
  0x5c   : > { %p6955_p13 = scmp.ne.s32.totalorder %s7228_s30, %s6954_s14  ;;  %p6960_p2 = scmp.lt.s32.totalorder %s7228_s30, %s8209_s1 }
  0x5d   : > { %p6961_p4 = scmp.lt.s32.totalorder %s6959_s12, %s6954_s14 }
  0x5e   : > { %p6957_p8 = pnand %p6955_p13, %p6928_p1 }
  0x5f   : > { %p6962_p6 = por %p6961_p4, %p6960_p2 }
  0x60   : > { %p6958_p10 = pneg %p6957_p8 }
  0x62   : > { %p6963_p12 = pnand %p6962_p6, %p6958_p10 }
  0x64   : > { %6966 = shalt.err (!%p6963_p12)
}
  0x65   : > { %s6967_s8 = scalar_lea.vmem %s253_s9, 128  ;;  %s7068_s15 = smov [#allocation5]  }
  0x66   : > { %p6968_p0 = scmp.ne.s32.totalorder %s253_s9, %s6967_s8  ;;  %s6972_s17 = sshll.u32 %s7068_s15, 4  ;;  %s6973_s17 = int_to_ptr.vmem [resolvable:$false] %s6972_s17 }
  0x67   : > { %s6974_s7 = scalar_lea.vmem %s6973_s17, 256  ;;  %p6975_p7 = scmp.lt.s32.totalorder %s253_s9, %s6973_s17 }
  0x68   : > { %p6970_p5 = pnand %p6968_p0, %p6928_p1  ;;  %p6976_p9 = scmp.lt.s32.totalorder %s6974_s7, %s6967_s8 }
  0x6a   : > { %p6971_p3 = pneg %p6970_p5  ;;  %p6977_p13 = por %p6976_p9, %p6975_p7 }
  0x6c   : > { %p6978_p8 = pnand %p6977_p13, %p6971_p3 }
  0x6e   : > { %6981 = shalt.err (!%p6978_p8)
}
  0x6f   : > { %6663 = dma.hbm_to_vmem [thread:$0]  (!%p7221_p11), %s7228_s30, 128, %s253_s9, %s242_s13  }
  0x70   : > { %p8229_p10 = scmp.ne.s32.totalorder %s8222_s26, 0 }
  0x71   : > { %s7273_s2 = sand.u32 (!%p8229_p10), 1, %s7050_s19   ;;  %p8230_p1 = scmp.ne.s32.totalorder (!%p8229_p10), %s8220_s24, 0 }
  0x72   : > { %261 = sbr.rel (%p8229_p10) target bundleno = 8879 (0x22af), region = 40  ;;  %s7276_s3 = sshll.u32 (!%p8229_p10), %s7273_s2, 3 }
  0x73   : > { %s264_s14 = scalar_lea.sflag (!%p8229_p10), [#allocation3], %s7273_s2  ;;  %s267_s16 = scalar_lea.vmem (!%p8229_p10), [#allocation2], %s7276_s3 }
  0x77   : > { %7025 = dma.done.wait (%p8230_p1), %s264_s14, 128  }
  0x78   : > { %7027 = vsyncadd (%p8230_p1), %s264_s14, 4294967168  ;;  %s272_s26 = sand.u32 1, %s7134_s22   ;;  %s276_s30 = scalar_lea.vmem [#allocation5], %s7276_s3 }
  0x79   : > { %s273_s23 = scalar_lea.sflag [#allocation6], %s272_s26 }
  0x7a   : > { %7029 = dma.done.wait (%p8230_p1), %s273_s23, 128  }
  0x7b   : > { %7031 = vsyncadd (%p8230_p1), %s273_s23, 4294967168  ;;  %p8231_p11 = scmp.eq.s32.totalorder %s7134_s22, 0 }
  0x7d   : > { %7033 = dma.done.wait (%p8231_p11), [#allocation6], 1280   ;;  %p8232_p2 = pmov %p8231_p11 }
  0x7f   : > { %7035 = vsyncadd (%p8232_p2), [#allocation6], 4294966016  ;;  %p8233_p4 = pmov %p8232_p2 }
  0x80   : > { %p8234_p6 = pmov %p8232_p2 }
  0x81   : > { %7037 = dma.done.wait (%p8233_p4), [#allocation9], 1536  }
  0x82   : > { %7039 = vsyncadd (%p8234_p6), [#allocation9], 4294965760  ;;  %vm331_vm0 = vcmask 261120   ;;  %v7298_v0 = vld [vmem:[%s267_s16] sm:$0xff]  ;;  %v7069_v8 = vmov 0.0   ;;  %vm7070_vm1 = vmmov 0   ;;  %v323_v29 = vlaneseq }
  0x83   : > { %v332_v1 = vsel %vm331_vm0, %v7298_v0, 0.0  ;;  %v6728_v7 = vld [vmem:[#allocation7 + $0x8] sm:$0xff]   ;;  %6277 = vmatprep.subr.bf16.mxu1 %v7069_v8  ;;  %6281 = vmatprep.mubr.msk.bf16.mxu1 %vm7070_vm1, %v7069_v8  ;;  %v6729_v9 = vld [vmem:[#allocation7] sm:$0xff]   ;;  %s7071_s24 = smov 104   ;;  %s7072_s9 = smov 120   ;;  %vm875_vm2 = vcmask 64512  }
  0x84   : > { %333 = vadd.xlane.f32.xlu0 %v332_v1  ;;  %6278 = vmatpush3.bf16.msra.mxu1 %v6728_v7  ;;  %v5993_v14 = vld [vmem:[#allocation10] ss:$0 sm:$0xff]  ;;  %v5994_v16 = vld [vmem:[#allocation10 + $0x1] ss:$0 sm:$0xff]  ;;  %v5995_v20 = vld [vmem:[#allocation10 + $0x2] ss:$0 sm:$0xff] }
  0x85   : > { %6291 = vmatprep.subr.bf16.mxu0 %v7069_v8  ;;  %6279 = vmatprep.subr.bf16.mxu1 %v7069_v8  ;;  %s7073_s13 = smov 112   ;;  %s7074_s29 = smov 96   ;;  %v7075_v30 = vmov 1983009808   ;;  %v7338_v32 = vshrl.u32 %v323_v29, 7  ;;  %vm1111_vm4 = vcmask 1043456  }
  0x86   : > { %6293 = vmatprep.mubr.msk.bf16.mxu0 %vm7070_vm1, %v7069_v8  ;;  %v434_v31 = vunpack.c.l.s4 %v7075_v30  ;;  %v7076_v35 = vmov 1934713408   ;;  %s7078_s12 = smov 64   ;;  %s7079_s27 = smov 16   ;;  %vm1442_vm5 = vcmask 130048   ;;  %vm1444_vm6 = vcmask 195584  }
  0x87   : > { %v466_v36 = vunpack.c.l.s4 %v7076_v35  ;;  %s7080_s28 = smov 8   ;;  %s7081_s8 = smov 24   ;;  %vm1641_vm7 = vcmask 523264  }
  0x88   : > { %6280 = vmatpush3.bf16.msra.mxu1 %v6729_v9  ;;  %v435_v33 = vunpack.c.0.s8 %v434_v31  ;;  %s6148_s15 = sshll.u32 %s7134_s22, 7  ;;  %s319_s17 = scalar_lea.vmem [#allocation11], %s7276_s3 }
  0x89   : > { %6285 = vmatprep.subr.bf16.mxu1 %v7069_v8  ;;  %v467_v43 = vunpack.c.0.s8 %v466_v36  ;;  %s5855_s7 = sshll.u32 %s319_s17, 4  ;;  %s8164_s26 = scalar_lea.hbm %s8213_s5, %s6148_s15  ;;  %s8166_s7 = int_to_ptr.vmem [resolvable:$true] %s5855_s7 }
  0x8a   : > { %v7345_v39 = vsub.s32 %v435_v33, %v7338_v32  ;;  %s5842_s22 = scalar_lea.sflag [#allocation4], %s7273_s2  ;;  %s6982_s3 = scalar_lea.vmem %s8166_s7, 128 }
  0x8b   : > { %v7356_v49 = vsub.s32 %v467_v43, %v7338_v32  ;;  %p6983_p12 = scmp.ne.s32.totalorder %s8166_s7, %s6982_s3  ;;  %p8235_p0 = scmp.ne.s32.totalorder %s8227_s11, 0 }
  0x8c   : > { %s7082_s23 = smov [#allocation11]  }
  0x8d   : > { %p6984_p5 = pnand %p6983_p12, %p8235_p0 }
  0x8f   : > { %p6985_p3 = pneg %p6984_p5 }
 0x10d   : > { %v334_v2 = vpop.xlane.xlu0 %333 }
 0x10e   : > { %v336_v3 = vmul.f32 0.03125, %v334_v2 }
 0x110   : > { %v337_v4 = vsub.f32 %v7298_v0, %v336_v3 }
 0x112   : > { %v338_v5 = vmul.f32 %v337_v4, %v337_v4 }
 0x114   : > { %v339_v6 = vsel %vm331_vm0, %v338_v5, 0.0 }
 0x115   : > { %340 = vadd.xlane.f32.xlu0 %v339_v6 }
 0x19e   : > { %v341_v10 = vpop.xlane.xlu0 %340 }
 0x19f   : > { %v342_v11 = vmul.f32 0.03125, %v341_v10 }
 0x1a1   : > { %v343_v12 = vadd.f32 1e-05, %v342_v11 }
 0x1a3   : > { %6768 = vrsqrt.f32 %v343_v12 }
 0x1b0   : > { %v6769_v13 = vpop.eup %6768 }
 0x1b1   : > { %v345_v15 = vmul.f32 %v6769_v13, %v337_v4 }
 0x1b3   : > { %v350_v17 = vmul.f32 %v5993_v14, %v345_v15 }
 0x1b5   : > { %v355_v18 = vadd.f32 %v5994_v16, %v350_v17 }
 0x1b7   : > { %v356_v19 = vpack.c.bf16 %v355_v18, %v355_v18 }
 0x1b9   : > { %6282 = vmatmul.mubr.msk.bf16.vlgmr.msra.gmra.mxu1 %vm331_vm0, %v356_v19 }
 0x1ba   : > { %6287 = vmatprep.mubr.msk.bf16.mxu1 %vm7070_vm1, %v7069_v8 }
 0x279   : > { %v415_v21 = vpop.f32.mrf.mxu1 }
 0x27a   : > { %v7315_v22 = vadd.f32 %v5995_v20, %v415_v21 }
 0x27b   : > { %v6283_v23 = vpop.f32.mrf.mxu1 }
 0x27c   : > { %428 = vrot.lane.b32.xlu0 %v7315_v22, %s7071_s24  ;;  %422 = vrot.lane.b32.xlu1 %v7315_v22, %s7072_s9 }
 0x27d   : > { %v418_v24 = vpop.f32.mrf.mxu1 }
 0x27f   : > { %v6284_v25 = vpop.f32.mrf.mxu1 }
 0x280   : > { %425 = vrot.lane.b32.xlu1 %v7315_v22, %s7073_s13 }
 0x284   : > { %571 = vrot.lane.b32.xlu1 %v7315_v22, %s7074_s29 }
 0x2ee   : > { %v7325_v26 = vpop.permute.xlu1 %422  ;;  %v7333_v28 = vpop.permute.xlu0 %428 }
 0x2ef   : > { %573 = vrot.lane.b32.xlu1 %v7325_v26, %s7074_s29  ;;  %v447_v40 = vcombine.low %v7325_v26, %v7333_v28  ;;  %v448_v41 = vcombine.high %v7325_v26, %v7333_v28 }
 0x2f1   : > { %v455_v46 = vrot.slane %v447_v40, %v7345_v39  ;;  %v462_v47 = vrot.slane %v448_v41, %v7345_v39 }
 0x2f2   : > { %v7329_v27 = vpop.permute.xlu1 %425 }
 0x2f3   : > { %575 = vrot.lane.b32.xlu1 %v7329_v27, %s7074_s29  ;;  %v431_v37 = vcombine.low %v7315_v22, %v7329_v27  ;;  %v432_v38 = vcombine.high %v7315_v22, %v7329_v27 }
 0x2f5   : > { %v439_v44 = vrot.slane %v431_v37, %v7345_v39  ;;  %v446_v45 = vrot.slane %v432_v38, %v7345_v39 }
 0x2f6   : > { %v572_v34 = vpop.permute.xlu1 %571 }
 0x2f7   : > { %577 = vrot.lane.b32.xlu1 %v7333_v28, %s7074_s29  ;;  %v463_v50 = vcombine.low %v439_v44, %v455_v46  ;;  %v464_v51 = vcombine.high %v439_v44, %v455_v46  ;;  %v479_v52 = vcombine.low %v446_v45, %v462_v47  ;;  %v480_v53 = vcombine.high %v446_v45, %v462_v47 }
 0x2f9   : > { %v471_v59 = vrot.slane %v463_v50, %v7356_v49  ;;  %v478_v60 = vrot.slane %v464_v51, %v7356_v49  ;;  %v487_v61 = vrot.slane %v479_v52, %v7356_v49  ;;  %v494_v62 = vrot.slane %v480_v53, %v7356_v49 }
 0x2fb   : > { %v499_v9 = vcombine.low %v471_v59, %v478_v60  ;;  %v5999_v10 = vcombine.high %v471_v59, %v478_v60  ;;  %v515_v11 = vcombine.low %v487_v61, %v494_v62  ;;  %v6000_v12 = vcombine.high %v487_v61, %v494_v62 }
 0x2fd   : > { %v506_v21 = vrot.slane %v499_v9, %v7345_v39  ;;  %v514_v23 = vrot.slane %v5999_v10, %v7345_v39  ;;  %v522_v24 = vrot.slane %v515_v11, %v7345_v39  ;;  %v530_v25 = vrot.slane %v6000_v12, %v7345_v39 }
 0x2fe   : > { %v326_v11 = vand.u32 127, %v323_v29  ;;  %v7077_v12 = vmov -1e+30  }
 0x2ff   : > { %v547_v43 = vcombine.low %v522_v24, %v530_v25  ;;  %v548_v60 = vcombine.high %v522_v24, %v530_v25 }
 0x300   : > { %vm327_vm3 = vcmp.ge.s32.totalorder %v7338_v32, %v326_v11 }
 0x301   : > { %v555_v52 = vrot.slane %v547_v43, %v7356_v49 }
 0x361   : > { %v574_v42 = vpop.permute.xlu1 %573 }
 0x365   : > { %v576_v48 = vpop.permute.xlu1 %575 }
 0x366   : > { %v583_v54 = vcombine.low %v572_v34, %v576_v48  ;;  %v584_v55 = vcombine.high %v572_v34, %v576_v48 }
 0x368   : > { %v591_v63 = vrot.slane %v583_v54, %v7345_v39  ;;  %v598_v1 = vrot.slane %v584_v55, %v7345_v39 }
 0x369   : > { %v578_v56 = vpop.permute.xlu1 %577 }
 0x36a   : > { %v599_v57 = vcombine.low %v574_v42, %v578_v56  ;;  %v600_v58 = vcombine.high %v574_v42, %v578_v56  ;;  %v531_v42 = vcombine.low %v506_v21, %v514_v23 }
 0x36c   : > { %v607_v2 = vrot.slane %v599_v57, %v7345_v39  ;;  %v614_v3 = vrot.slane %v600_v58, %v7345_v39  ;;  %v539_v51 = vrot.slane %v531_v42, %v7356_v49  ;;  %v532_v57 = vcombine.high %v506_v21, %v514_v23 }
 0x36e   : > { %v615_v4 = vcombine.low %v591_v63, %v607_v2  ;;  %v616_v5 = vcombine.high %v591_v63, %v607_v2  ;;  %v631_v6 = vcombine.low %v598_v1, %v614_v3  ;;  %v632_v7 = vcombine.high %v598_v1, %v614_v3 }
 0x36f   : > { %v563_v58 = vcombine.low %v539_v51, %v555_v52  ;;  %v564_v59 = vcombine.high %v539_v51, %v555_v52  ;;  %v546_v2 = vrot.slane %v532_v57, %v7356_v49  ;;  %v562_v3 = vrot.slane %v548_v60, %v7356_v49 }
 0x370   : > { %v623_v13 = vrot.slane %v615_v4, %v7356_v49  ;;  %v630_v14 = vrot.slane %v616_v5, %v7356_v49  ;;  %v639_v15 = vrot.slane %v631_v6, %v7356_v49  ;;  %v646_v16 = vrot.slane %v632_v7, %v7356_v49 }
 0x371   : > { %v567_v63 = vpack.c.bf16 %v563_v58, %v563_v58  ;;  %v568_v1 = vpack.c.bf16 %v564_v59, %v564_v59  ;;  %v565_v6 = vcombine.low %v546_v2, %v562_v3  ;;  %v566_v7 = vcombine.high %v546_v2, %v562_v3 }
 0x372   : > { %v651_v17 = vcombine.low %v623_v13, %v630_v14  ;;  %v6001_v18 = vcombine.high %v623_v13, %v630_v14  ;;  %v667_v19 = vcombine.low %v639_v15, %v646_v16  ;;  %v6002_v20 = vcombine.high %v639_v15, %v646_v16 }
 0x373   : > { %v569_v9 = vpack.c.bf16 %v565_v6, %v565_v6  ;;  %v570_v10 = vpack.c.bf16 %v566_v7, %v566_v7  ;;  %v7408_v13 = vsel %vm327_vm3, 0.0, %v7077_v12 }
 0x374   : > { %v658_v30 = vrot.slane %v651_v17, %v7345_v39  ;;  %v666_v31 = vrot.slane %v6001_v18, %v7345_v39  ;;  %v674_v33 = vrot.slane %v667_v19, %v7345_v39  ;;  %v682_v34 = vrot.slane %v6002_v20, %v7345_v39 }
 0x376   : > { %v683_v35 = vcombine.low %v658_v30, %v666_v31  ;;  %v699_v36 = vcombine.low %v674_v33, %v682_v34  ;;  %v684_v37 = vcombine.high %v658_v30, %v666_v31  ;;  %v700_v38 = vcombine.high %v674_v33, %v682_v34 }
 0x378   : > { %v691_v40 = vrot.slane %v683_v35, %v7356_v49  ;;  %v707_v41 = vrot.slane %v699_v36, %v7356_v49  ;;  %v698_v46 = vrot.slane %v684_v37, %v7356_v49  ;;  %v714_v47 = vrot.slane %v700_v38, %v7356_v49 }
 0x37a   : > { %v715_v44 = vcombine.low %v691_v40, %v707_v41  ;;  %v716_v45 = vcombine.high %v691_v40, %v707_v41  ;;  %v717_v55 = vcombine.low %v698_v46, %v714_v47  ;;  %v718_v56 = vcombine.high %v698_v46, %v714_v47 }
 0x37c   : > { %v719_v48 = vpack.c.bf16 %v715_v44, %v715_v44  ;;  %v720_v50 = vpack.c.bf16 %v716_v45, %v716_v45  ;;  %v721_v61 = vpack.c.bf16 %v717_v55, %v717_v55  ;;  %v722_v62 = vpack.c.bf16 %v718_v56, %v718_v56 }
 0x37e   : > { %v880_v53 = vsel %vm875_vm2, %v719_v48, 0  ;;  %v926_v54 = vsel %vm875_vm2, %v720_v50, 0  ;;  %v972_v4 = vsel %vm875_vm2, %v721_v61, 0  ;;  %v1018_v5 = vsel %vm875_vm2, %v722_v62, 0 }
 0x37f   : > { %6286 = vmatpush3.bf16.xpose.msra.mxu1 %v880_v53  ;;  %6292 = vmatpush3.bf16.xpose.msra.mxu0 %v926_v54 }
 0x380   : > { %6297 = vmatprep.subr.bf16.mxu1 %v7069_v8  ;;  %6303 = vmatprep.subr.bf16.mxu0 %v7069_v8 }
 0x386   : > { %6288 = vmatmul.mubr.msk.bf16.vlgmr.msra.gmra.mxu1 %vm875_vm2, %v567_v63  ;;  %6294 = vmatmul.mubr.msk.bf16.vlgmr.msra.gmra.mxu0 %vm875_vm2, %v568_v1 }
 0x387   : > { %6298 = vmatpush3.bf16.xpose.msra.mxu1 %v972_v4  ;;  %6304 = vmatpush3.bf16.xpose.msra.mxu0 %v1018_v5 }
 0x388   : > { %6299 = vmatprep.mubr.msk.bf16.mxu1 %vm7070_vm1, %v7069_v8  ;;  %6305 = vmatprep.mubr.msk.bf16.mxu0 %vm7070_vm1, %v7069_v8 }
 0x389   : > { %6309 = vmatprep.subr.bf16.mxu1 %v7069_v8  ;;  %6315 = vmatprep.subr.bf16.mxu0 %v7069_v8 }
 0x38e   : > { %6300 = vmatmul.mubr.msk.bf16.vlgmr.msra.gmra.mxu1 %vm875_vm2, %v569_v9  ;;  %6306 = vmatmul.mubr.msk.bf16.vlgmr.msra.gmra.mxu0 %vm875_vm2, %v570_v10 }
 0x38f   : > { %6311 = vmatprep.mubr.msk.bf16.mxu1 %vm7070_vm1, %v7069_v8  ;;  %6317 = vmatprep.mubr.msk.bf16.mxu0 %vm7070_vm1, %v7069_v8 }
 0x446   : > { %v916_v14 = vpop.f32.mrf.mxu1  ;;  %v962_v15 = vpop.f32.mrf.mxu0 }
 0x447   : > { %v917_v16 = vadd.f32 %v916_v14, %v7408_v13  ;;  %v963_v17 = vadd.f32 %v962_v15, %v7408_v13 }
 0x448   : > { %v6289_v18 = vpop.f32.mrf.mxu1  ;;  %v6295_v19 = vpop.f32.mrf.mxu0 }
 0x449   : > { %v1063_v20 = vsel %vm875_vm2, %v963_v17, -inf  ;;  %v1060_v21 = vsel %vm875_vm2, %v917_v16, -inf }
 0x44a   : > { %1064 = vmax.xlane.f32.xlu0 %v1063_v20  ;;  %v965_v23 = vpop.f32.mrf.mxu0  ;;  %1061 = vmax.xlane.f32.xlu1 %v1060_v21  ;;  %v919_v29 = vpop.f32.mrf.mxu1 }
 0x44c   : > { %v6290_v32 = vpop.f32.mrf.mxu1  ;;  %v6296_v24 = vpop.f32.mrf.mxu0 }
 0x44e   : > { %v1008_v25 = vpop.f32.mrf.mxu1  ;;  %v1054_v30 = vpop.f32.mrf.mxu0 }
 0x44f   : > { %v1009_v31 = vadd.f32 %v1008_v25, %v7408_v13  ;;  %v1055_v33 = vadd.f32 %v1054_v30, %v7408_v13 }
 0x450   : > { %v6301_v34 = vpop.f32.mrf.mxu1  ;;  %v6307_v35 = vpop.f32.mrf.mxu0 }
 0x451   : > { %v1069_v36 = vsel %vm875_vm2, %v1055_v33, -inf  ;;  %v1066_v37 = vsel %vm875_vm2, %v1009_v31, -inf }
 0x452   : > { %1070 = vmax.xlane.f32.xlu0 %v1069_v36  ;;  %v1057_v38 = vpop.f32.mrf.mxu0  ;;  %1067 = vmax.xlane.f32.xlu1 %v1066_v37  ;;  %v1011_v40 = vpop.f32.mrf.mxu1 }
 0x454   : > { %v6302_v41 = vpop.f32.mrf.mxu1  ;;  %v6308_v42 = vpop.f32.mrf.mxu0 }
 0x463   : > { %723 = vrot.lane.b32.xlu1 %v7315_v22, %s7078_s12 }
 0x4d3   : > { %v1065_v43 = vpop.xlane.xlu0 %1064  ;;  %v1062_v44 = vpop.xlane.xlu1 %1061 }
 0x4d4   : > { %v1073_v45 = vsub.f32 %v963_v17, %v1065_v43  ;;  %v1072_v46 = vsub.f32 %v917_v16, %v1062_v44 }
 0x4d6   : > { %v1078_v47 = vmul.f32 1.442695, %v1073_v45  ;;  %v1076_v48 = vmul.f32 1.442695, %v1072_v46 }
 0x4d8   : > { %6770 = vpow2.f32 %v1078_v47 }
 0x4d9   : > { %6772 = vpow2.f32 %v1076_v48 }
 0x4db   : > { %v1068_v22 = vpop.xlane.xlu1 %1067  ;;  %v1071_v55 = vpop.xlane.xlu0 %1070 }
 0x4dc   : > { %v1074_v54 = vsub.f32 %v1009_v31, %v1068_v22  ;;  %v1075_v57 = vsub.f32 %v1055_v33, %v1071_v55 }
 0x4de   : > { %v1080_v56 = vmul.f32 1.442695, %v1074_v54  ;;  %v1082_v58 = vmul.f32 1.442695, %v1075_v57 }
 0x4e0   : > { %6774 = vpow2.f32 %v1080_v56 }
 0x4e1   : > { %6776 = vpow2.f32 %v1082_v58 }
 0x4e5   : > { %v7420_v50 = vpop.eup %6770 }
 0x4e6   : > { %v7422_v51 = vpop.eup %6772  ;;  %v1087_v52 = vsel %vm875_vm2, %v7420_v50, 0.0 }
 0x4e7   : > { %1088 = vadd.xlane.f32.xlu0 %v1087_v52  ;;  %v1084_v53 = vsel %vm875_vm2, %v7422_v51, 0.0 }
 0x4e8   : > { %1085 = vadd.xlane.f32.xlu1 %v1084_v53 }
 0x4ed   : > { %v7434_v59 = vpop.eup %6774 }
 0x4ee   : > { %v1090_v60 = vsel %vm875_vm2, %v7434_v59, 0.0 }
 0x4f9   : > { %727 = vrot.lane.b32.xlu1 %v7329_v27, %s7078_s12  ;;  %v7438_v27 = vpop.eup %6776 }
 0x4fd   : > { %729 = vrot.lane.b32.xlu1 %v7333_v28, %s7078_s12  ;;  %725 = vrot.lane.b32.xlu0 %v7325_v26, %s7078_s12  ;;  %v1093_v28 = vsel %vm875_vm2, %v7438_v27, 0.0  ;;  %v724_v26 = vpop.permute.xlu1 %723 }
 0x51c   : > { %1091 = vadd.xlane.f32.xlu0 %v1090_v60 }
 0x521   : > { %1094 = vadd.xlane.f32.xlu1 %v1093_v28 }
 0x570   : > { %v1089_v62 = vpop.xlane.xlu0 %1088 }
 0x571   : > { %v1086_v61 = vpop.xlane.xlu1 %1085  ;;  %6778 = vrcp.f32 %v1089_v62 }
 0x572   : > { %6780 = vrcp.f32 %v1086_v61 }
 0x574   : > { %v726_v3 = vpop.permute.xlu0 %725 }
 0x575   : > { %v728_v63 = vpop.permute.xlu1 %727 }
 0x576   : > { %v735_v1 = vcombine.low %v724_v26, %v728_v63  ;;  %v736_v2 = vcombine.high %v724_v26, %v728_v63 }
 0x578   : > { %v743_v7 = vrot.slane %v735_v1, %v7345_v39  ;;  %v750_v9 = vrot.slane %v736_v2, %v7345_v39 }
 0x579   : > { %v730_v4 = vpop.permute.xlu1 %729 }
 0x57a   : > { %v751_v5 = vcombine.low %v726_v3, %v730_v4  ;;  %v752_v6 = vcombine.high %v726_v3, %v730_v4 }
 0x57c   : > { %v759_v10 = vrot.slane %v751_v5, %v7345_v39  ;;  %v766_v11 = vrot.slane %v752_v6, %v7345_v39 }
 0x57e   : > { %v767_v12 = vcombine.low %v743_v7, %v759_v10  ;;  %v768_v14 = vcombine.high %v743_v7, %v759_v10  ;;  %v783_v15 = vcombine.low %v750_v9, %v766_v11  ;;  %v784_v16 = vcombine.high %v750_v9, %v766_v11  ;;  %v6779_v37 = vpop.eup %6778 }
 0x57f   : > { %v6781_v38 = vpop.eup %6780  ;;  %v1099_v22 = vmul.f32 %v6779_v37, %v7420_v50 }
 0x580   : > { %v775_v17 = vrot.slane %v767_v12, %v7356_v49  ;;  %v782_v18 = vrot.slane %v768_v14, %v7356_v49  ;;  %v791_v19 = vrot.slane %v783_v15, %v7356_v49  ;;  %v798_v20 = vrot.slane %v784_v16, %v7356_v49 }
 0x581   : > { %v1097_v53 = vmul.f32 %v6781_v38, %v7422_v51  ;;  %v1105_v60 = vpack.c.bf16 %v1099_v22, %v1099_v22 }
 0x582   : > { %v803_v21 = vcombine.low %v775_v17, %v782_v18  ;;  %v6003_v23 = vcombine.high %v775_v17, %v782_v18  ;;  %v819_v29 = vcombine.low %v791_v19, %v798_v20  ;;  %v6004_v32 = vcombine.high %v791_v19, %v798_v20 }
 0x583   : > { %v1104_v58 = vpack.c.bf16 %v1097_v53, %v1097_v53 }
 0x584   : > { %v810_v24 = vrot.slane %v803_v21, %v7345_v39  ;;  %v818_v25 = vrot.slane %v6003_v23, %v7345_v39  ;;  %v826_v30 = vrot.slane %v819_v29, %v7345_v39  ;;  %v834_v31 = vrot.slane %v6004_v32, %v7345_v39 }
 0x586   : > { %v835_v33 = vcombine.low %v810_v24, %v818_v25  ;;  %v851_v34 = vcombine.low %v826_v30, %v834_v31  ;;  %v836_v35 = vcombine.high %v810_v24, %v818_v25  ;;  %v852_v36 = vcombine.high %v826_v30, %v834_v31 }
 0x588   : > { %v843_v40 = vrot.slane %v835_v33, %v7356_v49  ;;  %v859_v41 = vrot.slane %v851_v34, %v7356_v49  ;;  %v850_v42 = vrot.slane %v836_v35, %v7356_v49  ;;  %v866_v43 = vrot.slane %v852_v36, %v7356_v49  ;;  %v6730_v35 = vld [vmem:[#allocation7 + $0x18] sm:$0xff]  }
 0x58a   : > { %v867_v44 = vcombine.low %v843_v40, %v859_v41  ;;  %v868_v45 = vcombine.high %v843_v40, %v859_v41  ;;  %v869_v46 = vcombine.low %v850_v42, %v866_v43  ;;  %v870_v47 = vcombine.high %v850_v42, %v866_v43 }
 0x58c   : > { %v871_v48 = vpack.c.bf16 %v867_v44, %v867_v44  ;;  %v872_v52 = vpack.c.bf16 %v868_v45, %v868_v45  ;;  %v873_v56 = vpack.c.bf16 %v869_v46, %v869_v46  ;;  %v874_v57 = vpack.c.bf16 %v870_v47, %v870_v47  ;;  %v6731_v46 = vld [vmem:[#allocation7 + $0x10] sm:$0xff]  }
 0x58e   : > { %v1113_v54 = vsel %vm1111_vm4, %v871_v48, 0  ;;  %v1159_v55 = vsel %vm1111_vm4, %v872_v52, 0  ;;  %v1205_v50 = vsel %vm1111_vm4, %v873_v56, 0  ;;  %v1251_v51 = vsel %vm1111_vm4, %v874_v57, 0 }
 0x58f   : > { %6310 = vmatpush3.bf16.msra.mxu1 %v1113_v54  ;;  %6316 = vmatpush3.bf16.msra.mxu0 %v1159_v55 }
 0x590   : > { %6321 = vmatprep.subr.bf16.mxu1 %v7069_v8  ;;  %6327 = vmatprep.subr.bf16.mxu0 %v7069_v8 }
 0x592   : > { %6312 = vmatmul.mubr.msk.bf16.vlgmr.msra.gmra.mxu1 %vm875_vm2, %v1104_v58  ;;  %6318 = vmatmul.mubr.msk.bf16.vlgmr.msra.gmra.mxu0 %vm875_vm2, %v1105_v60 }
 0x593   : > { %6322 = vmatpush3.bf16.msra.mxu1 %v1205_v50  ;;  %6328 = vmatpush3.bf16.msra.mxu0 %v1251_v51 }
 0x594   : > { %6323 = vmatprep.mubr.msk.bf16.mxu1 %vm7070_vm1, %v7069_v8  ;;  %6329 = vmatprep.mubr.msk.bf16.mxu0 %vm7070_vm1, %v7069_v8 }
 0x595   : > { %6333 = vmatprep.subr.bf16.mxu1 %v7069_v8  ;;  %6341 = vmatprep.subr.bf16.mxu0 %v7069_v8 }
 0x5a5   : > { %v1092_v28 = vpop.xlane.xlu0 %1091 }
 0x5a6   : > { %6782 = vrcp.f32 %v1092_v28 }
 0x5aa   : > { %v1095_v26 = vpop.xlane.xlu1 %1094 }
 0x5ab   : > { %6784 = vrcp.f32 %v1095_v26 }
 0x5b3   : > { %v6783_v61 = vpop.eup %6782 }
 0x5b4   : > { %v1101_v62 = vmul.f32 %v6783_v61, %v7434_v59 }
 0x5b6   : > { %v1106_v63 = vpack.c.bf16 %v1101_v62, %v1101_v62 }
 0x5b8   : > { %v6785_v1 = vpop.eup %6784  ;;  %6324 = vmatmul.mubr.msk.bf16.vlgmr.msra.gmra.mxu1 %vm875_vm2, %v1106_v63 }
 0x5b9   : > { %v1103_v2 = vmul.f32 %v6785_v1, %v7438_v27  ;;  %6337 = vmatprep.mubr.msk.bf16.mxu1 %vm7070_vm1, %v7069_v8  ;;  %6334 = vmatpush3.bf16.msra.mxu1 %v6730_v35 }
 0x5ba   : > { %6335 = vmatprep.subr.bf16.mxu1 %v7069_v8 }
 0x5bb   : > { %v1107_v3 = vpack.c.bf16 %v1103_v2, %v1103_v2 }
 0x5bd   : > { %6330 = vmatmul.mubr.msk.bf16.vlgmr.msra.gmra.mxu0 %vm875_vm2, %v1107_v3  ;;  %6336 = vmatpush3.bf16.msra.mxu1 %v6731_v46  ;;  %v6738_v46 = vld [vmem:[#allocation8 + $0x8] sm:$0xff]  }
 0x5be   : > { %6345 = vmatprep.mubr.msk.bf16.mxu0 %vm7070_vm1, %v7069_v8  ;;  %6349 = vmatprep.subr.bf16.mxu1 %v7069_v8 }
 0x652   : > { %v1149_v4 = vpop.f32.mrf.mxu1  ;;  %v1195_v5 = vpop.f32.mrf.mxu0 }
 0x654   : > { %v6313_v6 = vpop.f32.mrf.mxu1  ;;  %v6319_v7 = vpop.f32.mrf.mxu0 }
 0x655   : > { %v6015_v6 = vld [vmem:[#allocation10 + $0x3] ss:$0 sm:$0xff] }
 0x656   : > { %v1152_v59 = vpop.f32.mrf.mxu1  ;;  %v1198_v9 = vpop.f32.mrf.mxu0 }
 0x658   : > { %v6314_v10 = vpop.f32.mrf.mxu1  ;;  %v6320_v11 = vpop.f32.mrf.mxu0 }
 0x678   : > { %v1241_v12 = vpop.f32.mrf.mxu1 }
 0x679   : > { %v1293_v27 = vcombine.low %v1149_v4, %v1241_v12  ;;  %v1294_v15 = vcombine.high %v1149_v4, %v1241_v12 }
 0x67a   : > { %v6325_v14 = vpop.f32.mrf.mxu1 }
 0x67b   : > { %v1301_v23 = vrot.slane %v1293_v27, %v7345_v39  ;;  %v1308_v29 = vrot.slane %v1294_v15, %v7345_v39 }
 0x67c   : > { %v1244_v16 = vpop.f32.mrf.mxu1 }
 0x67d   : > { %v1287_v17 = vpop.f32.mrf.mxu0 }
 0x67e   : > { %v1309_v18 = vcombine.low %v1195_v5, %v1287_v17  ;;  %v1310_v19 = vcombine.high %v1195_v5, %v1287_v17  ;;  %v6326_v20 = vpop.f32.mrf.mxu1 }
 0x67f   : > { %v6331_v21 = vpop.f32.mrf.mxu0  ;;  %v6732_v20 = vld [vmem:[#allocation7 + $0x28] sm:$0xff]  }
 0x680   : > { %v1317_v32 = vrot.slane %v1309_v18, %v7345_v39  ;;  %v1324_v24 = vrot.slane %v1310_v19, %v7345_v39  ;;  %v7517_v18 = vld [vmem:[%s276_s30] sm:$0xff]  ;;  %6342 = vmatpush3.bf16.msra.mxu0 %v6732_v20  ;;  %v6733_v21 = vld [vmem:[#allocation7 + $0x20] sm:$0xff]   ;;  %s6986_s30 = sshll.u32 %s7082_s23, 4  ;;  %s6987_s30 = int_to_ptr.vmem [resolvable:$false] %s6986_s30 }
 0x681   : > { %v1290_v25 = vpop.f32.mrf.mxu0  ;;  %6343 = vmatprep.subr.bf16.mxu0 %v7069_v8  ;;  %p6989_p7 = scmp.lt.s32.totalorder %s8166_s7, %s6987_s30 }
 0x682   : > { %v1325_v30 = vcombine.low %v1301_v23, %v1317_v32  ;;  %v1326_v31 = vcombine.high %v1301_v23, %v1317_v32  ;;  %v1341_v33 = vcombine.low %v1308_v29, %v1324_v24  ;;  %v1342_v34 = vcombine.high %v1308_v29, %v1324_v24  ;;  %v6734_v23 = vld [vmem:[#allocation7 + $0x48] sm:$0xff]   ;;  %v6735_v29 = vld [vmem:[#allocation7 + $0x40] sm:$0xff]  }
 0x683   : > { %v6332_v36 = vpop.f32.mrf.mxu0 }
 0x684   : > { %v1333_v37 = vrot.slane %v1325_v30, %v7356_v49  ;;  %v1340_v38 = vrot.slane %v1326_v31, %v7356_v49  ;;  %v1349_v40 = vrot.slane %v1341_v33, %v7356_v49  ;;  %v1356_v41 = vrot.slane %v1342_v34, %v7356_v49  ;;  %6344 = vmatpush3.bf16.msra.mxu0 %v6733_v21 }
 0x685   : > { %6361 = vmatprep.subr.bf16.mxu0 %v7069_v8 }
 0x686   : > { %v1361_v42 = vcombine.low %v1333_v37, %v1340_v38  ;;  %v6013_v43 = vcombine.high %v1333_v37, %v1340_v38  ;;  %v1377_v44 = vcombine.low %v1349_v40, %v1356_v41  ;;  %v6014_v45 = vcombine.high %v1349_v40, %v1356_v41  ;;  %v6019_v37 = vld [vmem:[#allocation10 + $0x4] ss:$0 sm:$0xff]  ;;  %v6020_v40 = vld [vmem:[#allocation10 + $0x5] ss:$0 sm:$0xff] }
 0x688   : > { %v1368_v47 = vrot.slane %v1361_v42, %v7345_v39  ;;  %v1376_v48 = vrot.slane %v6013_v43, %v7345_v39  ;;  %v1384_v52 = vrot.slane %v1377_v44, %v7345_v39  ;;  %v1392_v53 = vrot.slane %v6014_v45, %v7345_v39  ;;  %v6736_v44 = vld [vmem:[#allocation7 + $0x38] sm:$0xff]   ;;  %v6737_v45 = vld [vmem:[#allocation7 + $0x30] sm:$0xff]  }
 0x68a   : > { %v1394_v22 = vcombine.high %v1368_v47, %v1376_v48  ;;  %v1410_v54 = vcombine.high %v1384_v52, %v1392_v53  ;;  %v1393_v55 = vcombine.low %v1368_v47, %v1376_v48  ;;  %v1409_v56 = vcombine.low %v1384_v52, %v1392_v53  ;;  %v6739_v47 = vld [vmem:[#allocation8] sm:$0xff]  }
 0x68c   : > { %v1408_v57 = vrot.slane %v1394_v22, %v7356_v49  ;;  %v1424_v58 = vrot.slane %v1410_v54, %v7356_v49  ;;  %v1401_v60 = vrot.slane %v1393_v55, %v7356_v49  ;;  %v1417_v50 = vrot.slane %v1409_v56, %v7356_v49  ;;  %v6031_v54 = vld [vmem:[#allocation10 + $0x8] ss:$0 sm:$0xff]  ;;  %v6032_v56 = vld [vmem:[#allocation10 + $0x9] ss:$0 sm:$0xff] }
 0x68e   : > { %v1427_v51 = vcombine.low %v1408_v57, %v1424_v58  ;;  %v1426_v28 = vcombine.high %v1401_v60, %v1417_v50  ;;  %v1425_v26 = vcombine.low %v1401_v60, %v1417_v50  ;;  %v1428_v61 = vcombine.high %v1408_v57, %v1424_v58 }
 0x690   : > { %1434 = vrot.lane.b32.xlu1 %v1427_v51, %s7079_s27  ;;  %1430 = vrot.lane.b32.xlu0 %v1426_v28, %s7080_s28  ;;  %v6021_v51 = vld [vmem:[#allocation10 + $0x6] ss:$0 sm:$0xff] }
 0x694   : > { %1438 = vrot.lane.b32.xlu0 %v1428_v61, %s7081_s8 }
 0x702   : > { %v1431_v62 = vpop.permute.xlu0 %1430  ;;  %v1435_v63 = vpop.permute.xlu1 %1434 }
 0x703   : > { %v1441_v1 = vsel %vm875_vm2, %v1425_v26, %v1431_v62 }
 0x704   : > { %v1443_v3 = vsel %vm1442_vm5, %v1441_v1, %v1435_v63 }
 0x706   : > { %v1439_v2 = vpop.permute.xlu0 %1438 }
 0x707   : > { %v1445_v4 = vsel %vm1444_vm6, %v1443_v3, %v1439_v2 }
 0x708   : > { %v1446_v5 = vpack.c.bf16 %v1445_v4, %v1445_v4  ;;  %v6033_v4 = vld [vmem:[#allocation10 + $0xa] ss:$0 sm:$0xff] }
 0x70a   : > { %6338 = vmatmul.mubr.msk.bf16.vlgmr.msra.gmra.mxu1 %vm331_vm0, %v1446_v5 }
 0x70b   : > { %6357 = vmatprep.mubr.msk.bf16.mxu1 %vm7070_vm1, %v7069_v8  ;;  %6350 = vmatpush3.bf16.msra.mxu1 %v6734_v23 }
 0x70c   : > { %6351 = vmatprep.subr.bf16.mxu1 %v7069_v8 }
 0x70f   : > { %6352 = vmatpush3.bf16.msra.mxu1 %v6735_v29 }
 0x710   : > { %6353 = vmatprep.subr.bf16.mxu1 %v7069_v8 }
 0x713   : > { %6354 = vmatpush3.bf16.msra.mxu1 %v6736_v44 }
 0x714   : > { %6355 = vmatprep.subr.bf16.mxu1 %v7069_v8 }
 0x717   : > { %6356 = vmatpush3.bf16.msra.mxu1 %v6737_v45 }
 0x718   : > { %6377 = vmatprep.subr.bf16.mxu1 %v7069_v8 }
 0x7ca   : > { %v1505_v7 = vpop.f32.mrf.mxu1 }
 0x7cb   : > { %v1506_v59 = vadd.f32 %v6015_v6, %v1505_v7 }
 0x7cc   : > { %v6339_v9 = vpop.f32.mrf.mxu1 }
 0x7cd   : > { %v7510_v10 = vadd.f32 %v1506_v59, %v7298_v0  ;;  %v1688_v0 = vsel %vm331_vm0, %v7517_v18, 0.0  ;;  %v6025_v9 = vld [vmem:[#allocation10 + $0x7] ss:$0 sm:$0xff] }
 0x7ce   : > { %v1508_v11 = vpop.f32.mrf.mxu1 }
 0x7cf   : > { %v1514_v12 = vsel %vm331_vm0, %v7510_v10, 0.0 }
 0x7d0   : > { %1515 = vadd.xlane.f32.xlu1 %v1514_v12  ;;  %v6340_v14 = vpop.f32.mrf.mxu1 }
 0x859   : > { %v1516_v27 = vpop.xlane.xlu1 %1515 }
 0x85a   : > { %v1517_v15 = vmul.f32 0.03125, %v1516_v27 }
 0x85c   : > { %v1518_v16 = vsub.f32 %v7510_v10, %v1517_v15 }
 0x85e   : > { %v1519_v17 = vmul.f32 %v1518_v16, %v1518_v16 }
 0x860   : > { %v1520_v19 = vsel %vm331_vm0, %v1519_v17, 0.0 }
 0x861   : > { %1521 = vadd.xlane.f32.xlu0 %v1520_v19 }
 0x865   : > { %1689 = vadd.xlane.f32.xlu0 %v1688_v0 }
 0x87b   : > { %1779 = vrot.lane.b32.xlu0 %v6738_v46, %s7074_s29 }
 0x8ea   : > { %v1522_v32 = vpop.xlane.xlu0 %1521 }
 0x8eb   : > { %v1523_v24 = vmul.f32 0.03125, %v1522_v32 }
 0x8ed   : > { %v1524_v25 = vadd.f32 1e-05, %v1523_v24 }
 0x8ee   : > { %v1690_v30 = vpop.xlane.xlu0 %1689 }
 0x8ef   : > { %6786 = vrsqrt.f32 %v1524_v25  ;;  %v1691_v31 = vmul.f32 0.03125, %v1690_v30 }
 0x8f1   : > { %v1692_v33 = vsub.f32 %v7517_v18, %v1691_v31 }
 0x8f2   : > { %v1780_v50 = vpop.permute.xlu0 %1779 }
 0x8f3   : > { %v1693_v34 = vmul.f32 %v1692_v33, %v1692_v33 }
 0x8f5   : > { %v1694_v35 = vsel %vm331_vm0, %v1693_v34, 0.0 }
 0x8f6   : > { %1695 = vadd.xlane.f32.xlu1 %v1694_v35 }
 0x8fc   : > { %v6787_v36 = vpop.eup %6786 }
 0x8fd   : > { %v1526_v38 = vmul.f32 %v6787_v36, %v1518_v16 }
 0x8ff   : > { %v1531_v41 = vmul.f32 %v6019_v37, %v1526_v38 }
 0x901   : > { %v1536_v42 = vadd.f32 %v6020_v40, %v1531_v41 }
 0x903   : > { %v1537_v43 = vpack.c.bf16 %v1536_v42, %v1536_v42 }
 0x905   : > { %6346 = vmatmul.mubr.msk.bf16.vlgmr.msra.gmra.mxu0 %vm331_vm0, %v1537_v43 }
 0x906   : > { %6365 = vmatprep.mubr.msk.bf16.mxu0 %vm7070_vm1, %v7069_v8  ;;  %6362 = vmatpush3.bf16.msra.mxu0 %v6738_v46 }
 0x907   : > { %6363 = vmatprep.subr.bf16.mxu0 %v7069_v8  ;;  %1777 = vrot.lane.b32.xlu1 %v6739_v47, %s7074_s29 }
 0x90a   : > { %6364 = vmatpush3.bf16.msra.mxu0 %v6739_v47 }
 0x90b   : > { %6369 = vmatprep.subr.bf16.mxu0 %v7069_v8  ;;  %1784 = vrot.lane.b32.xlu1 %v6033_v4, %s7074_s29 }
 0x97f   : > { %v1696_v48 = vpop.xlane.xlu1 %1695 }
 0x980   : > { %v1697_v52 = vmul.f32 0.03125, %v1696_v48 }
 0x982   : > { %v1698_v53 = vadd.f32 1e-05, %v1697_v52 }
 0x983   : > { %v1778_v3 = vpop.permute.xlu1 %1777 }
 0x984   : > { %6788 = vrsqrt.f32 %v1698_v53 }
 0x987   : > { %v1785_v19 = vpop.permute.xlu1 %1784 }
 0x991   : > { %v6789_v22 = vpop.eup %6788 }
 0x992   : > { %v1700_v55 = vmul.f32 %v6789_v22, %v1692_v33 }
 0x994   : > { %v1705_v57 = vmul.f32 %v6031_v54, %v1700_v55 }
 0x996   : > { %v1710_v58 = vadd.f32 %v6032_v56, %v1705_v57 }
 0x998   : > { %v1711_v60 = vpack.c.bf16 %v1710_v58, %v1710_v58 }
 0x99a   : > { %6366 = vmatmul.mubr.msk.bf16.vlgmr.msra.gmra.mxu0 %vm331_vm0, %v1711_v60 }
 0x99b   : > { %6373 = vmatprep.mubr.msk.bf16.mxu0 %vm7070_vm1, %v7069_v8  ;;  %6370 = vmatpush3.bf16.msra.mxu0 %v1780_v50 }
 0x99c   : > { %6371 = vmatprep.subr.bf16.mxu0 %v7069_v8 }
 0x99f   : > { %6372 = vmatpush3.bf16.msra.mxu0 %v1778_v3 }
 0x9a0   : > { %6383 = vmatprep.subr.bf16.mxu0 %v7069_v8 }
 0x9c5   : > { %v1596_v28 = vpop.f32.mrf.mxu0 }
 0x9c6   : > { %v1597_v26 = vadd.f32 %v6021_v51, %v1596_v28 }
 0x9c7   : > { %v6347_v61 = vpop.f32.mrf.mxu0 }
 0x9c8   : > { %v1602_v62 = vmax.f32 %v1597_v26, 0.0 }
 0x9c9   : > { %v1599_v63 = vpop.f32.mrf.mxu0 }
 0x9ca   : > { %v1603_v1 = vpack.c.bf16 %v1602_v62, %v1602_v62 }
 0x9cb   : > { %v6348_v2 = vpop.f32.mrf.mxu0 }
 0x9cc   : > { %6358 = vmatmul.mubr.msk.bf16.vlgmr.msra.gmra.mxu1 %vm1641_vm7, %v1603_v1 }
 0x9cd   : > { %6379 = vmatprep.mubr.msk.bf16.mxu1 %vm7070_vm1, %v7069_v8 }
 0xa5a   : > { %v1770_v5 = vpop.f32.mrf.mxu0 }
 0xa5b   : > { %v1771_v23 = vadd.f32 %v6033_v4, %v1770_v5 }
 0xa5c   : > { %v6367_v6 = vpop.f32.mrf.mxu0 }
 0xa5e   : > { %v1773_v7 = vpop.f32.mrf.mxu0 }
 0xa60   : > { %v6368_v59 = vpop.f32.mrf.mxu0 }
 0xa8c   : > { %v1679_v11 = vpop.f32.mrf.mxu1 }
 0xa8d   : > { %v1680_v12 = vadd.f32 %v6025_v9, %v1679_v11 }
 0xa8e   : > { %v6359_v14 = vpop.f32.mrf.mxu1 }
 0xa8f   : > { %v7547_v27 = vadd.f32 %v1680_v12, %v7510_v10 }
 0xa90   : > { %v1682_v15 = vpop.f32.mrf.mxu1 }
 0xa91   : > { %v1776_v16 = vpack.c.bf16 %v7547_v27, %v7547_v27 }
 0xa92   : > { %v6360_v17 = vpop.f32.mrf.mxu1 }
 0xa93   : > { %6374 = vmatmul.mubr.msk.bf16.vlgmr.msra.gmra.mxu0 %vm331_vm0, %v1776_v16 }
 0xa94   : > { %6385 = vmatprep.mubr.msk.bf16.mxu0 %vm7070_vm1, %v7069_v8 }
 0xb53   : > { %v1824_v0 = vpop.f32.mrf.mxu0 }
 0xb54   : > { %v7554_v20 = vadd.f32 %v1824_v0, %v1785_v19 }
 0xb55   : > { %v6375_v21 = vpop.f32.mrf.mxu0 }
 0xb56   : > { %1984 = vrot.lane.b32.xlu1 %v7554_v20, %s7073_s13  ;;  %1981 = vrot.lane.b32.xlu0 %v7554_v20, %s7072_s9 }
 0xb57   : > { %v1827_v10 = vpop.f32.mrf.mxu0 }
 0xb59   : > { %v6376_v29 = vpop.f32.mrf.mxu0 }
 0xb5a   : > { %1831 = vrot.lane.b32.xlu1 %v1771_v23, %s7072_s9  ;;  %1987 = vrot.lane.b32.xlu0 %v7554_v20, %s7071_s24 }
 0xb5e   : > { %1837 = vrot.lane.b32.xlu1 %v1771_v23, %s7071_s24  ;;  %1834 = vrot.lane.b32.xlu0 %v1771_v23, %s7073_s13 }
 0xbc8   : > { %v7565_v32 = vpop.permute.xlu1 %1984  ;;  %v7567_v24 = vpop.permute.xlu0 %1981 }
 0xbc9   : > { %v1990_v25 = vcombine.low %v7554_v20, %v7565_v32  ;;  %v1991_v30 = vcombine.high %v7554_v20, %v7565_v32 }
 0xbcb   : > { %v1998_v36 = vrot.slane %v1990_v25, %v7345_v39  ;;  %v2005_v37 = vrot.slane %v1991_v30, %v7345_v39 }
 0xbcc   : > { %v1832_v31 = vpop.permute.xlu1 %1831  ;;  %v7573_v33 = vpop.permute.xlu0 %1987 }
 0xbcd   : > { %v2006_v34 = vcombine.low %v7567_v24, %v7573_v33  ;;  %v2007_v35 = vcombine.high %v7567_v24, %v7573_v33 }
 0xbcf   : > { %v2014_v38 = vrot.slane %v2006_v34, %v7345_v39  ;;  %v2021_v40 = vrot.slane %v2007_v35, %v7345_v39 }
 0xbd0   : > { %v1838_v41 = vpop.permute.xlu1 %1837  ;;  %v1835_v42 = vpop.permute.xlu0 %1834 }
 0xbd1   : > { %v2022_v43 = vcombine.low %v1998_v36, %v2014_v38  ;;  %v2023_v44 = vcombine.high %v1998_v36, %v2014_v38  ;;  %v2038_v45 = vcombine.low %v2005_v37, %v2021_v40  ;;  %v2039_v46 = vcombine.high %v2005_v37, %v2021_v40 }
 0xbd2   : > { %v1856_v47 = vcombine.low %v1832_v31, %v1838_v41  ;;  %v1857_v48 = vcombine.high %v1832_v31, %v1838_v41  ;;  %v1840_v52 = vcombine.low %v1771_v23, %v1835_v42  ;;  %v1841_v53 = vcombine.high %v1771_v23, %v1835_v42 }
 0xbd3   : > { %v2030_v22 = vrot.slane %v2022_v43, %v7356_v49  ;;  %v2037_v54 = vrot.slane %v2023_v44, %v7356_v49  ;;  %v2046_v55 = vrot.slane %v2038_v45, %v7356_v49  ;;  %v2053_v56 = vrot.slane %v2039_v46, %v7356_v49 }
 0xbd4   : > { %v1864_v57 = vrot.slane %v1856_v47, %v7345_v39  ;;  %v1871_v58 = vrot.slane %v1857_v48, %v7345_v39  ;;  %v1848_v60 = vrot.slane %v1840_v52, %v7345_v39  ;;  %v1855_v50 = vrot.slane %v1841_v53, %v7345_v39 }
 0xbd5   : > { %v2058_v51 = vcombine.low %v2030_v22, %v2037_v54  ;;  %v6040_v28 = vcombine.high %v2030_v22, %v2037_v54  ;;  %v2074_v26 = vcombine.low %v2046_v55, %v2053_v56  ;;  %v6041_v61 = vcombine.high %v2046_v55, %v2053_v56 }
 0xbd6   : > { %v1872_v62 = vcombine.low %v1848_v60, %v1864_v57  ;;  %v1873_v63 = vcombine.high %v1848_v60, %v1864_v57  ;;  %v1888_v1 = vcombine.low %v1855_v50, %v1871_v58  ;;  %v1889_v2 = vcombine.high %v1855_v50, %v1871_v58 }
 0xbd7   : > { %v2065_v3 = vrot.slane %v2058_v51, %v7345_v39  ;;  %v2073_v4 = vrot.slane %v6040_v28, %v7345_v39  ;;  %v2081_v5 = vrot.slane %v2074_v26, %v7345_v39  ;;  %v2089_v6 = vrot.slane %v6041_v61, %v7345_v39 }
 0xbd8   : > { %v1880_v7 = vrot.slane %v1872_v62, %v7356_v49  ;;  %v1887_v59 = vrot.slane %v1873_v63, %v7356_v49  ;;  %v1896_v9 = vrot.slane %v1888_v1, %v7356_v49  ;;  %v1903_v11 = vrot.slane %v1889_v2, %v7356_v49 }
 0xbd9   : > { %v2090_v12 = vcombine.low %v2065_v3, %v2073_v4  ;;  %v2106_v14 = vcombine.low %v2081_v5, %v2089_v6  ;;  %v2091_v15 = vcombine.high %v2065_v3, %v2073_v4  ;;  %v2107_v16 = vcombine.high %v2081_v5, %v2089_v6 }
 0xbda   : > { %v1908_v17 = vcombine.low %v1880_v7, %v1887_v59  ;;  %v6038_v19 = vcombine.high %v1880_v7, %v1887_v59  ;;  %v1924_v0 = vcombine.low %v1896_v9, %v1903_v11  ;;  %v6039_v21 = vcombine.high %v1896_v9, %v1903_v11 }
 0xbdb   : > { %v2098_v10 = vrot.slane %v2090_v12, %v7356_v49  ;;  %v2114_v23 = vrot.slane %v2106_v14, %v7356_v49  ;;  %v2105_v36 = vrot.slane %v2091_v15, %v7356_v49  ;;  %v2121_v37 = vrot.slane %v2107_v16, %v7356_v49 }
 0xbdc   : > { %v1915_v29 = vrot.slane %v1908_v17, %v7345_v39  ;;  %v1923_v25 = vrot.slane %v6038_v19, %v7345_v39  ;;  %v1931_v30 = vrot.slane %v1924_v0, %v7345_v39  ;;  %v1939_v31 = vrot.slane %v6039_v21, %v7345_v39 }
 0xbdd   : > { %v2122_v34 = vcombine.low %v2098_v10, %v2114_v23  ;;  %v2123_v35 = vcombine.high %v2098_v10, %v2114_v23  ;;  %v2124_v47 = vcombine.low %v2105_v36, %v2121_v37  ;;  %v2125_v48 = vcombine.high %v2105_v36, %v2121_v37 }
 0xbde   : > { %v1940_v38 = vcombine.low %v1915_v29, %v1923_v25  ;;  %v1956_v40 = vcombine.low %v1931_v30, %v1939_v31  ;;  %v1941_v52 = vcombine.high %v1915_v29, %v1923_v25  ;;  %v1957_v53 = vcombine.high %v1931_v30, %v1939_v31 }
 0xbdf   : > { %v2126_v41 = vpack.c.bf16 %v2122_v34, %v2122_v34  ;;  %v2127_v42 = vpack.c.bf16 %v2123_v35, %v2123_v35  ;;  %v2128_v55 = vpack.c.bf16 %v2124_v47, %v2124_v47  ;;  %v2129_v56 = vpack.c.bf16 %v2125_v48, %v2125_v48 }
 0xbe0   : > { %v1948_v43 = vrot.slane %v1940_v38, %v7356_v49  ;;  %v1964_v44 = vrot.slane %v1956_v40, %v7356_v49  ;;  %v1955_v60 = vrot.slane %v1941_v52, %v7356_v49  ;;  %v1971_v50 = vrot.slane %v1957_v53, %v7356_v49 }
 0xbe1   : > { %v2286_v45 = vsel %vm875_vm2, %v2126_v41, 0  ;;  %v2332_v46 = vsel %vm875_vm2, %v2127_v42, 0  ;;  %v2378_v51 = vsel %vm875_vm2, %v2128_v55, 0  ;;  %v2424_v28 = vsel %vm875_vm2, %v2129_v56, 0 }
 0xbe2   : > { %6378 = vmatpush3.bf16.xpose.msra.mxu1 %v2286_v45  ;;  %6384 = vmatpush3.bf16.xpose.msra.mxu0 %v2332_v46  ;;  %v1972_v22 = vcombine.low %v1948_v43, %v1964_v44  ;;  %v1973_v54 = vcombine.high %v1948_v43, %v1964_v44  ;;  %v1974_v26 = vcombine.low %v1955_v60, %v1971_v50 }
 0xbe3   : > { %6389 = vmatprep.subr.bf16.mxu1 %v7069_v8  ;;  %6395 = vmatprep.subr.bf16.mxu0 %v7069_v8  ;;  %v1975_v61 = vcombine.high %v1955_v60, %v1971_v50 }
 0xbe4   : > { %v1976_v57 = vpack.c.bf16 %v1972_v22, %v1972_v22  ;;  %v1977_v58 = vpack.c.bf16 %v1973_v54, %v1973_v54  ;;  %v1978_v62 = vpack.c.bf16 %v1974_v26, %v1974_v26 }
 0xbe5   : > { %v1979_v63 = vpack.c.bf16 %v1975_v61, %v1975_v61 }
 0xbe9   : > { %6380 = vmatmul.mubr.msk.bf16.vlgmr.msra.gmra.mxu1 %vm875_vm2, %v1976_v57  ;;  %6386 = vmatmul.mubr.msk.bf16.vlgmr.msra.gmra.mxu0 %vm875_vm2, %v1977_v58 }
 0xbea   : > { %6390 = vmatpush3.bf16.xpose.msra.mxu1 %v2378_v51  ;;  %6396 = vmatpush3.bf16.xpose.msra.mxu0 %v2424_v28 }
 0xbeb   : > { %6391 = vmatprep.mubr.msk.bf16.mxu1 %vm7070_vm1, %v7069_v8  ;;  %6397 = vmatprep.mubr.msk.bf16.mxu0 %vm7070_vm1, %v7069_v8 }
 0xbec   : > { %6401 = vmatprep.subr.bf16.mxu1 %v7069_v8  ;;  %6407 = vmatprep.subr.bf16.mxu0 %v7069_v8 }
 0xbf1   : > { %6392 = vmatmul.mubr.msk.bf16.vlgmr.msra.gmra.mxu1 %vm875_vm2, %v1978_v62  ;;  %6398 = vmatmul.mubr.msk.bf16.vlgmr.msra.gmra.mxu0 %vm875_vm2, %v1979_v63 }
 0xbf2   : > { %6403 = vmatprep.mubr.msk.bf16.mxu1 %vm7070_vm1, %v7069_v8  ;;  %6409 = vmatprep.mubr.msk.bf16.mxu0 %vm7070_vm1, %v7069_v8 }
 0xca9   : > { %v2322_v1 = vpop.f32.mrf.mxu1  ;;  %v2368_v2 = vpop.f32.mrf.mxu0 }
 0xcaa   : > { %v2469_v3 = vsel %vm875_vm2, %v2368_v2, -inf  ;;  %v2466_v4 = vsel %vm875_vm2, %v2322_v1, -inf }
 0xcab   : > { %2470 = vmax.xlane.f32.xlu1 %v2469_v3  ;;  %v6387_v5 = vpop.f32.mrf.mxu0  ;;  %2467 = vmax.xlane.f32.xlu0 %v2466_v4  ;;  %v6381_v6 = vpop.f32.mrf.mxu1 }
 0xcad   : > { %v2325_v7 = vpop.f32.mrf.mxu1  ;;  %v2371_v59 = vpop.f32.mrf.mxu0 }
 0xcaf   : > { %v6382_v9 = vpop.f32.mrf.mxu1  ;;  %v6388_v11 = vpop.f32.mrf.mxu0 }
 0xcb1   : > { %v2414_v12 = vpop.f32.mrf.mxu1  ;;  %v2460_v14 = vpop.f32.mrf.mxu0 }
 0xcb2   : > { %v2472_v15 = vsel %vm875_vm2, %v2414_v12, -inf  ;;  %v2475_v21 = vsel %vm875_vm2, %v2460_v14, -inf }
 0xcb3   : > { %v6399_v16 = vpop.f32.mrf.mxu0  ;;  %2473 = vmax.xlane.f32.xlu0 %v2472_v15  ;;  %v6393_v17 = vpop.f32.mrf.mxu1 }
 0xcb5   : > { %v2417_v19 = vpop.f32.mrf.mxu1  ;;  %v2463_v0 = vpop.f32.mrf.mxu0 }
 0xcb7   : > { %v6400_v10 = vpop.f32.mrf.mxu0  ;;  %2476 = vmax.xlane.f32.xlu0 %v2475_v21  ;;  %v6394_v23 = vpop.f32.mrf.mxu1 }
 0xcbc   : > { %2130 = vrot.lane.b32.xlu1 %v7554_v20, %s7074_s29 }
 0xd34   : > { %v2471_v29 = vpop.xlane.xlu1 %2470  ;;  %v2468_v25 = vpop.xlane.xlu0 %2467 }
 0xd35   : > { %v2479_v30 = vsub.f32 %v2368_v2, %v2471_v29  ;;  %v2478_v31 = vsub.f32 %v2322_v1, %v2468_v25 }
 0xd37   : > { %v2484_v34 = vmul.f32 1.442695, %v2479_v30  ;;  %v2482_v35 = vmul.f32 1.442695, %v2478_v31 }
 0xd39   : > { %6790 = vpow2.f32 %v2484_v34 }
 0xd3a   : > { %6792 = vpow2.f32 %v2482_v35 }
 0xd3c   : > { %v2474_v20 = vpop.xlane.xlu0 %2473 }
 0xd3d   : > { %v2480_v41 = vsub.f32 %v2414_v12, %v2474_v20 }
 0xd3f   : > { %v2486_v43 = vmul.f32 1.442695, %v2480_v41 }
 0xd40   : > { %v2477_v42 = vpop.xlane.xlu0 %2476 }
 0xd41   : > { %v2481_v44 = vsub.f32 %v2460_v14, %v2477_v42  ;;  %6794 = vpow2.f32 %v2486_v43 }
 0xd43   : > { %v2488_v45 = vmul.f32 1.442695, %v2481_v44 }
 0xd45   : > { %6796 = vpow2.f32 %v2488_v45 }
 0xd46   : > { %v7637_v36 = vpop.eup %6790 }
 0xd47   : > { %v7639_v37 = vpop.eup %6792  ;;  %v2493_v38 = vsel %vm875_vm2, %v7637_v36, 0.0 }
 0xd48   : > { %v2490_v40 = vsel %vm875_vm2, %v7639_v37, 0.0  ;;  %2494 = vadd.xlane.f32.xlu0 %v2493_v38 }
 0xd49   : > { %2491 = vadd.xlane.f32.xlu1 %v2490_v40 }
 0xd4e   : > { %v7651_v46 = vpop.eup %6794 }
 0xd4f   : > { %v2496_v47 = vsel %vm875_vm2, %v7651_v46, 0.0 }
 0xd5a   : > { %2134 = vrot.lane.b32.xlu1 %v7565_v32, %s7074_s29  ;;  %v7655_v32 = vpop.eup %6796 }
 0xd5e   : > { %2136 = vrot.lane.b32.xlu1 %v7573_v33, %s7074_s29  ;;  %2132 = vrot.lane.b32.xlu0 %v7567_v24, %s7074_s29  ;;  %v2499_v33 = vsel %vm875_vm2, %v7655_v32, 0.0  ;;  %v2131_v24 = vpop.permute.xlu1 %2130 }
 0xd7d   : > { %2497 = vadd.xlane.f32.xlu0 %v2496_v47 }
 0xd82   : > { %2500 = vadd.xlane.f32.xlu1 %v2499_v33 }
 0xdd1   : > { %v2495_v52 = vpop.xlane.xlu0 %2494 }
 0xdd2   : > { %v2492_v48 = vpop.xlane.xlu1 %2491  ;;  %6798 = vrcp.f32 %v2495_v52 }
 0xdd3   : > { %6800 = vrcp.f32 %v2492_v48 }
 0xdd5   : > { %v2133_v55 = vpop.permute.xlu0 %2132 }
 0xdd6   : > { %v2135_v53 = vpop.permute.xlu1 %2134 }
 0xdd7   : > { %v2142_v22 = vcombine.low %v2131_v24, %v2135_v53  ;;  %v2143_v54 = vcombine.high %v2131_v24, %v2135_v53 }
 0xdd9   : > { %v2150_v60 = vrot.slane %v2142_v22, %v7345_v39  ;;  %v2157_v50 = vrot.slane %v2143_v54, %v7345_v39 }
 0xdda   : > { %v2137_v56 = vpop.permute.xlu1 %2136 }
 0xddb   : > { %v2158_v57 = vcombine.low %v2133_v55, %v2137_v56  ;;  %v2159_v58 = vcombine.high %v2133_v55, %v2137_v56 }
 0xddd   : > { %v2166_v51 = vrot.slane %v2158_v57, %v7345_v39  ;;  %v2173_v28 = vrot.slane %v2159_v58, %v7345_v39 }
 0xddf   : > { %v2174_v26 = vcombine.low %v2150_v60, %v2166_v51  ;;  %v2175_v61 = vcombine.high %v2150_v60, %v2166_v51  ;;  %v2190_v62 = vcombine.low %v2157_v50, %v2173_v28  ;;  %v2191_v63 = vcombine.high %v2157_v50, %v2173_v28  ;;  %v6799_v0 = vpop.eup %6798 }
 0xde0   : > { %v6801_v21 = vpop.eup %6800  ;;  %v2505_v41 = vmul.f32 %v6799_v0, %v7637_v36 }
 0xde1   : > { %v2182_v1 = vrot.slane %v2174_v26, %v7356_v49  ;;  %v2189_v2 = vrot.slane %v2175_v61, %v7356_v49  ;;  %v2198_v3 = vrot.slane %v2190_v62, %v7356_v49  ;;  %v2205_v4 = vrot.slane %v2191_v63, %v7356_v49 }
 0xde2   : > { %v2503_v20 = vmul.f32 %v6801_v21, %v7639_v37  ;;  %v2511_v33 = vpack.c.bf16 %v2505_v41, %v2505_v41 }
 0xde3   : > { %v2210_v5 = vcombine.low %v2182_v1, %v2189_v2  ;;  %v6042_v6 = vcombine.high %v2182_v1, %v2189_v2  ;;  %v2226_v7 = vcombine.low %v2198_v3, %v2205_v4  ;;  %v6043_v59 = vcombine.high %v2198_v3, %v2205_v4 }
 0xde4   : > { %v2510_v47 = vpack.c.bf16 %v2503_v20, %v2503_v20 }
 0xde5   : > { %v2217_v9 = vrot.slane %v2210_v5, %v7345_v39  ;;  %v2225_v11 = vrot.slane %v6042_v6, %v7345_v39  ;;  %v2233_v12 = vrot.slane %v2226_v7, %v7345_v39  ;;  %v2241_v14 = vrot.slane %v6043_v59, %v7345_v39 }
 0xde7   : > { %v2242_v15 = vcombine.low %v2217_v9, %v2225_v11  ;;  %v2258_v16 = vcombine.low %v2233_v12, %v2241_v14  ;;  %v2243_v17 = vcombine.high %v2217_v9, %v2225_v11  ;;  %v2259_v19 = vcombine.high %v2233_v12, %v2241_v14 }
 0xde9   : > { %v2250_v10 = vrot.slane %v2242_v15, %v7356_v49  ;;  %v2266_v23 = vrot.slane %v2258_v16, %v7356_v49  ;;  %v2257_v29 = vrot.slane %v2243_v17, %v7356_v49  ;;  %v2273_v25 = vrot.slane %v2259_v19, %v7356_v49  ;;  %v6740_v19 = vld [vmem:[#allocation8 + $0x18] sm:$0xff]  }
 0xdeb   : > { %v2274_v30 = vcombine.low %v2250_v10, %v2266_v23  ;;  %v2275_v31 = vcombine.high %v2250_v10, %v2266_v23  ;;  %v2276_v34 = vcombine.low %v2257_v29, %v2273_v25  ;;  %v2277_v35 = vcombine.high %v2257_v29, %v2273_v25 }
 0xded   : > { %v2278_v38 = vpack.c.bf16 %v2274_v30, %v2274_v30  ;;  %v2279_v40 = vpack.c.bf16 %v2275_v31, %v2275_v31  ;;  %v2280_v44 = vpack.c.bf16 %v2276_v34, %v2276_v34  ;;  %v2281_v45 = vpack.c.bf16 %v2277_v35, %v2277_v35  ;;  %v6741_v35 = vld [vmem:[#allocation8 + $0x10] sm:$0xff]  }
 0xdef   : > { %v2518_v42 = vsel %vm1111_vm4, %v2278_v38, 0  ;;  %v2564_v43 = vsel %vm1111_vm4, %v2279_v40, 0  ;;  %v2610_v36 = vsel %vm1111_vm4, %v2280_v44, 0  ;;  %v2656_v37 = vsel %vm1111_vm4, %v2281_v45, 0 }
 0xdf0   : > { %6402 = vmatpush3.bf16.msra.mxu1 %v2518_v42  ;;  %6408 = vmatpush3.bf16.msra.mxu0 %v2564_v43 }
 0xdf1   : > { %6413 = vmatprep.subr.bf16.mxu1 %v7069_v8  ;;  %6419 = vmatprep.subr.bf16.mxu0 %v7069_v8 }
 0xdf3   : > { %6404 = vmatmul.mubr.msk.bf16.vlgmr.msra.gmra.mxu1 %vm875_vm2, %v2510_v47  ;;  %6410 = vmatmul.mubr.msk.bf16.vlgmr.msra.gmra.mxu0 %vm875_vm2, %v2511_v33 }
 0xdf4   : > { %6414 = vmatpush3.bf16.msra.mxu1 %v2610_v36  ;;  %6420 = vmatpush3.bf16.msra.mxu0 %v2656_v37 }
 0xdf5   : > { %6415 = vmatprep.mubr.msk.bf16.mxu1 %vm7070_vm1, %v7069_v8  ;;  %6421 = vmatprep.mubr.msk.bf16.mxu0 %vm7070_vm1, %v7069_v8 }
 0xdf6   : > { %6425 = vmatprep.subr.bf16.mxu1 %v7069_v8  ;;  %6433 = vmatprep.subr.bf16.mxu0 %v7069_v8 }
 0xe06   : > { %v2498_v24 = vpop.xlane.xlu0 %2497 }
 0xe07   : > { %6802 = vrcp.f32 %v2498_v24 }
 0xe0b   : > { %v2501_v48 = vpop.xlane.xlu1 %2500 }
 0xe0c   : > { %6804 = vrcp.f32 %v2501_v48 }
 0xe14   : > { %v6803_v52 = vpop.eup %6802 }
 0xe15   : > { %v2507_v53 = vmul.f32 %v6803_v52, %v7651_v46 }
 0xe17   : > { %v2512_v22 = vpack.c.bf16 %v2507_v53, %v2507_v53 }
 0xe19   : > { %v6805_v54 = vpop.eup %6804  ;;  %6416 = vmatmul.mubr.msk.bf16.vlgmr.msra.gmra.mxu1 %vm875_vm2, %v2512_v22  ;;  %v3090_v22 = vsel %vm331_vm0, %v7547_v27, 0.0 }
 0xe1a   : > { %v2509_v55 = vmul.f32 %v6805_v54, %v7655_v32  ;;  %6429 = vmatprep.mubr.msk.bf16.mxu1 %vm7070_vm1, %v7069_v8  ;;  %6426 = vmatpush3.bf16.msra.mxu1 %v6740_v19 }
 0xe1b   : > { %6427 = vmatprep.subr.bf16.mxu1 %v7069_v8 }
 0xe1c   : > { %v2513_v56 = vpack.c.bf16 %v2509_v55, %v2509_v55 }
 0xe1e   : > { %6422 = vmatmul.mubr.msk.bf16.vlgmr.msra.gmra.mxu0 %vm875_vm2, %v2513_v56  ;;  %6428 = vmatpush3.bf16.msra.mxu1 %v6741_v35 }
 0xe1f   : > { %6437 = vmatprep.mubr.msk.bf16.mxu0 %vm7070_vm1, %v7069_v8  ;;  %6441 = vmatprep.subr.bf16.mxu1 %v7069_v8 }
 0xeb3   : > { %v2554_v57 = vpop.f32.mrf.mxu1  ;;  %v2600_v58 = vpop.f32.mrf.mxu0 }
 0xeb5   : > { %v6405_v60 = vpop.f32.mrf.mxu1  ;;  %v6411_v50 = vpop.f32.mrf.mxu0 }
 0xeb7   : > { %v2557_v46 = vpop.f32.mrf.mxu1  ;;  %v2603_v51 = vpop.f32.mrf.mxu0 }
 0xeb9   : > { %v6406_v28 = vpop.f32.mrf.mxu1  ;;  %v6412_v26 = vpop.f32.mrf.mxu0 }
 0xeba   : > { %v6054_v28 = vld [vmem:[#allocation10 + $0xb] ss:$0 sm:$0xff] }
 0xed9   : > { %v2646_v61 = vpop.f32.mrf.mxu1 }
 0xeda   : > { %v2698_v32 = vcombine.low %v2554_v57, %v2646_v61  ;;  %v2699_v63 = vcombine.high %v2554_v57, %v2646_v61 }
 0xedb   : > { %v6417_v62 = vpop.f32.mrf.mxu1 }
 0xedc   : > { %v2706_v7 = vrot.slane %v2698_v32, %v7345_v39  ;;  %v2713_v59 = vrot.slane %v2699_v63, %v7345_v39 }
 0xedd   : > { %v2649_v1 = vpop.f32.mrf.mxu1 }
 0xede   : > { %v2692_v2 = vpop.f32.mrf.mxu0 }
 0xedf   : > { %v2714_v3 = vcombine.low %v2600_v58, %v2692_v2  ;;  %v2715_v4 = vcombine.high %v2600_v58, %v2692_v2  ;;  %v6418_v5 = vpop.f32.mrf.mxu1 }
 0xee0   : > { %v6423_v6 = vpop.f32.mrf.mxu0 }
 0xee1   : > { %v2722_v9 = vrot.slane %v2714_v3, %v7345_v39  ;;  %v2729_v11 = vrot.slane %v2715_v4, %v7345_v39 }
 0xee2   : > { %v2695_v12 = vpop.f32.mrf.mxu0 }
 0xee3   : > { %v2730_v14 = vcombine.low %v2706_v7, %v2722_v9  ;;  %v2731_v15 = vcombine.high %v2706_v7, %v2722_v9  ;;  %v2746_v16 = vcombine.low %v2713_v59, %v2729_v11  ;;  %v2747_v17 = vcombine.high %v2713_v59, %v2729_v11  ;;  %v6743_v12 = vld [vmem:[#allocation8 + $0x20] sm:$0xff]  }
 0xee4   : > { %v6424_v0 = vpop.f32.mrf.mxu0 }
 0xee5   : > { %v2738_v21 = vrot.slane %v2730_v14, %v7356_v49  ;;  %v2745_v10 = vrot.slane %v2731_v15, %v7356_v49  ;;  %v2754_v23 = vrot.slane %v2746_v16, %v7356_v49  ;;  %v2761_v29 = vrot.slane %v2747_v17, %v7356_v49  ;;  %v6746_v14 = vld [vmem:[#allocation8 + $0x48] sm:$0xff]   ;;  %v6747_v15 = vld [vmem:[#allocation8 + $0x40] sm:$0xff]  }
 0xee7   : > { %v2766_v25 = vcombine.low %v2738_v21, %v2745_v10  ;;  %v6052_v30 = vcombine.high %v2738_v21, %v2745_v10  ;;  %v2782_v31 = vcombine.low %v2754_v23, %v2761_v29  ;;  %v6053_v34 = vcombine.high %v2754_v23, %v2761_v29 }
 0xee9   : > { %v2773_v38 = vrot.slane %v2766_v25, %v7345_v39  ;;  %v2781_v40 = vrot.slane %v6052_v30, %v7345_v39  ;;  %v2789_v20 = vrot.slane %v2782_v31, %v7345_v39  ;;  %v2797_v41 = vrot.slane %v6053_v34, %v7345_v39  ;;  %v6058_v25 = vld [vmem:[#allocation10 + $0xc] ss:$0 sm:$0xff]  ;;  %v6059_v31 = vld [vmem:[#allocation10 + $0xd] ss:$0 sm:$0xff] }
 0xeeb   : > { %v2799_v42 = vcombine.high %v2773_v38, %v2781_v40  ;;  %v2815_v43 = vcombine.high %v2789_v20, %v2797_v41  ;;  %v2798_v44 = vcombine.low %v2773_v38, %v2781_v40  ;;  %v2814_v45 = vcombine.low %v2789_v20, %v2797_v41  ;;  %v6070_v38 = vld [vmem:[#allocation10] ss:$0 sm:$0xff]  ;;  %v6744_v20 = vld [vmem:[#allocation7 + $0x8] sm:$0xff]  }
 0xeed   : > { %v2813_v47 = vrot.slane %v2799_v42, %v7356_v49  ;;  %v2829_v33 = vrot.slane %v2815_v43, %v7356_v49  ;;  %v2806_v36 = vrot.slane %v2798_v44, %v7356_v49  ;;  %v2822_v37 = vrot.slane %v2814_v45, %v7356_v49  ;;  %v6071_v43 = vld [vmem:[#allocation10 + $0x1] ss:$0 sm:$0xff] }
 0xeee   : > { %v6745_v44 = vld [vmem:[#allocation7] sm:$0xff]  }
 0xeef   : > { %v2832_v24 = vcombine.low %v2813_v47, %v2829_v33  ;;  %v2831_v48 = vcombine.high %v2806_v36, %v2822_v37  ;;  %v2830_v52 = vcombine.low %v2806_v36, %v2822_v37  ;;  %v2833_v53 = vcombine.high %v2813_v47, %v2829_v33  ;;  %v6748_v33 = vld [vmem:[#allocation8 + $0x38] sm:$0xff]   ;;  %v6749_v36 = vld [vmem:[#allocation8 + $0x30] sm:$0xff]  }
 0xef0   : > { %v6060_v37 = vld [vmem:[#allocation10 + $0xe] ss:$0 sm:$0xff] }
 0xef1   : > { %2839 = vrot.lane.b32.xlu1 %v2832_v24, %s7079_s27  ;;  %2835 = vrot.lane.b32.xlu0 %v2831_v48, %s7080_s28 }
 0xef5   : > { %2843 = vrot.lane.b32.xlu0 %v2833_v53, %s7081_s8 }
 0xf14   : > { %3091 = vadd.xlane.f32.xlu0 %v3090_v22 }
 0xf63   : > { %v2836_v54 = vpop.permute.xlu0 %2835  ;;  %v2840_v55 = vpop.permute.xlu1 %2839 }
 0xf64   : > { %v2846_v56 = vsel %vm875_vm2, %v2830_v52, %v2836_v54 }
 0xf65   : > { %v2847_v58 = vsel %vm1442_vm5, %v2846_v56, %v2840_v55  ;;  %v6072_v56 = vld [vmem:[#allocation10 + $0x2] ss:$0 sm:$0xff] }
 0xf67   : > { %v2844_v57 = vpop.permute.xlu0 %2843 }
 0xf68   : > { %v2848_v60 = vsel %vm1444_vm6, %v2847_v58, %v2844_v57 }
 0xf69   : > { %v2849_v50 = vpack.c.bf16 %v2848_v60, %v2848_v60 }
 0xf6b   : > { %6430 = vmatmul.mubr.msk.bf16.vlgmr.msra.gmra.mxu1 %vm331_vm0, %v2849_v50 }
 0xf6c   : > { %6449 = vmatprep.mubr.msk.bf16.mxu1 %vm7070_vm1, %v7069_v8  ;;  %6442 = vmatpush3.bf16.msra.mxu1 %v6746_v14 }
 0xf6d   : > { %6443 = vmatprep.subr.bf16.mxu1 %v7069_v8 }
 0xf70   : > { %6444 = vmatpush3.bf16.msra.mxu1 %v6747_v15 }
 0xf71   : > { %6445 = vmatprep.subr.bf16.mxu1 %v7069_v8 }
 0xf74   : > { %6446 = vmatpush3.bf16.msra.mxu1 %v6748_v33 }
 0xf75   : > { %6447 = vmatprep.subr.bf16.mxu1 %v7069_v8 }
 0xf78   : > { %6448 = vmatpush3.bf16.msra.mxu1 %v6749_v36 }
 0xf79   : > { %6467 = vmatprep.subr.bf16.mxu1 %v7069_v8 }
 0xf9d   : > { %v3092_v46 = vpop.xlane.xlu0 %3091 }
 0xf9e   : > { %v3093_v51 = vmul.f32 0.03125, %v3092_v46 }
 0xfa0   : > { %v3094_v61 = vsub.f32 %v7547_v27, %v3093_v51 }
 0xfa2   : > { %v3095_v3 = vmul.f32 %v3094_v61, %v3094_v61 }
 0xfa4   : > { %v3096_v5 = vsel %vm331_vm0, %v3095_v3, 0.0 }
0x102b   : > { %v2908_v26 = vpop.f32.mrf.mxu1 }
0x102c   : > { %v2909_v62 = vadd.f32 %v6054_v28, %v2908_v26 }
0x102d   : > { %v6431_v32 = vpop.f32.mrf.mxu1 }
0x102e   : > { %v7730_v63 = vadd.f32 %v2909_v62, %v7517_v18  ;;  %v6742_v18 = vld [vmem:[#allocation8 + $0x28] sm:$0xff]  }
0x102f   : > { %v2911_v1 = vpop.f32.mrf.mxu1  ;;  %6434 = vmatpush3.bf16.msra.mxu0 %v6742_v18 }
0x1030   : > { %v2917_v2 = vsel %vm331_vm0, %v7730_v63, 0.0  ;;  %6435 = vmatprep.subr.bf16.mxu0 %v7069_v8 }
0x1031   : > { %2918 = vadd.xlane.f32.xlu1 %v2917_v2  ;;  %v6432_v4 = vpop.f32.mrf.mxu1 }
0x1033   : > { %6436 = vmatpush3.bf16.msra.mxu0 %v6743_v12 }
0x1034   : > { %6453 = vmatprep.subr.bf16.mxu0 %v7069_v8 }
0x1035   : > { %3097 = vadd.xlane.f32.xlu1 %v3096_v5 }
0x10ba   : > { %v2919_v6 = vpop.xlane.xlu1 %2918 }
0x10bb   : > { %v2920_v7 = vmul.f32 0.03125, %v2919_v6 }
0x10bd   : > { %v2921_v59 = vsub.f32 %v7730_v63, %v2920_v7 }
0x10be   : > { %v3098_v16 = vpop.xlane.xlu1 %3097 }
0x10bf   : > { %v2922_v9 = vmul.f32 %v2921_v59, %v2921_v59  ;;  %v3099_v17 = vmul.f32 0.03125, %v3098_v16 }
0x10c1   : > { %v2923_v11 = vsel %vm331_vm0, %v2922_v9, 0.0  ;;  %v3100_v19 = vadd.f32 1e-05, %v3099_v17 }
0x10c2   : > { %2924 = vadd.xlane.f32.xlu0 %v2923_v11 }
0x10c3   : > { %6806 = vrsqrt.f32 %v3100_v19 }
0x10d0   : > { %v6807_v23 = vpop.eup %6806 }
0x10d1   : > { %v3102_v34 = vmul.f32 %v6807_v23, %v3094_v61 }
0x10d3   : > { %v3107_v42 = vmul.f32 %v6070_v38, %v3102_v34 }
0x10d5   : > { %v3112_v45 = vadd.f32 %v6071_v43, %v3107_v42 }
0x10d7   : > { %v3113_v47 = vpack.c.bf16 %v3112_v45, %v3112_v45 }
0x114b   : > { %v2925_v0 = vpop.xlane.xlu0 %2924 }
0x114c   : > { %v2926_v21 = vmul.f32 0.03125, %v2925_v0 }
0x114e   : > { %v2927_v10 = vadd.f32 1e-05, %v2926_v21 }
0x1150   : > { %6808 = vrsqrt.f32 %v2927_v10 }
0x115d   : > { %v6809_v29 = vpop.eup %6808 }
0x115e   : > { %v2929_v30 = vmul.f32 %v6809_v29, %v2921_v59 }
0x1160   : > { %v2934_v35 = vmul.f32 %v6058_v25, %v2929_v30 }
0x1162   : > { %v2939_v40 = vadd.f32 %v6059_v31, %v2934_v35 }
0x1164   : > { %v2940_v41 = vpack.c.bf16 %v2939_v40, %v2939_v40 }
0x1166   : > { %6438 = vmatmul.mubr.msk.bf16.vlgmr.msra.gmra.mxu0 %vm331_vm0, %v2940_v41 }
0x1167   : > { %6454 = vmatpush3.bf16.msra.mxu0 %v6744_v20  ;;  %6457 = vmatprep.mubr.msk.bf16.mxu0 %vm7070_vm1, %v7069_v8 }
0x1168   : > { %6455 = vmatprep.subr.bf16.mxu0 %v7069_v8 }
0x116b   : > { %6456 = vmatpush3.bf16.msra.mxu0 %v6745_v44 }
0x116c   : > { %6461 = vmatprep.subr.bf16.mxu0 %v7069_v8 }
0x116e   : > { %6458 = vmatmul.mubr.msk.bf16.vlgmr.msra.gmra.mxu0 %vm331_vm0, %v3113_v47 }
0x116f   : > { %6463 = vmatprep.mubr.msk.bf16.mxu0 %vm7070_vm1, %v7069_v8 }
0x1226   : > { %v2999_v24 = vpop.f32.mrf.mxu0 }
0x1227   : > { %v3000_v48 = vadd.f32 %v6060_v37, %v2999_v24 }
0x1228   : > { %v6439_v52 = vpop.f32.mrf.mxu0 }
0x1229   : > { %v3005_v53 = vmax.f32 %v3000_v48, 0.0 }
0x122a   : > { %v3002_v22 = vpop.f32.mrf.mxu0 }
0x122b   : > { %v3006_v54 = vpack.c.bf16 %v3005_v53, %v3005_v53 }
0x122c   : > { %v6440_v55 = vpop.f32.mrf.mxu0 }
0x122d   : > { %6450 = vmatmul.mubr.msk.bf16.vlgmr.msra.gmra.mxu1 %vm1641_vm7, %v3006_v54 }
0x122e   : > { %v3172_v57 = vpop.f32.mrf.mxu0  ;;  %6469 = vmatprep.mubr.msk.bf16.mxu1 %vm7070_vm1, %v7069_v8 }
0x122f   : > { %v7754_v58 = vadd.f32 %v6072_v56, %v3172_v57 }
0x1230   : > { %v6459_v60 = vpop.f32.mrf.mxu0 }
0x1231   : > { %3182 = vrot.lane.b32.xlu1 %v7754_v58, %s7073_s13  ;;  %3179 = vrot.lane.b32.xlu0 %v7754_v58, %s7072_s9 }
0x1232   : > { %v3175_v50 = vpop.f32.mrf.mxu0 }
0x1234   : > { %v6460_v46 = vpop.f32.mrf.mxu0 }
0x1235   : > { %3185 = vrot.lane.b32.xlu1 %v7754_v58, %s7071_s24  ;;  %3328 = vrot.lane.b32.xlu0 %v7754_v58, %s7074_s29 }
0x12a3   : > { %v7764_v51 = vpop.permute.xlu1 %3182  ;;  %v7766_v28 = vpop.permute.xlu0 %3179 }
0x12a4   : > { %3332 = vrot.lane.b32.xlu0 %v7764_v51, %s7074_s29  ;;  %3330 = vrot.lane.b32.xlu1 %v7766_v28, %s7074_s29  ;;  %v3188_v4 = vcombine.low %v7754_v58, %v7764_v51  ;;  %v3189_v5 = vcombine.high %v7754_v58, %v7764_v51 }
0x12a6   : > { %v3196_v9 = vrot.slane %v3188_v4, %v7345_v39  ;;  %v3203_v11 = vrot.slane %v3189_v5, %v7345_v39 }
0x12a7   : > { %v7772_v26 = vpop.permute.xlu1 %3185  ;;  %v3329_v6 = vpop.permute.xlu0 %3328 }
0x12a8   : > { %3334 = vrot.lane.b32.xlu1 %v7772_v26, %s7074_s29  ;;  %v3204_v2 = vcombine.low %v7766_v28, %v7772_v26  ;;  %v3205_v3 = vcombine.high %v7766_v28, %v7772_v26 }
0x12aa   : > { %v3212_v7 = vrot.slane %v3204_v2, %v7345_v39  ;;  %v3219_v59 = vrot.slane %v3205_v3, %v7345_v39 }
0x12ac   : > { %v3220_v14 = vcombine.low %v3196_v9, %v3212_v7  ;;  %v3221_v15 = vcombine.high %v3196_v9, %v3212_v7  ;;  %v3236_v16 = vcombine.low %v3203_v11, %v3219_v59  ;;  %v3237_v17 = vcombine.high %v3203_v11, %v3219_v59 }
0x12ae   : > { %v3228_v29 = vrot.slane %v3220_v14, %v7356_v49  ;;  %v3235_v25 = vrot.slane %v3221_v15, %v7356_v49  ;;  %v3244_v30 = vrot.slane %v3236_v16, %v7356_v49  ;;  %v3251_v31 = vrot.slane %v3237_v17, %v7356_v49 }
0x12b0   : > { %v3256_v44 = vcombine.low %v3228_v29, %v3235_v25  ;;  %v6076_v45 = vcombine.high %v3228_v29, %v3235_v25  ;;  %v3272_v47 = vcombine.low %v3244_v30, %v3251_v31  ;;  %v6077_v33 = vcombine.high %v3244_v30, %v3251_v31 }
0x12b2   : > { %v3263_v55 = vrot.slane %v3256_v44, %v7345_v39  ;;  %v3271_v56 = vrot.slane %v6076_v45, %v7345_v39  ;;  %v3279_v57 = vrot.slane %v3272_v47, %v7345_v39  ;;  %v3287_v60 = vrot.slane %v6077_v33, %v7345_v39 }
0x12b4   : > { %v3288_v7 = vcombine.low %v3263_v55, %v3271_v56  ;;  %v3304_v59 = vcombine.low %v3279_v57, %v3287_v60  ;;  %v3305_v30 = vcombine.high %v3279_v57, %v3287_v60 }
0x12b6   : > { %v3296_v16 = vrot.slane %v3288_v7, %v7356_v49  ;;  %v3312_v17 = vrot.slane %v3304_v59, %v7356_v49 }
0x12b8   : > { %v3320_v29 = vcombine.low %v3296_v16, %v3312_v17  ;;  %v3321_v25 = vcombine.high %v3296_v16, %v3312_v17 }
0x12ed   : > { %v7776_v61 = vpop.f32.mrf.mxu1 }
0x12ef   : > { %v6451_v62 = vpop.f32.mrf.mxu1 }
0x12f1   : > { %v3084_v32 = vpop.f32.mrf.mxu1 }
0x12f3   : > { %v6452_v1 = vpop.f32.mrf.mxu1 }
0x1316   : > { %v3331_v18 = vpop.permute.xlu1 %3330  ;;  %v3333_v12 = vpop.permute.xlu0 %3332 }
0x1317   : > { %v3340_v19 = vcombine.low %v3329_v6, %v3333_v12  ;;  %v3341_v0 = vcombine.high %v3329_v6, %v3333_v12 }
0x1319   : > { %v3348_v34 = vrot.slane %v3340_v19, %v7345_v39  ;;  %v3355_v35 = vrot.slane %v3341_v0, %v7345_v39 }
0x131a   : > { %v3335_v21 = vpop.permute.xlu1 %3334 }
0x131b   : > { %v3356_v10 = vcombine.low %v3331_v18, %v3335_v21  ;;  %v3357_v23 = vcombine.high %v3331_v18, %v3335_v21 }
0x131d   : > { %v3364_v38 = vrot.slane %v3356_v10, %v7345_v39  ;;  %v3371_v40 = vrot.slane %v3357_v23, %v7345_v39  ;;  %v3289_v23 = vcombine.high %v3263_v55, %v3271_v56 }
0x131f   : > { %v3372_v20 = vcombine.low %v3348_v34, %v3364_v38  ;;  %v3373_v41 = vcombine.high %v3348_v34, %v3364_v38  ;;  %v3388_v42 = vcombine.low %v3355_v35, %v3371_v40  ;;  %v3389_v43 = vcombine.high %v3355_v35, %v3371_v40 }
0x1320   : > { %v3324_v35 = vpack.c.bf16 %v3320_v29, %v3320_v29  ;;  %v3325_v38 = vpack.c.bf16 %v3321_v25, %v3321_v25  ;;  %v3303_v40 = vrot.slane %v3289_v23, %v7356_v49 }
0x1321   : > { %v3380_v36 = vrot.slane %v3372_v20, %v7356_v49  ;;  %v3387_v37 = vrot.slane %v3373_v41, %v7356_v49  ;;  %v3396_v24 = vrot.slane %v3388_v42, %v7356_v49  ;;  %v3403_v48 = vrot.slane %v3389_v43, %v7356_v49 }
0x1322   : > { %v3319_v20 = vrot.slane %v3305_v30, %v7356_v49 }
0x1323   : > { %v3408_v52 = vcombine.low %v3380_v36, %v3387_v37  ;;  %v6078_v53 = vcombine.high %v3380_v36, %v3387_v37  ;;  %v3424_v22 = vcombine.low %v3396_v24, %v3403_v48  ;;  %v6079_v54 = vcombine.high %v3396_v24, %v3403_v48 }
0x1324   : > { %v3322_v43 = vcombine.low %v3303_v40, %v3319_v20  ;;  %v3323_v44 = vcombine.high %v3303_v40, %v3319_v20 }
0x1325   : > { %v3415_v50 = vrot.slane %v3408_v52, %v7345_v39  ;;  %v3423_v46 = vrot.slane %v6078_v53, %v7345_v39  ;;  %v3431_v62 = vrot.slane %v3424_v22, %v7345_v39  ;;  %v3439_v32 = vrot.slane %v6079_v54, %v7345_v39 }
0x1326   : > { %v3326_v45 = vpack.c.bf16 %v3322_v43, %v3322_v43  ;;  %v3327_v47 = vpack.c.bf16 %v3323_v44, %v3323_v44 }
0x1327   : > { %v3440_v1 = vcombine.low %v3415_v50, %v3423_v46  ;;  %v3456_v2 = vcombine.low %v3431_v62, %v3439_v32  ;;  %v3441_v3 = vcombine.high %v3415_v50, %v3423_v46  ;;  %v3457_v4 = vcombine.high %v3431_v62, %v3439_v32 }
0x1329   : > { %v3448_v5 = vrot.slane %v3440_v1, %v7356_v49  ;;  %v3464_v6 = vrot.slane %v3456_v2, %v7356_v49  ;;  %v3455_v18 = vrot.slane %v3441_v3, %v7356_v49  ;;  %v3471_v12 = vrot.slane %v3457_v4, %v7356_v49 }
0x132b   : > { %v3472_v9 = vcombine.low %v3448_v5, %v3464_v6  ;;  %v3473_v11 = vcombine.high %v3448_v5, %v3464_v6  ;;  %v3474_v21 = vcombine.low %v3455_v18, %v3471_v12  ;;  %v3475_v10 = vcombine.high %v3455_v18, %v3471_v12 }
0x132d   : > { %v3476_v14 = vpack.c.bf16 %v3472_v9, %v3472_v9  ;;  %v3477_v15 = vpack.c.bf16 %v3473_v11, %v3473_v11  ;;  %v3478_v31 = vpack.c.bf16 %v3474_v21, %v3474_v21  ;;  %v3479_v34 = vpack.c.bf16 %v3475_v10, %v3475_v10 }
0x132f   : > { %v3636_v19 = vsel %vm875_vm2, %v3476_v14, 0  ;;  %v3682_v0 = vsel %vm875_vm2, %v3477_v15, 0  ;;  %v3728_v41 = vsel %vm875_vm2, %v3478_v31, 0  ;;  %v3774_v42 = vsel %vm875_vm2, %v3479_v34, 0 }
0x1330   : > { %6462 = vmatpush3.bf16.xpose.msra.mxu0 %v3636_v19  ;;  %6468 = vmatpush3.bf16.xpose.msra.mxu1 %v3682_v0 }
0x1331   : > { %6473 = vmatprep.subr.bf16.mxu0 %v7069_v8  ;;  %6479 = vmatprep.subr.bf16.mxu1 %v7069_v8 }
0x1337   : > { %6464 = vmatmul.mubr.msk.bf16.vlgmr.msra.gmra.mxu0 %vm875_vm2, %v3324_v35  ;;  %6470 = vmatmul.mubr.msk.bf16.vlgmr.msra.gmra.mxu1 %vm875_vm2, %v3325_v38 }
0x1338   : > { %6474 = vmatpush3.bf16.xpose.msra.mxu0 %v3728_v41  ;;  %6480 = vmatpush3.bf16.xpose.msra.mxu1 %v3774_v42 }
0x1339   : > { %6475 = vmatprep.mubr.msk.bf16.mxu0 %vm7070_vm1, %v7069_v8  ;;  %6481 = vmatprep.mubr.msk.bf16.mxu1 %vm7070_vm1, %v7069_v8 }
0x133a   : > { %6485 = vmatprep.subr.bf16.mxu0 %v7069_v8  ;;  %6491 = vmatprep.subr.bf16.mxu1 %v7069_v8 }
0x133f   : > { %6476 = vmatmul.mubr.msk.bf16.vlgmr.msra.gmra.mxu0 %vm875_vm2, %v3326_v45  ;;  %6482 = vmatmul.mubr.msk.bf16.vlgmr.msra.gmra.mxu1 %vm875_vm2, %v3327_v47 }
0x1340   : > { %6487 = vmatprep.mubr.msk.bf16.mxu0 %vm7070_vm1, %v7069_v8  ;;  %6493 = vmatprep.mubr.msk.bf16.mxu1 %vm7070_vm1, %v7069_v8 }
0x13f7   : > { %v3672_v33 = vpop.f32.mrf.mxu0  ;;  %v3718_v36 = vpop.f32.mrf.mxu1 }
0x13f8   : > { %v3673_v37 = vadd.f32 %v3672_v33, %v7408_v13  ;;  %v3719_v24 = vadd.f32 %v3718_v36, %v7408_v13 }
0x13f9   : > { %v6465_v48 = vpop.f32.mrf.mxu0  ;;  %v6471_v52 = vpop.f32.mrf.mxu1 }
0x13fa   : > { %v3816_v53 = vsel %vm875_vm2, %v3673_v37, -inf  ;;  %v3819_v22 = vsel %vm875_vm2, %v3719_v24, -inf }
0x13fb   : > { %3817 = vmax.xlane.f32.xlu0 %v3816_v53  ;;  %v3675_v54 = vpop.f32.mrf.mxu0  ;;  %3820 = vmax.xlane.f32.xlu1 %v3819_v22  ;;  %v3721_v55 = vpop.f32.mrf.mxu1 }
0x13fd   : > { %v6466_v56 = vpop.f32.mrf.mxu0  ;;  %v6472_v57 = vpop.f32.mrf.mxu1 }
0x13ff   : > { %v3764_v60 = vpop.f32.mrf.mxu0  ;;  %v3810_v50 = vpop.f32.mrf.mxu1 }
0x1400   : > { %v3765_v46 = vadd.f32 %v3764_v60, %v7408_v13  ;;  %v3811_v1 = vadd.f32 %v3810_v50, %v7408_v13 }
0x1401   : > { %v6477_v62 = vpop.f32.mrf.mxu0  ;;  %v6483_v32 = vpop.f32.mrf.mxu1 }
0x1402   : > { %v3822_v2 = vsel %vm875_vm2, %v3765_v46, -inf  ;;  %v3825_v7 = vsel %vm875_vm2, %v3811_v1, -inf }
0x1403   : > { %3823 = vmax.xlane.f32.xlu0 %v3822_v2  ;;  %v3767_v3 = vpop.f32.mrf.mxu0  ;;  %v3813_v4 = vpop.f32.mrf.mxu1 }
0x1405   : > { %v6478_v5 = vpop.f32.mrf.mxu0  ;;  %v6484_v6 = vpop.f32.mrf.mxu1 }
0x1407   : > { %3826 = vmax.xlane.f32.xlu0 %v3825_v7 }
0x140c   : > { %3480 = vrot.lane.b32.xlu1 %v7754_v58, %s7078_s12 }
0x1484   : > { %v3818_v59 = vpop.xlane.xlu0 %3817  ;;  %v3821_v9 = vpop.xlane.xlu1 %3820 }
0x1485   : > { %v3828_v11 = vsub.f32 %v3673_v37, %v3818_v59  ;;  %v3829_v18 = vsub.f32 %v3719_v24, %v3821_v9 }
0x1487   : > { %v3832_v12 = vmul.f32 1.442695, %v3828_v11  ;;  %v3834_v14 = vmul.f32 1.442695, %v3829_v18 }
0x1489   : > { %6810 = vpow2.f32 %v3832_v12 }
0x148a   : > { %6812 = vpow2.f32 %v3834_v14 }
0x148c   : > { %v3824_v58 = vpop.xlane.xlu0 %3823 }
0x148d   : > { %v3830_v19 = vsub.f32 %v3765_v46, %v3824_v58 }
0x148f   : > { %v3836_v10 = vmul.f32 1.442695, %v3830_v19 }
0x1490   : > { %v3827_v0 = vpop.xlane.xlu0 %3826 }
0x1491   : > { %v3831_v21 = vsub.f32 %v3811_v1, %v3827_v0  ;;  %6814 = vpow2.f32 %v3836_v10 }
0x1493   : > { %v3838_v23 = vmul.f32 1.442695, %v3831_v21 }
0x1495   : > { %6816 = vpow2.f32 %v3838_v23 }
0x1496   : > { %v7848_v13 = vpop.eup %6810 }
0x1497   : > { %v7850_v15 = vpop.eup %6812  ;;  %v3840_v16 = vsel %vm875_vm2, %v7848_v13, 0.0 }
0x1498   : > { %3841 = vadd.xlane.f32.xlu1 %v3840_v16  ;;  %v3843_v17 = vsel %vm875_vm2, %v7850_v15, 0.0 }
0x1499   : > { %3844 = vadd.xlane.f32.xlu0 %v3843_v17 }
0x149e   : > { %v7862_v29 = vpop.eup %6814 }
0x14a2   : > { %v7864_v25 = vpop.eup %6816 }
0x14a9   : > { %3484 = vrot.lane.b32.xlu1 %v7764_v51, %s7078_s12  ;;  %v3846_v51 = vsel %vm875_vm2, %v7862_v29, 0.0 }
0x14ad   : > { %3486 = vrot.lane.b32.xlu1 %v7772_v26, %s7078_s12  ;;  %v3849_v26 = vsel %vm875_vm2, %v7864_v25, 0.0 }
0x14af   : > { %3482 = vrot.lane.b32.xlu0 %v7766_v28, %s7078_s12  ;;  %v3481_v28 = vpop.permute.xlu1 %3480 }
0x14ce   : > { %3847 = vadd.xlane.f32.xlu0 %v3846_v51 }
0x14d1   : > { %3850 = vadd.xlane.f32.xlu1 %v3849_v26 }
0x1521   : > { %v3842_v30 = vpop.xlane.xlu1 %3841 }
0x1522   : > { %v3845_v31 = vpop.xlane.xlu0 %3844  ;;  %6818 = vrcp.f32 %v3842_v30 }
0x1523   : > { %6820 = vrcp.f32 %v3845_v31 }
0x1525   : > { %v3485_v34 = vpop.permute.xlu1 %3484 }
0x1526   : > { %v3492_v35 = vcombine.low %v3481_v28, %v3485_v34  ;;  %v3493_v38 = vcombine.high %v3481_v28, %v3485_v34  ;;  %v3483_v40 = vpop.permute.xlu0 %3482 }
0x1528   : > { %v3500_v43 = vrot.slane %v3492_v35, %v7345_v39  ;;  %v3507_v44 = vrot.slane %v3493_v38, %v7345_v39 }
0x1529   : > { %v3487_v20 = vpop.permute.xlu1 %3486 }
0x152a   : > { %v3508_v41 = vcombine.low %v3483_v40, %v3487_v20  ;;  %v3509_v42 = vcombine.high %v3483_v40, %v3487_v20 }
0x152c   : > { %v3516_v45 = vrot.slane %v3508_v41, %v7345_v39  ;;  %v3523_v47 = vrot.slane %v3509_v42, %v7345_v39 }
0x152e   : > { %v3524_v33 = vcombine.low %v3500_v43, %v3516_v45  ;;  %v3525_v36 = vcombine.high %v3500_v43, %v3516_v45  ;;  %v3540_v37 = vcombine.low %v3507_v44, %v3523_v47  ;;  %v3541_v24 = vcombine.high %v3507_v44, %v3523_v47 }
0x152f   : > { %v6819_v4 = vpop.eup %6818 }
0x1530   : > { %v3532_v48 = vrot.slane %v3524_v33, %v7356_v49  ;;  %v3539_v52 = vrot.slane %v3525_v36, %v7356_v49  ;;  %v3548_v53 = vrot.slane %v3540_v37, %v7356_v49  ;;  %v3555_v22 = vrot.slane %v3541_v24, %v7356_v49  ;;  %v6821_v5 = vpop.eup %6820 }
0x1531   : > { %v3853_v58 = vmul.f32 %v6819_v4, %v7848_v13  ;;  %v3855_v19 = vmul.f32 %v6821_v5, %v7850_v15 }
0x1532   : > { %v3560_v54 = vcombine.low %v3532_v48, %v3539_v52  ;;  %v6080_v55 = vcombine.high %v3532_v48, %v3539_v52  ;;  %v3576_v56 = vcombine.low %v3548_v53, %v3555_v22  ;;  %v6081_v57 = vcombine.high %v3548_v53, %v3555_v22 }
0x1533   : > { %v3860_v51 = vpack.c.bf16 %v3853_v58, %v3853_v58  ;;  %v3861_v26 = vpack.c.bf16 %v3855_v19, %v3855_v19 }
0x1534   : > { %v3567_v60 = vrot.slane %v3560_v54, %v7345_v39  ;;  %v3575_v50 = vrot.slane %v6080_v55, %v7345_v39  ;;  %v3583_v46 = vrot.slane %v3576_v56, %v7345_v39  ;;  %v3591_v62 = vrot.slane %v6081_v57, %v7345_v39 }
0x1536   : > { %v3592_v32 = vcombine.low %v3567_v60, %v3575_v50  ;;  %v3608_v1 = vcombine.low %v3583_v46, %v3591_v62  ;;  %v3593_v2 = vcombine.high %v3567_v60, %v3575_v50  ;;  %v3609_v3 = vcombine.high %v3583_v46, %v3591_v62 }
0x1538   : > { %v3600_v6 = vrot.slane %v3592_v32, %v7356_v49  ;;  %v3616_v7 = vrot.slane %v3608_v1, %v7356_v49  ;;  %v3607_v59 = vrot.slane %v3593_v2, %v7356_v49  ;;  %v3623_v9 = vrot.slane %v3609_v3, %v7356_v49  ;;  %v6750_v3 = vld [vmem:[#allocation7 + $0x18] sm:$0xff]  }
0x153a   : > { %v3624_v11 = vcombine.low %v3600_v6, %v3616_v7  ;;  %v3625_v18 = vcombine.high %v3600_v6, %v3616_v7  ;;  %v3626_v12 = vcombine.low %v3607_v59, %v3623_v9  ;;  %v3627_v14 = vcombine.high %v3607_v59, %v3623_v9 }
0x153c   : > { %v3628_v16 = vpack.c.bf16 %v3624_v11, %v3624_v11  ;;  %v3629_v17 = vpack.c.bf16 %v3625_v18, %v3625_v18  ;;  %v3630_v10 = vpack.c.bf16 %v3626_v12, %v3626_v12  ;;  %v3631_v23 = vpack.c.bf16 %v3627_v14, %v3627_v14  ;;  %v6751_v14 = vld [vmem:[#allocation7 + $0x10] sm:$0xff]  }
0x153e   : > { %v3868_v0 = vsel %vm1111_vm4, %v3628_v16, 0  ;;  %v3914_v21 = vsel %vm1111_vm4, %v3629_v17, 0  ;;  %v3960_v13 = vsel %vm1111_vm4, %v3630_v10, 0  ;;  %v4006_v15 = vsel %vm1111_vm4, %v3631_v23, 0 }
0x153f   : > { %6486 = vmatpush3.bf16.msra.mxu0 %v3868_v0  ;;  %6492 = vmatpush3.bf16.msra.mxu1 %v3914_v21 }
0x1540   : > { %6497 = vmatprep.subr.bf16.mxu0 %v7069_v8  ;;  %6503 = vmatprep.subr.bf16.mxu1 %v7069_v8 }
0x1542   : > { %6488 = vmatmul.mubr.msk.bf16.vlgmr.msra.gmra.mxu0 %vm875_vm2, %v3860_v51  ;;  %6494 = vmatmul.mubr.msk.bf16.vlgmr.msra.gmra.mxu1 %vm875_vm2, %v3861_v26 }
0x1543   : > { %6498 = vmatpush3.bf16.msra.mxu0 %v3960_v13  ;;  %6504 = vmatpush3.bf16.msra.mxu1 %v4006_v15 }
0x1544   : > { %6499 = vmatprep.mubr.msk.bf16.mxu0 %vm7070_vm1, %v7069_v8  ;;  %6505 = vmatprep.mubr.msk.bf16.mxu1 %vm7070_vm1, %v7069_v8 }
0x1545   : > { %6509 = vmatprep.subr.bf16.mxu0 %v7069_v8  ;;  %6517 = vmatprep.subr.bf16.mxu1 %v7069_v8 }
0x1557   : > { %v3848_v28 = vpop.xlane.xlu0 %3847 }
0x1558   : > { %6822 = vrcp.f32 %v3848_v28 }
0x155a   : > { %v3851_v30 = vpop.xlane.xlu1 %3850 }
0x155b   : > { %6824 = vrcp.f32 %v3851_v30 }
0x1565   : > { %v6823_v31 = vpop.eup %6822 }
0x1566   : > { %v3857_v34 = vmul.f32 %v6823_v31, %v7862_v29 }
0x1568   : > { %v6825_v35 = vpop.eup %6824  ;;  %v3862_v38 = vpack.c.bf16 %v3857_v34, %v3857_v34 }
0x1569   : > { %v3859_v40 = vmul.f32 %v6825_v35, %v7864_v25 }
0x156a   : > { %6500 = vmatmul.mubr.msk.bf16.vlgmr.msra.gmra.mxu0 %vm875_vm2, %v3862_v38 }
0x156b   : > { %v3863_v20 = vpack.c.bf16 %v3859_v40, %v3859_v40  ;;  %6513 = vmatprep.mubr.msk.bf16.mxu0 %vm7070_vm1, %v7069_v8  ;;  %6510 = vmatpush3.bf16.msra.mxu0 %v6750_v3 }
0x156c   : > { %6511 = vmatprep.subr.bf16.mxu0 %v7069_v8 }
0x156d   : > { %6506 = vmatmul.mubr.msk.bf16.vlgmr.msra.gmra.mxu1 %vm875_vm2, %v3863_v20 }
0x156e   : > { %6521 = vmatprep.mubr.msk.bf16.mxu1 %vm7070_vm1, %v7069_v8 }
0x156f   : > { %6512 = vmatpush3.bf16.msra.mxu0 %v6751_v14  ;;  %v6757_v14 = vld [vmem:[#allocation7 + $0x40] sm:$0xff]  }
0x1570   : > { %6525 = vmatprep.subr.bf16.mxu0 %v7069_v8 }
0x1602   : > { %v3904_v41 = vpop.f32.mrf.mxu0  ;;  %v3950_v42 = vpop.f32.mrf.mxu1 }
0x1604   : > { %v6489_v43 = vpop.f32.mrf.mxu0  ;;  %v6495_v44 = vpop.f32.mrf.mxu1 }
0x1605   : > { %v6092_v44 = vld [vmem:[#allocation10 + $0x3] ss:$0 sm:$0xff] }
0x1606   : > { %v3907_v29 = vpop.f32.mrf.mxu0  ;;  %v3953_v45 = vpop.f32.mrf.mxu1 }
0x1608   : > { %v6490_v47 = vpop.f32.mrf.mxu0  ;;  %v6496_v33 = vpop.f32.mrf.mxu1 }
0x162a   : > { %v3996_v25 = vpop.f32.mrf.mxu0 }
0x162b   : > { %v4048_v36 = vcombine.low %v3904_v41, %v3996_v25  ;;  %v4049_v37 = vcombine.high %v3904_v41, %v3996_v25 }
0x162c   : > { %v6501_v24 = vpop.f32.mrf.mxu0 }
0x162d   : > { %v4042_v48 = vpop.f32.mrf.mxu1  ;;  %v4056_v55 = vrot.slane %v4048_v36, %v7345_v39  ;;  %v4063_v56 = vrot.slane %v4049_v37, %v7345_v39  ;;  %v6064_v24 = vld [vmem:[#allocation10 + $0xf] ss:$0 sm:$0xff] }
0x162e   : > { %v3999_v52 = vpop.f32.mrf.mxu0  ;;  %v4064_v53 = vcombine.low %v3950_v42, %v4042_v48  ;;  %v4065_v22 = vcombine.high %v3950_v42, %v4042_v48 }
0x162f   : > { %v6507_v54 = vpop.f32.mrf.mxu1 }
0x1630   : > { %v4072_v57 = vrot.slane %v4064_v53, %v7345_v39  ;;  %v4079_v60 = vrot.slane %v4065_v22, %v7345_v39  ;;  %v6502_v50 = vpop.f32.mrf.mxu0  ;;  %v3082_v53 = vadd.f32 %v6064_v24, %v7776_v61 }
0x1631   : > { %v4045_v46 = vpop.f32.mrf.mxu1 }
0x1632   : > { %v4080_v62 = vcombine.low %v4056_v55, %v4072_v57  ;;  %v4081_v32 = vcombine.high %v4056_v55, %v4072_v57  ;;  %v4096_v1 = vcombine.low %v4063_v56, %v4079_v60  ;;  %v4097_v2 = vcombine.high %v4063_v56, %v4079_v60  ;;  %v6752_v57 = vld [vmem:[#allocation7 + $0x28] sm:$0xff]   ;;  %v6753_v60 = vld [vmem:[#allocation7 + $0x20] sm:$0xff]  }
0x1633   : > { %v6508_v4 = vpop.f32.mrf.mxu1  ;;  %v7945_v55 = vadd.f32 %v3082_v53, %v7730_v63  ;;  %6518 = vmatpush3.bf16.msra.mxu1 %v6752_v57 }
0x1634   : > { %v4088_v5 = vrot.slane %v4080_v62, %v7356_v49  ;;  %v4095_v6 = vrot.slane %v4081_v32, %v7356_v49  ;;  %v4104_v7 = vrot.slane %v4096_v1, %v7356_v49  ;;  %v4111_v59 = vrot.slane %v4097_v2, %v7356_v49  ;;  %6519 = vmatprep.subr.bf16.mxu1 %v7069_v8  ;;  %v6096_v4 = vld [vmem:[#allocation10 + $0x4] ss:$0 sm:$0xff] }
0x1635   : > { %v4440_v56 = vsel %vm331_vm0, %v7945_v55, 0.0 }
0x1636   : > { %v4116_v9 = vcombine.low %v4088_v5, %v4095_v6  ;;  %v6090_v11 = vcombine.high %v4088_v5, %v4095_v6  ;;  %v4132_v18 = vcombine.low %v4104_v7, %v4111_v59  ;;  %v6091_v12 = vcombine.high %v4104_v7, %v4111_v59  ;;  %v6097_v6 = vld [vmem:[#allocation10 + $0x5] ss:$0 sm:$0xff] }
0x1637   : > { %6520 = vmatpush3.bf16.msra.mxu1 %v6753_v60 }
0x1638   : > { %v4123_v16 = vrot.slane %v4116_v9, %v7345_v39  ;;  %v4131_v17 = vrot.slane %v6090_v11, %v7345_v39  ;;  %v4139_v58 = vrot.slane %v4132_v18, %v7345_v39  ;;  %v4147_v19 = vrot.slane %v6091_v12, %v7345_v39  ;;  %6537 = vmatprep.subr.bf16.mxu1 %v7069_v8  ;;  %v6754_v11 = vld [vmem:[#allocation8 + $0x8] sm:$0xff]   ;;  %v6755_v18 = vld [vmem:[#allocation8] sm:$0xff]   ;;  %v6756_v12 = vld [vmem:[#allocation7 + $0x48] sm:$0xff]  }
0x163a   : > { %v4149_v0 = vcombine.high %v4123_v16, %v4131_v17  ;;  %v4165_v21 = vcombine.high %v4139_v58, %v4147_v19  ;;  %v4148_v10 = vcombine.low %v4123_v16, %v4131_v17  ;;  %v4164_v23 = vcombine.low %v4139_v58, %v4147_v19  ;;  %v6758_v16 = vld [vmem:[#allocation7 + $0x38] sm:$0xff]   ;;  %v6759_v17 = vld [vmem:[#allocation7 + $0x30] sm:$0xff]   ;;  %v6110_v58 = vld [vmem:[#allocation10 + $0xa] ss:$0 sm:$0xff] }
0x163c   : > { %v4163_v51 = vrot.slane %v4149_v0, %v7356_v49  ;;  %v4179_v26 = vrot.slane %v4165_v21, %v7356_v49  ;;  %v4156_v13 = vrot.slane %v4148_v10, %v7356_v49  ;;  %v4172_v15 = vrot.slane %v4164_v23, %v7356_v49  ;;  %v6108_v23 = vld [vmem:[#allocation10 + $0x8] ss:$0 sm:$0xff] }
0x163e   : > { %v4182_v28 = vcombine.low %v4163_v51, %v4179_v26  ;;  %v4181_v30 = vcombine.high %v4156_v13, %v4172_v15  ;;  %v4180_v31 = vcombine.low %v4156_v13, %v4172_v15  ;;  %v4183_v34 = vcombine.high %v4163_v51, %v4179_v26  ;;  %v6109_v26 = vld [vmem:[#allocation10 + $0x9] ss:$0 sm:$0xff] }
0x1640   : > { %4189 = vrot.lane.b32.xlu1 %v4182_v28, %s7079_s27  ;;  %4185 = vrot.lane.b32.xlu0 %v4181_v30, %s7080_s28  ;;  %v6098_v30 = vld [vmem:[#allocation10 + $0x6] ss:$0 sm:$0xff] }
0x1644   : > { %4193 = vrot.lane.b32.xlu0 %v4183_v34, %s7081_s8 }
0x16b2   : > { %v4186_v35 = vpop.permute.xlu0 %4185  ;;  %v4190_v38 = vpop.permute.xlu1 %4189 }
0x16b3   : > { %v4196_v40 = vsel %vm875_vm2, %v4180_v31, %v4186_v35 }
0x16b4   : > { %v4197_v41 = vsel %vm1442_vm5, %v4196_v40, %v4190_v38 }
0x16b6   : > { %v4194_v20 = vpop.permute.xlu0 %4193 }
0x16b7   : > { %v4198_v42 = vsel %vm1444_vm6, %v4197_v41, %v4194_v20 }
0x16b8   : > { %v4199_v43 = vpack.c.bf16 %v4198_v42, %v4198_v42 }
0x16ba   : > { %6514 = vmatmul.mubr.msk.bf16.vlgmr.msra.gmra.mxu0 %vm331_vm0, %v4199_v43 }
0x16bb   : > { %6533 = vmatprep.mubr.msk.bf16.mxu0 %vm7070_vm1, %v7069_v8  ;;  %6526 = vmatpush3.bf16.msra.mxu0 %v6756_v12 }
0x16bc   : > { %6527 = vmatprep.subr.bf16.mxu0 %v7069_v8 }
0x16bf   : > { %6528 = vmatpush3.bf16.msra.mxu0 %v6757_v14 }
0x16c0   : > { %6529 = vmatprep.subr.bf16.mxu0 %v7069_v8 }
0x16c3   : > { %6530 = vmatpush3.bf16.msra.mxu0 %v6758_v16 }
0x16c4   : > { %6531 = vmatprep.subr.bf16.mxu0 %v7069_v8 }
0x16c7   : > { %6532 = vmatpush3.bf16.msra.mxu0 %v6759_v17 }
0x16c8   : > { %6553 = vmatprep.subr.bf16.mxu0 %v7069_v8 }
0x177a   : > { %v4258_v29 = vpop.f32.mrf.mxu0 }
0x177b   : > { %v4259_v45 = vadd.f32 %v6092_v44, %v4258_v29 }
0x177c   : > { %v6515_v47 = vpop.f32.mrf.mxu0 }
0x177d   : > { %v7938_v33 = vadd.f32 %v4259_v45, %v7547_v27 }
0x177e   : > { %v4261_v25 = vpop.f32.mrf.mxu0 }
0x177f   : > { %v4267_v36 = vsel %vm331_vm0, %v7938_v33, 0.0  ;;  %v6102_v25 = vld [vmem:[#allocation10 + $0x7] ss:$0 sm:$0xff] }
0x1780   : > { %4268 = vadd.xlane.f32.xlu1 %v4267_v36  ;;  %v6516_v37 = vpop.f32.mrf.mxu0 }
0x1809   : > { %v4269_v48 = vpop.xlane.xlu1 %4268 }
0x180a   : > { %v4270_v52 = vmul.f32 0.03125, %v4269_v48 }
0x180c   : > { %v4271_v22 = vsub.f32 %v7938_v33, %v4270_v52 }
0x180e   : > { %v4272_v54 = vmul.f32 %v4271_v22, %v4271_v22 }
0x1810   : > { %v4273_v27 = vsel %vm331_vm0, %v4272_v54, 0.0 }
0x1811   : > { %4274 = vadd.xlane.f32.xlu0 %v4273_v27 }
0x1815   : > { %4441 = vadd.xlane.f32.xlu0 %v4440_v56 }
0x182b   : > { %4531 = vrot.lane.b32.xlu0 %v6754_v11, %s7074_s29 }
0x189a   : > { %v4275_v61 = vpop.xlane.xlu0 %4274 }
0x189b   : > { %v4276_v50 = vmul.f32 0.03125, %v4275_v61 }
0x189d   : > { %v4277_v46 = vadd.f32 1e-05, %v4276_v50 }
0x189e   : > { %v4442_v63 = vpop.xlane.xlu0 %4441 }
0x189f   : > { %6826 = vrsqrt.f32 %v4277_v46  ;;  %v4443_v62 = vmul.f32 0.03125, %v4442_v63 }
0x18a1   : > { %v4444_v32 = vsub.f32 %v7945_v55, %v4443_v62 }
0x18a2   : > { %v4532_v42 = vpop.permute.xlu0 %4531 }
0x18a3   : > { %v4445_v1 = vmul.f32 %v4444_v32, %v4444_v32 }
0x18a5   : > { %v4446_v2 = vsel %vm331_vm0, %v4445_v1, 0.0 }
0x18a6   : > { %4447 = vadd.xlane.f32.xlu1 %v4446_v2 }
0x18ac   : > { %v6827_v3 = vpop.eup %6826 }
0x18ad   : > { %v4279_v5 = vmul.f32 %v6827_v3, %v4271_v22 }
0x18af   : > { %v4284_v7 = vmul.f32 %v6096_v4, %v4279_v5 }
0x18b1   : > { %v4289_v59 = vadd.f32 %v6097_v6, %v4284_v7 }
0x18b3   : > { %v4290_v9 = vpack.c.bf16 %v4289_v59, %v4289_v59 }
0x18b5   : > { %6522 = vmatmul.mubr.msk.bf16.vlgmr.msra.gmra.mxu1 %vm331_vm0, %v4290_v9 }
0x18b6   : > { %6541 = vmatprep.mubr.msk.bf16.mxu1 %vm7070_vm1, %v7069_v8  ;;  %6538 = vmatpush3.bf16.msra.mxu1 %v6754_v11 }
0x18b7   : > { %6539 = vmatprep.subr.bf16.mxu1 %v7069_v8  ;;  %4529 = vrot.lane.b32.xlu1 %v6755_v18, %s7074_s29 }
0x18ba   : > { %6540 = vmatpush3.bf16.msra.mxu1 %v6755_v18 }
0x18bb   : > { %6545 = vmatprep.subr.bf16.mxu1 %v7069_v8  ;;  %4536 = vrot.lane.b32.xlu1 %v6110_v58, %s7074_s29 }
0x192f   : > { %v4448_v19 = vpop.xlane.xlu1 %4447 }
0x1930   : > { %v4449_v0 = vmul.f32 0.03125, %v4448_v19 }
0x1932   : > { %v4450_v21 = vadd.f32 1e-05, %v4449_v0 }
0x1933   : > { %v4530_v43 = vpop.permute.xlu1 %4529 }
0x1934   : > { %6828 = vrsqrt.f32 %v4450_v21 }
0x1937   : > { %v4537_v54 = vpop.permute.xlu1 %4536 }
0x1941   : > { %v6829_v10 = vpop.eup %6828 }
0x1942   : > { %v4452_v51 = vmul.f32 %v6829_v10, %v4444_v32 }
0x1944   : > { %v4457_v13 = vmul.f32 %v6108_v23, %v4452_v51 }
0x1946   : > { %v4462_v15 = vadd.f32 %v6109_v26, %v4457_v13 }
0x1948   : > { %v4463_v28 = vpack.c.bf16 %v4462_v15, %v4462_v15 }
0x194a   : > { %6542 = vmatmul.mubr.msk.bf16.vlgmr.msra.gmra.mxu1 %vm331_vm0, %v4463_v28 }
0x194b   : > { %6549 = vmatprep.mubr.msk.bf16.mxu1 %vm7070_vm1, %v7069_v8  ;;  %6546 = vmatpush3.bf16.msra.mxu1 %v4532_v42 }
0x194c   : > { %6547 = vmatprep.subr.bf16.mxu1 %v7069_v8 }
0x194f   : > { %6548 = vmatpush3.bf16.msra.mxu1 %v4530_v43 }
0x1950   : > { %6559 = vmatprep.subr.bf16.mxu1 %v7069_v8 }
0x1975   : > { %v4349_v31 = vpop.f32.mrf.mxu1 }
0x1976   : > { %v4350_v34 = vadd.f32 %v6098_v30, %v4349_v31 }
0x1977   : > { %v6523_v35 = vpop.f32.mrf.mxu1 }
0x1978   : > { %v4355_v38 = vmax.f32 %v4350_v34, 0.0 }
0x1979   : > { %v4352_v40 = vpop.f32.mrf.mxu1 }
0x197a   : > { %v4356_v20 = vpack.c.bf16 %v4355_v38, %v4355_v38 }
0x197b   : > { %v6524_v41 = vpop.f32.mrf.mxu1 }
0x197c   : > { %6534 = vmatmul.mubr.msk.bf16.vlgmr.msra.gmra.mxu0 %vm1641_vm7, %v4356_v20 }
0x197d   : > { %6555 = vmatprep.mubr.msk.bf16.mxu0 %vm7070_vm1, %v7069_v8 }
0x1a0a   : > { %v4522_v44 = vpop.f32.mrf.mxu1 }
0x1a0b   : > { %v4523_v60 = vadd.f32 %v6110_v58, %v4522_v44 }
0x1a0c   : > { %v6543_v29 = vpop.f32.mrf.mxu1 }
0x1a0e   : > { %v4525_v45 = vpop.f32.mrf.mxu1 }
0x1a10   : > { %v6544_v47 = vpop.f32.mrf.mxu1 }
0x1a3c   : > { %v4431_v36 = vpop.f32.mrf.mxu0 }
0x1a3d   : > { %v4432_v37 = vadd.f32 %v6102_v25, %v4431_v36 }
0x1a3e   : > { %v6535_v24 = vpop.f32.mrf.mxu0 }
0x1a3f   : > { %v4437_v48 = vadd.f32 %v4432_v37, %v7938_v33 }
0x1a40   : > { %v4434_v52 = vpop.f32.mrf.mxu0 }
0x1a41   : > { %v4528_v53 = vpack.c.bf16 %v4437_v48, %v4437_v48 }
0x1a42   : > { %v6536_v22 = vpop.f32.mrf.mxu0 }
0x1a43   : > { %6550 = vmatmul.mubr.msk.bf16.vlgmr.msra.gmra.mxu1 %vm331_vm0, %v4528_v53 }
0x1a44   : > { %6561 = vmatprep.mubr.msk.bf16.mxu1 %vm7070_vm1, %v7069_v8 }
0x1b03   : > { %v4576_v27 = vpop.f32.mrf.mxu1 }
0x1b04   : > { %v7978_v56 = vadd.f32 %v4576_v27, %v4537_v54 }
0x1b05   : > { %v6551_v57 = vpop.f32.mrf.mxu1 }
0x1b06   : > { %4736 = vrot.lane.b32.xlu1 %v7978_v56, %s7073_s13  ;;  %4733 = vrot.lane.b32.xlu0 %v7978_v56, %s7072_s9 }
0x1b07   : > { %v4579_v33 = vpop.f32.mrf.mxu1 }
0x1b09   : > { %v6552_v61 = vpop.f32.mrf.mxu1 }
0x1b0a   : > { %4583 = vrot.lane.b32.xlu1 %v4523_v60, %s7072_s9  ;;  %4739 = vrot.lane.b32.xlu0 %v7978_v56, %s7071_s24 }
0x1b0e   : > { %4589 = vrot.lane.b32.xlu1 %v4523_v60, %s7071_s24  ;;  %4586 = vrot.lane.b32.xlu0 %v4523_v60, %s7073_s13  ;;  %s6988_s24 = scalar_lea.vmem %s6987_s30, 256 }
0x1b0f   : > { %p6990_p9 = scmp.lt.s32.totalorder %s6988_s24, %s6982_s3 }
0x1b11   : > { %p6991_p13 = por %p6990_p9, %p6989_p7 }
0x1b13   : > { %p6992_p8 = pnand %p6991_p13, %p6985_p3 }
0x1b78   : > { %v7989_v50 = vpop.permute.xlu1 %4736  ;;  %v7991_v46 = vpop.permute.xlu0 %4733 }
0x1b79   : > { %v4742_v63 = vcombine.low %v7978_v56, %v7989_v50  ;;  %v4743_v62 = vcombine.high %v7978_v56, %v7989_v50 }
0x1b7b   : > { %v4750_v4 = vrot.slane %v4742_v63, %v7345_v39  ;;  %v4757_v5 = vrot.slane %v4743_v62, %v7345_v39 }
0x1b7c   : > { %v4584_v32 = vpop.permute.xlu1 %4583  ;;  %v7997_v1 = vpop.permute.xlu0 %4739 }
0x1b7d   : > { %v4758_v2 = vcombine.low %v7991_v46, %v7997_v1  ;;  %v4759_v3 = vcombine.high %v7991_v46, %v7997_v1 }
0x1b7f   : > { %v4766_v6 = vrot.slane %v4758_v2, %v7345_v39  ;;  %v4773_v7 = vrot.slane %v4759_v3, %v7345_v39 }
0x1b80   : > { %v4590_v59 = vpop.permute.xlu1 %4589  ;;  %v4587_v9 = vpop.permute.xlu0 %4586 }
0x1b81   : > { %v4774_v11 = vcombine.low %v4750_v4, %v4766_v6  ;;  %v4775_v18 = vcombine.high %v4750_v4, %v4766_v6  ;;  %v4790_v12 = vcombine.low %v4757_v5, %v4773_v7  ;;  %v4791_v14 = vcombine.high %v4757_v5, %v4773_v7 }
0x1b82   : > { %v4608_v16 = vcombine.low %v4584_v32, %v4590_v59  ;;  %v4609_v17 = vcombine.high %v4584_v32, %v4590_v59  ;;  %v4592_v58 = vcombine.low %v4523_v60, %v4587_v9  ;;  %v4593_v19 = vcombine.high %v4523_v60, %v4587_v9 }
0x1b83   : > { %v4782_v0 = vrot.slane %v4774_v11, %v7356_v49  ;;  %v4789_v21 = vrot.slane %v4775_v18, %v7356_v49  ;;  %v4798_v10 = vrot.slane %v4790_v12, %v7356_v49  ;;  %v4805_v23 = vrot.slane %v4791_v14, %v7356_v49 }
0x1b84   : > { %v4616_v51 = vrot.slane %v4608_v16, %v7345_v39  ;;  %v4623_v26 = vrot.slane %v4609_v17, %v7345_v39  ;;  %v4600_v13 = vrot.slane %v4592_v58, %v7345_v39  ;;  %v4607_v15 = vrot.slane %v4593_v19, %v7345_v39 }
0x1b85   : > { %v4810_v28 = vcombine.low %v4782_v0, %v4789_v21  ;;  %v6117_v30 = vcombine.high %v4782_v0, %v4789_v21  ;;  %v4826_v31 = vcombine.low %v4798_v10, %v4805_v23  ;;  %v6118_v34 = vcombine.high %v4798_v10, %v4805_v23 }
0x1b86   : > { %v4624_v35 = vcombine.low %v4600_v13, %v4616_v51  ;;  %v4625_v38 = vcombine.high %v4600_v13, %v4616_v51  ;;  %v4640_v40 = vcombine.low %v4607_v15, %v4623_v26  ;;  %v4641_v20 = vcombine.high %v4607_v15, %v4623_v26 }
0x1b87   : > { %v4817_v41 = vrot.slane %v4810_v28, %v7345_v39  ;;  %v4825_v42 = vrot.slane %v6117_v30, %v7345_v39  ;;  %v4833_v43 = vrot.slane %v4826_v31, %v7345_v39  ;;  %v4841_v44 = vrot.slane %v6118_v34, %v7345_v39 }
0x1b88   : > { %v4632_v29 = vrot.slane %v4624_v35, %v7356_v49  ;;  %v4639_v45 = vrot.slane %v4625_v38, %v7356_v49  ;;  %v4648_v47 = vrot.slane %v4640_v40, %v7356_v49  ;;  %v4655_v25 = vrot.slane %v4641_v20, %v7356_v49 }
0x1b89   : > { %v4842_v36 = vcombine.low %v4817_v41, %v4825_v42  ;;  %v4858_v37 = vcombine.low %v4833_v43, %v4841_v44  ;;  %v4843_v24 = vcombine.high %v4817_v41, %v4825_v42  ;;  %v4859_v48 = vcombine.high %v4833_v43, %v4841_v44 }
0x1b8a   : > { %v4660_v52 = vcombine.low %v4632_v29, %v4639_v45  ;;  %v6115_v53 = vcombine.high %v4632_v29, %v4639_v45  ;;  %v4676_v22 = vcombine.low %v4648_v47, %v4655_v25  ;;  %v6116_v54 = vcombine.high %v4648_v47, %v4655_v25 }
0x1b8b   : > { %v4850_v27 = vrot.slane %v4842_v36, %v7356_v49  ;;  %v4866_v57 = vrot.slane %v4858_v37, %v7356_v49  ;;  %v4857_v2 = vrot.slane %v4843_v24, %v7356_v49  ;;  %v4873_v3 = vrot.slane %v4859_v48, %v7356_v49 }
0x1b8c   : > { %v4667_v33 = vrot.slane %v4660_v52, %v7345_v39  ;;  %v4675_v60 = vrot.slane %v6115_v53, %v7345_v39  ;;  %v4683_v61 = vrot.slane %v4676_v22, %v7345_v39  ;;  %v4691_v63 = vrot.slane %v6116_v54, %v7345_v39 }
0x1b8d   : > { %v4874_v62 = vcombine.low %v4850_v27, %v4866_v57  ;;  %v4875_v32 = vcombine.high %v4850_v27, %v4866_v57  ;;  %v4876_v12 = vcombine.low %v4857_v2, %v4873_v3  ;;  %v4877_v14 = vcombine.high %v4857_v2, %v4873_v3 }
0x1b8e   : > { %v4692_v4 = vcombine.low %v4667_v33, %v4675_v60  ;;  %v4708_v5 = vcombine.low %v4683_v61, %v4691_v63  ;;  %v4693_v16 = vcombine.high %v4667_v33, %v4675_v60  ;;  %v4709_v17 = vcombine.high %v4683_v61, %v4691_v63 }
0x1b8f   : > { %v4878_v6 = vpack.c.bf16 %v4874_v62, %v4874_v62  ;;  %v4879_v7 = vpack.c.bf16 %v4875_v32, %v4875_v32  ;;  %v4880_v0 = vpack.c.bf16 %v4876_v12, %v4876_v12  ;;  %v4881_v21 = vpack.c.bf16 %v4877_v14, %v4877_v14 }
0x1b90   : > { %v4700_v59 = vrot.slane %v4692_v4, %v7356_v49  ;;  %v4716_v9 = vrot.slane %v4708_v5, %v7356_v49  ;;  %v4707_v51 = vrot.slane %v4693_v16, %v7356_v49  ;;  %v4723_v26 = vrot.slane %v4709_v17, %v7356_v49 }
0x1b91   : > { %v5038_v11 = vsel %vm875_vm2, %v4878_v6, 0  ;;  %v5084_v18 = vsel %vm875_vm2, %v4879_v7, 0  ;;  %v5130_v13 = vsel %vm875_vm2, %v4880_v0, 0  ;;  %v5176_v15 = vsel %vm875_vm2, %v4881_v21, 0 }
0x1b92   : > { %6554 = vmatpush3.bf16.xpose.msra.mxu0 %v5038_v11  ;;  %6560 = vmatpush3.bf16.xpose.msra.mxu1 %v5084_v18  ;;  %v4724_v58 = vcombine.low %v4700_v59, %v4716_v9  ;;  %v4725_v19 = vcombine.high %v4700_v59, %v4716_v9  ;;  %v4726_v28 = vcombine.low %v4707_v51, %v4723_v26 }
0x1b93   : > { %6565 = vmatprep.subr.bf16.mxu0 %v7069_v8  ;;  %6571 = vmatprep.subr.bf16.mxu1 %v7069_v8  ;;  %v4727_v30 = vcombine.high %v4707_v51, %v4723_v26 }
0x1b94   : > { %v4728_v10 = vpack.c.bf16 %v4724_v58, %v4724_v58  ;;  %v4729_v23 = vpack.c.bf16 %v4725_v19, %v4725_v19  ;;  %v4730_v31 = vpack.c.bf16 %v4726_v28, %v4726_v28 }
0x1b95   : > { %v4731_v34 = vpack.c.bf16 %v4727_v30, %v4727_v30 }
0x1b99   : > { %6556 = vmatmul.mubr.msk.bf16.vlgmr.msra.gmra.mxu0 %vm875_vm2, %v4728_v10  ;;  %6562 = vmatmul.mubr.msk.bf16.vlgmr.msra.gmra.mxu1 %vm875_vm2, %v4729_v23 }
0x1b9a   : > { %6566 = vmatpush3.bf16.xpose.msra.mxu0 %v5130_v13  ;;  %6572 = vmatpush3.bf16.xpose.msra.mxu1 %v5176_v15 }
0x1b9b   : > { %6567 = vmatprep.mubr.msk.bf16.mxu0 %vm7070_vm1, %v7069_v8  ;;  %6573 = vmatprep.mubr.msk.bf16.mxu1 %vm7070_vm1, %v7069_v8 }
0x1b9c   : > { %6577 = vmatprep.subr.bf16.mxu0 %v7069_v8  ;;  %6583 = vmatprep.subr.bf16.mxu1 %v7069_v8 }
0x1ba1   : > { %6568 = vmatmul.mubr.msk.bf16.vlgmr.msra.gmra.mxu0 %vm875_vm2, %v4730_v31  ;;  %6574 = vmatmul.mubr.msk.bf16.vlgmr.msra.gmra.mxu1 %vm875_vm2, %v4731_v34 }
0x1ba2   : > { %6579 = vmatprep.mubr.msk.bf16.mxu0 %vm7070_vm1, %v7069_v8  ;;  %6585 = vmatprep.mubr.msk.bf16.mxu1 %vm7070_vm1, %v7069_v8 }
0x1c59   : > { %v5074_v35 = vpop.f32.mrf.mxu0  ;;  %v5120_v38 = vpop.f32.mrf.mxu1 }
0x1c5a   : > { %v5218_v40 = vsel %vm875_vm2, %v5074_v35, -inf  ;;  %v5221_v20 = vsel %vm875_vm2, %v5120_v38, -inf }
0x1c5b   : > { %5219 = vmax.xlane.f32.xlu0 %v5218_v40  ;;  %v6557_v41 = vpop.f32.mrf.mxu0  ;;  %5222 = vmax.xlane.f32.xlu1 %v5221_v20  ;;  %v6563_v42 = vpop.f32.mrf.mxu1 }
0x1c5d   : > { %v5077_v43 = vpop.f32.mrf.mxu0  ;;  %v5123_v44 = vpop.f32.mrf.mxu1 }
0x1c5f   : > { %v6558_v29 = vpop.f32.mrf.mxu0  ;;  %v6564_v45 = vpop.f32.mrf.mxu1 }
0x1c61   : > { %v5166_v47 = vpop.f32.mrf.mxu0  ;;  %v5212_v25 = vpop.f32.mrf.mxu1 }
0x1c62   : > { %v5224_v36 = vsel %vm875_vm2, %v5166_v47, -inf  ;;  %v5227_v53 = vsel %vm875_vm2, %v5212_v25, -inf }
0x1c63   : > { %5225 = vmax.xlane.f32.xlu0 %v5224_v36  ;;  %v6569_v37 = vpop.f32.mrf.mxu0  ;;  %v6575_v24 = vpop.f32.mrf.mxu1 }
0x1c65   : > { %v5169_v48 = vpop.f32.mrf.mxu0  ;;  %v5215_v52 = vpop.f32.mrf.mxu1 }
0x1c67   : > { %v6570_v22 = vpop.f32.mrf.mxu0  ;;  %5228 = vmax.xlane.f32.xlu0 %v5227_v53  ;;  %v6576_v54 = vpop.f32.mrf.mxu1 }
0x1c6c   : > { %4882 = vrot.lane.b32.xlu1 %v7978_v56, %s7074_s29 }
0x1ce4   : > { %v5220_v27 = vpop.xlane.xlu0 %5219  ;;  %v5223_v57 = vpop.xlane.xlu1 %5222 }
0x1ce5   : > { %v5230_v33 = vsub.f32 %v5074_v35, %v5220_v27  ;;  %v5231_v60 = vsub.f32 %v5120_v38, %v5223_v57 }
0x1ce7   : > { %v5234_v61 = vmul.f32 1.442695, %v5230_v33  ;;  %v5236_v63 = vmul.f32 1.442695, %v5231_v60 }
0x1ce9   : > { %6830 = vpow2.f32 %v5234_v61 }
0x1cea   : > { %6832 = vpow2.f32 %v5236_v63 }
0x1cec   : > { %v5226_v56 = vpop.xlane.xlu0 %5225 }
0x1ced   : > { %v5232_v4 = vsub.f32 %v5166_v47, %v5226_v56 }
0x1cef   : > { %v5238_v7 = vmul.f32 1.442695, %v5232_v4 }
0x1cf0   : > { %v5229_v5 = vpop.xlane.xlu0 %5228 }
0x1cf1   : > { %v5233_v6 = vsub.f32 %v5212_v25, %v5229_v5  ;;  %6834 = vpow2.f32 %v5238_v7 }
0x1cf3   : > { %v5240_v59 = vmul.f32 1.442695, %v5233_v6 }
0x1cf5   : > { %6836 = vpow2.f32 %v5240_v59 }
0x1cf6   : > { %v8061_v62 = vpop.eup %6830 }
0x1cf7   : > { %v8063_v32 = vpop.eup %6832  ;;  %v5242_v2 = vsel %vm875_vm2, %v8061_v62, 0.0 }
0x1cf8   : > { %5243 = vadd.xlane.f32.xlu1 %v5242_v2  ;;  %v5245_v3 = vsel %vm875_vm2, %v8063_v32, 0.0 }
0x1cf9   : > { %5246 = vadd.xlane.f32.xlu0 %v5245_v3 }
0x1cfe   : > { %v8075_v9 = vpop.eup %6834 }
0x1d02   : > { %v8077_v11 = vpop.eup %6836 }
0x1d09   : > { %4886 = vrot.lane.b32.xlu1 %v7989_v50, %s7074_s29  ;;  %v5248_v50 = vsel %vm875_vm2, %v8075_v9, 0.0 }
0x1d0d   : > { %4888 = vrot.lane.b32.xlu1 %v7997_v1, %s7074_s29  ;;  %v5251_v1 = vsel %vm875_vm2, %v8077_v11, 0.0 }
0x1d0f   : > { %4884 = vrot.lane.b32.xlu0 %v7991_v46, %s7074_s29  ;;  %v4883_v46 = vpop.permute.xlu1 %4882 }
0x1d2e   : > { %5249 = vadd.xlane.f32.xlu0 %v5248_v50 }
0x1d31   : > { %5252 = vadd.xlane.f32.xlu1 %v5251_v1 }
0x1d81   : > { %v5244_v18 = vpop.xlane.xlu1 %5243 }
0x1d82   : > { %v5247_v12 = vpop.xlane.xlu0 %5246  ;;  %6838 = vrcp.f32 %v5244_v18 }
0x1d83   : > { %6840 = vrcp.f32 %v5247_v12 }
0x1d85   : > { %v4887_v14 = vpop.permute.xlu1 %4886 }
0x1d86   : > { %v4894_v16 = vcombine.low %v4883_v46, %v4887_v14  ;;  %v4895_v17 = vcombine.high %v4883_v46, %v4887_v14  ;;  %v4885_v58 = vpop.permute.xlu0 %4884 }
0x1d88   : > { %v4902_v10 = vrot.slane %v4894_v16, %v7345_v39  ;;  %v4909_v23 = vrot.slane %v4895_v17, %v7345_v39 }
0x1d89   : > { %v4889_v19 = vpop.permute.xlu1 %4888 }
0x1d8a   : > { %v4910_v0 = vcombine.low %v4885_v58, %v4889_v19  ;;  %v4911_v21 = vcombine.high %v4885_v58, %v4889_v19 }
0x1d8c   : > { %v4918_v51 = vrot.slane %v4910_v0, %v7345_v39  ;;  %v4925_v26 = vrot.slane %v4911_v21, %v7345_v39 }
0x1d8e   : > { %v4926_v13 = vcombine.low %v4902_v10, %v4918_v51  ;;  %v4927_v15 = vcombine.high %v4902_v10, %v4918_v51  ;;  %v4942_v28 = vcombine.low %v4909_v23, %v4925_v26  ;;  %v4943_v30 = vcombine.high %v4909_v23, %v4925_v26 }
0x1d8f   : > { %v6839_v24 = vpop.eup %6838 }
0x1d90   : > { %v4934_v31 = vrot.slane %v4926_v13, %v7356_v49  ;;  %v4941_v34 = vrot.slane %v4927_v15, %v7356_v49  ;;  %v4950_v35 = vrot.slane %v4942_v28, %v7356_v49  ;;  %v4957_v38 = vrot.slane %v4943_v30, %v7356_v49  ;;  %v6841_v48 = vpop.eup %6840 }
0x1d91   : > { %v5255_v2 = vmul.f32 %v6839_v24, %v8061_v62  ;;  %v5257_v3 = vmul.f32 %v6841_v48, %v8063_v32 }
0x1d92   : > { %v4962_v40 = vcombine.low %v4934_v31, %v4941_v34  ;;  %v6119_v20 = vcombine.high %v4934_v31, %v4941_v34  ;;  %v4978_v41 = vcombine.low %v4950_v35, %v4957_v38  ;;  %v6120_v42 = vcombine.high %v4950_v35, %v4957_v38 }
0x1d93   : > { %v5262_v7 = vpack.c.bf16 %v5255_v2, %v5255_v2  ;;  %v5263_v59 = vpack.c.bf16 %v5257_v3, %v5257_v3 }
0x1d94   : > { %v4969_v43 = vrot.slane %v4962_v40, %v7345_v39  ;;  %v4977_v44 = vrot.slane %v6119_v20, %v7345_v39  ;;  %v4985_v29 = vrot.slane %v4978_v41, %v7345_v39  ;;  %v4993_v45 = vrot.slane %v6120_v42, %v7345_v39 }
0x1d96   : > { %v4994_v47 = vcombine.low %v4969_v43, %v4977_v44  ;;  %v5010_v25 = vcombine.low %v4985_v29, %v4993_v45  ;;  %v4995_v36 = vcombine.high %v4969_v43, %v4977_v44  ;;  %v5011_v37 = vcombine.high %v4985_v29, %v4993_v45 }
0x1d98   : > { %v5002_v52 = vrot.slane %v4994_v47, %v7356_v49  ;;  %v5018_v53 = vrot.slane %v5010_v25, %v7356_v49  ;;  %v5009_v22 = vrot.slane %v4995_v36, %v7356_v49  ;;  %v5025_v54 = vrot.slane %v5011_v37, %v7356_v49  ;;  %v6760_v36 = vld [vmem:[#allocation8 + $0x18] sm:$0xff]  }
0x1d9a   : > { %v5026_v27 = vcombine.low %v5002_v52, %v5018_v53  ;;  %v5027_v57 = vcombine.high %v5002_v52, %v5018_v53  ;;  %v5028_v33 = vcombine.low %v5009_v22, %v5025_v54  ;;  %v5029_v60 = vcombine.high %v5009_v22, %v5025_v54 }
0x1d9c   : > { %v5030_v61 = vpack.c.bf16 %v5026_v27, %v5026_v27  ;;  %v5031_v63 = vpack.c.bf16 %v5027_v57, %v5027_v57  ;;  %v5032_v5 = vpack.c.bf16 %v5028_v33, %v5028_v33  ;;  %v5033_v6 = vpack.c.bf16 %v5029_v60, %v5029_v60  ;;  %v6761_v57 = vld [vmem:[#allocation8 + $0x10] sm:$0xff]  }
0x1d9e   : > { %v5270_v56 = vsel %vm1111_vm4, %v5030_v61, 0  ;;  %v5316_v4 = vsel %vm1111_vm4, %v5031_v63, 0  ;;  %v5362_v62 = vsel %vm1111_vm4, %v5032_v5, 0  ;;  %v5408_v32 = vsel %vm1111_vm4, %v5033_v6, 0 }
0x1d9f   : > { %6578 = vmatpush3.bf16.msra.mxu0 %v5270_v56  ;;  %6584 = vmatpush3.bf16.msra.mxu1 %v5316_v4 }
0x1da0   : > { %6589 = vmatprep.subr.bf16.mxu0 %v7069_v8  ;;  %6595 = vmatprep.subr.bf16.mxu1 %v7069_v8 }
0x1da2   : > { %6580 = vmatmul.mubr.msk.bf16.vlgmr.msra.gmra.mxu0 %vm875_vm2, %v5262_v7  ;;  %6586 = vmatmul.mubr.msk.bf16.vlgmr.msra.gmra.mxu1 %vm875_vm2, %v5263_v59 }
0x1da3   : > { %6590 = vmatpush3.bf16.msra.mxu0 %v5362_v62  ;;  %6596 = vmatpush3.bf16.msra.mxu1 %v5408_v32 }
0x1da4   : > { %6591 = vmatprep.mubr.msk.bf16.mxu0 %vm7070_vm1, %v7069_v8  ;;  %6597 = vmatprep.mubr.msk.bf16.mxu1 %vm7070_vm1, %v7069_v8 }
0x1da5   : > { %6601 = vmatprep.subr.bf16.mxu0 %v7069_v8  ;;  %6609 = vmatprep.subr.bf16.mxu1 %v7069_v8 }
0x1db7   : > { %v5250_v50 = vpop.xlane.xlu0 %5249 }
0x1db8   : > { %6842 = vrcp.f32 %v5250_v50 }
0x1dba   : > { %v5253_v1 = vpop.xlane.xlu1 %5252 }
0x1dbb   : > { %6844 = vrcp.f32 %v5253_v1 }
0x1dc5   : > { %v6843_v46 = vpop.eup %6842 }
0x1dc6   : > { %v5259_v18 = vmul.f32 %v6843_v46, %v8075_v9 }
0x1dc8   : > { %v6845_v12 = vpop.eup %6844  ;;  %v5264_v14 = vpack.c.bf16 %v5259_v18, %v5259_v18 }
0x1dc9   : > { %v5261_v16 = vmul.f32 %v6845_v12, %v8077_v11 }
0x1dca   : > { %6592 = vmatmul.mubr.msk.bf16.vlgmr.msra.gmra.mxu0 %vm875_vm2, %v5264_v14 }
0x1dcb   : > { %v5265_v17 = vpack.c.bf16 %v5261_v16, %v5261_v16  ;;  %6605 = vmatprep.mubr.msk.bf16.mxu0 %vm7070_vm1, %v7069_v8  ;;  %6602 = vmatpush3.bf16.msra.mxu0 %v6760_v36 }
0x1dcc   : > { %6603 = vmatprep.subr.bf16.mxu0 %v7069_v8 }
0x1dcd   : > { %6598 = vmatmul.mubr.msk.bf16.vlgmr.msra.gmra.mxu1 %vm875_vm2, %v5265_v17  ;;  %v6131_v17 = vld [vmem:[#allocation10 + $0xb] ss:$0 sm:$0xff] }
0x1dce   : > { %6613 = vmatprep.mubr.msk.bf16.mxu1 %vm7070_vm1, %v7069_v8 }
0x1dcf   : > { %6604 = vmatpush3.bf16.msra.mxu0 %v6761_v57 }
0x1dd0   : > { %6617 = vmatprep.subr.bf16.mxu0 %v7069_v8 }
0x1e62   : > { %v5306_v58 = vpop.f32.mrf.mxu0  ;;  %v5352_v19 = vpop.f32.mrf.mxu1 }
0x1e64   : > { %v6581_v0 = vpop.f32.mrf.mxu0  ;;  %v6587_v21 = vpop.f32.mrf.mxu1 }
0x1e66   : > { %v5309_v9 = vpop.f32.mrf.mxu0  ;;  %v5355_v10 = vpop.f32.mrf.mxu1 }
0x1e68   : > { %v6582_v23 = vpop.f32.mrf.mxu0  ;;  %v6588_v51 = vpop.f32.mrf.mxu1 }
0x1e8a   : > { %v5398_v11 = vpop.f32.mrf.mxu0 }
0x1e8b   : > { %v5450_v26 = vcombine.low %v5306_v58, %v5398_v11  ;;  %v5451_v13 = vcombine.high %v5306_v58, %v5398_v11 }
0x1e8c   : > { %v6593_v15 = vpop.f32.mrf.mxu0 }
0x1e8d   : > { %v5444_v28 = vpop.f32.mrf.mxu1  ;;  %v5458_v38 = vrot.slane %v5450_v26, %v7345_v39  ;;  %v5465_v40 = vrot.slane %v5451_v13, %v7345_v39 }
0x1e8e   : > { %v5401_v30 = vpop.f32.mrf.mxu0  ;;  %v5466_v31 = vcombine.low %v5352_v19, %v5444_v28  ;;  %v5467_v34 = vcombine.high %v5352_v19, %v5444_v28  ;;  %v6762_v28 = vld [vmem:[#allocation8 + $0x28] sm:$0xff]  }
0x1e8f   : > { %v6599_v35 = vpop.f32.mrf.mxu1  ;;  %6610 = vmatpush3.bf16.msra.mxu1 %v6762_v28  ;;  %v6763_v30 = vld [vmem:[#allocation8 + $0x20] sm:$0xff]  }
0x1e90   : > { %v5474_v20 = vrot.slane %v5466_v31, %v7345_v39  ;;  %v5481_v41 = vrot.slane %v5467_v34, %v7345_v39  ;;  %v6594_v42 = vpop.f32.mrf.mxu0  ;;  %6611 = vmatprep.subr.bf16.mxu1 %v7069_v8  ;;  %v6764_v31 = vld [vmem:[#allocation8 + $0x48] sm:$0xff]  }
0x1e91   : > { %v5447_v43 = vpop.f32.mrf.mxu1  ;;  %v6136_v42 = vld [vmem:[#allocation10 + $0xd] ss:$0 sm:$0xff] }
0x1e92   : > { %v5482_v44 = vcombine.low %v5458_v38, %v5474_v20  ;;  %v5483_v29 = vcombine.high %v5458_v38, %v5474_v20  ;;  %v5498_v45 = vcombine.low %v5465_v40, %v5481_v41  ;;  %v5499_v47 = vcombine.high %v5465_v40, %v5481_v41  ;;  %v6135_v20 = vld [vmem:[#allocation10 + $0xc] ss:$0 sm:$0xff] }
0x1e93   : > { %v6600_v25 = vpop.f32.mrf.mxu1  ;;  %6612 = vmatpush3.bf16.msra.mxu1 %v6763_v30 }
0x1e94   : > { %v5490_v37 = vrot.slane %v5482_v44, %v7356_v49  ;;  %v5497_v24 = vrot.slane %v5483_v29, %v7356_v49  ;;  %v5506_v48 = vrot.slane %v5498_v45, %v7356_v49  ;;  %v5513_v52 = vrot.slane %v5499_v47, %v7356_v49  ;;  %v6766_v45 = vld [vmem:[#allocation8 + $0x38] sm:$0xff]   ;;  %v6767_v47 = vld [vmem:[#allocation8 + $0x30] sm:$0xff]  }
0x1e95   : > { %v6137_v25 = vld [vmem:[#allocation10 + $0xe] ss:$0 sm:$0xff] }
0x1e96   : > { %v5518_v53 = vcombine.low %v5490_v37, %v5497_v24  ;;  %v6129_v22 = vcombine.high %v5490_v37, %v5497_v24  ;;  %v5534_v54 = vcombine.low %v5506_v48, %v5513_v52  ;;  %v6130_v27 = vcombine.high %v5506_v48, %v5513_v52 }
0x1e98   : > { %v5525_v33 = vrot.slane %v5518_v53, %v7345_v39  ;;  %v5533_v60 = vrot.slane %v6129_v22, %v7345_v39  ;;  %v5541_v61 = vrot.slane %v5534_v54, %v7345_v39  ;;  %v5549_v63 = vrot.slane %v6130_v27, %v7345_v39  ;;  %v6141_v54 = vld [vmem:[#allocation10 + $0xf] ss:$0 sm:$0xff] }
0x1e9a   : > { %v5551_v2 = vcombine.high %v5525_v33, %v5533_v60  ;;  %v5567_v3 = vcombine.high %v5541_v61, %v5549_v63  ;;  %v5550_v56 = vcombine.low %v5525_v33, %v5533_v60  ;;  %v5566_v4 = vcombine.low %v5541_v61, %v5549_v63 }
0x1e9c   : > { %v5565_v5 = vrot.slane %v5551_v2, %v7356_v49  ;;  %v5581_v6 = vrot.slane %v5567_v3, %v7356_v49  ;;  %v5558_v7 = vrot.slane %v5550_v56, %v7356_v49  ;;  %v5574_v59 = vrot.slane %v5566_v4, %v7356_v49 }
0x1e9e   : > { %v5584_v62 = vcombine.low %v5565_v5, %v5581_v6  ;;  %v5583_v32 = vcombine.high %v5558_v7, %v5574_v59  ;;  %v5582_v50 = vcombine.low %v5558_v7, %v5574_v59  ;;  %v5585_v39 = vcombine.high %v5565_v5, %v5581_v6 }
0x1ea0   : > { %5591 = vrot.lane.b32.xlu1 %v5584_v62, %s7079_s27  ;;  %5587 = vrot.lane.b32.xlu0 %v5583_v32, %s7080_s28 }
0x1ea4   : > { %5595 = vrot.lane.b32.xlu0 %v5585_v39, %s7081_s8 }
0x1f12   : > { %v5588_v1 = vpop.permute.xlu0 %5587  ;;  %v5592_v46 = vpop.permute.xlu1 %5591 }
0x1f13   : > { %v5598_v18 = vsel %vm875_vm2, %v5582_v50, %v5588_v1 }
0x1f14   : > { %v5599_v14 = vsel %vm1442_vm5, %v5598_v18, %v5592_v46 }
0x1f16   : > { %v5596_v12 = vpop.permute.xlu0 %5595 }
0x1f17   : > { %v5600_v16 = vsel %vm1444_vm6, %v5599_v14, %v5596_v12 }
0x1f18   : > { %v5601_v49 = vpack.c.bf16 %v5600_v16, %v5600_v16 }
0x1f1a   : > { %6606 = vmatmul.mubr.msk.bf16.vlgmr.msra.gmra.mxu0 %vm331_vm0, %v5601_v49 }
0x1f1b   : > { %6625 = vmatprep.mubr.msk.bf16.mxu0 %vm7070_vm1, %v7069_v8  ;;  %6618 = vmatpush3.bf16.msra.mxu0 %v6764_v31 }
0x1f1c   : > { %6619 = vmatprep.subr.bf16.mxu0 %v7069_v8 }
0x1fda   : > { %v5660_v58 = vpop.f32.mrf.mxu0 }
0x1fdb   : > { %v5661_v19 = vadd.f32 %v6131_v17, %v5660_v58 }
0x1fdc   : > { %v6607_v0 = vpop.f32.mrf.mxu0 }
0x1fdd   : > { %v5666_v21 = vadd.f32 %v5661_v19, %v7945_v55  ;;  %v6765_v55 = vld [vmem:[#allocation8 + $0x40] sm:$0xff]  }
0x1fde   : > { %v5663_v9 = vpop.f32.mrf.mxu0  ;;  %6620 = vmatpush3.bf16.msra.mxu0 %v6765_v55 }
0x1fdf   : > { %v5669_v10 = vsel %vm331_vm0, %v5666_v21, 0.0  ;;  %6621 = vmatprep.subr.bf16.mxu0 %v7069_v8 }
0x1fe0   : > { %5670 = vadd.xlane.f32.xlu1 %v5669_v10  ;;  %v6608_v23 = vpop.f32.mrf.mxu0 }
0x1fe2   : > { %6622 = vmatpush3.bf16.msra.mxu0 %v6766_v45 }
0x1fe3   : > { %6623 = vmatprep.subr.bf16.mxu0 %v7069_v8 }
0x1fe6   : > { %6624 = vmatpush3.bf16.msra.mxu0 %v6767_v47 }
0x2069   : > { %v5671_v51 = vpop.xlane.xlu1 %5670 }
0x206a   : > { %v5672_v11 = vmul.f32 0.03125, %v5671_v51 }
0x206c   : > { %v5673_v26 = vsub.f32 %v5666_v21, %v5672_v11 }
0x206e   : > { %v5674_v13 = vmul.f32 %v5673_v26, %v5673_v26 }
0x2070   : > { %v5675_v15 = vsel %vm331_vm0, %v5674_v13, 0.0 }
0x2071   : > { %5676 = vadd.xlane.f32.xlu0 %v5675_v15 }
0x20fa   : > { %v5677_v34 = vpop.xlane.xlu0 %5676 }
0x20fb   : > { %v5678_v35 = vmul.f32 0.03125, %v5677_v34 }
0x20fd   : > { %v5679_v38 = vadd.f32 1e-05, %v5678_v35 }
0x20ff   : > { %6846 = vrsqrt.f32 %v5679_v38 }
0x210c   : > { %v6847_v40 = vpop.eup %6846 }
0x210d   : > { %v5681_v41 = vmul.f32 %v6847_v40, %v5673_v26 }
0x210f   : > { %v5686_v43 = vmul.f32 %v6135_v20, %v5681_v41 }
0x2111   : > { %v5691_v44 = vadd.f32 %v6136_v42, %v5686_v43 }
0x2113   : > { %v5692_v29 = vpack.c.bf16 %v5691_v44, %v5691_v44 }
0x2115   : > { %6614 = vmatmul.mubr.msk.bf16.vlgmr.msra.gmra.mxu1 %vm331_vm0, %v5692_v29 }
0x21d5   : > { %v5751_v36 = vpop.f32.mrf.mxu1 }
0x21d6   : > { %v5752_v37 = vadd.f32 %v6137_v25, %v5751_v36 }
0x21d7   : > { %v6615_v24 = vpop.f32.mrf.mxu1 }
0x21d8   : > { %v5757_v48 = vmax.f32 %v5752_v37, 0.0 }
0x21d9   : > { %v5754_v52 = vpop.f32.mrf.mxu1 }
0x21da   : > { %v5758_v53 = vpack.c.bf16 %v5757_v48, %v5757_v48 }
0x21db   : > { %v6616_v22 = vpop.f32.mrf.mxu1 }
0x21dc   : > { %6626 = vmatmul.mubr.msk.bf16.vlgmr.msra.gmra.mxu0 %vm1641_vm7, %v5758_v53 }
0x229c   : > { %v5833_v27 = vpop.f32.mrf.mxu0 }
0x229d   : > { %v5834_v8 = vadd.f32 %v6141_v54, %v5833_v27 }
0x229e   : > { %v6627_v57 = vpop.f32.mrf.mxu0 }
0x229f   : > { %v5839_v33 = vadd.f32 %v5834_v8, %v5666_v21 }
0x22a0   : > { %v5836_v60 = vpop.f32.mrf.mxu0 }
0x22a1   : > { %5840 = vst.msk [vmem:[%s319_s17] sm:$0xff] %vm331_vm0, %v5839_v33 }
0x22a2   : > { %v6628_v61 = vpop.f32.mrf.mxu0 }
0x22a3   : > { %6995 = shalt.err (!%p6992_p8)
}
0x22a4   : > { %s6996_s9 = scalar_lea.hbm %s8164_s26, 128  ;;  %s7000_s29 = scalar_lea.hbm %s8213_s5, 256 }
0x22a5   : > { %p6997_p10 = scmp.ne.s32.totalorder %s8164_s26, %s6996_s9  ;;  %p7001_p2 = scmp.lt.s32.totalorder %s8164_s26, %s8213_s5 }
0x22a6   : > { %p7002_p4 = scmp.lt.s32.totalorder %s7000_s29, %s6996_s9 }
0x22a7   : > { %p6998_p1 = pnand %p6997_p10, %p8235_p0 }
0x22a8   : > { %p7003_p6 = por %p7002_p4, %p7001_p2 }
0x22a9   : > { %p6999_p11 = pneg %p6998_p1 }
0x22ab   : > { %p7004_p12 = pnand %p7003_p6, %p6999_p11 }
0x22ad   : > { %7007 = shalt.err (!%p7004_p12)
}
0x22ae   : > { %6645 = dma.vmem_to_hbm [thread:$0]  (%p8235_p0), %s8166_s7, 128, %s8164_s26, %s5842_s22  }
0x22af PF: > { %s5867_s28 = sand.u32 1, %s7046_s18   ;;  %p8236_p5 = scmp.ne.s32.totalorder %s8221_s25, 0 }
0x22b0   : > { %p8237_p3 = scmp.ge.s32.totalorder %s7058_s21, 2  ;;  %s5868_s8 = scalar_lea.sflag [#allocation4], %s5867_s28 }
0x22b2   : > { %p6665_p7 = pnand %p8237_p3, %p8236_p5 }
0x22b4   : > { %p6666_p9 = pneg %p6665_p7 }
0x22b6   : > { %7041 = dma.done.wait (%p6666_p9), %s5868_s8, 128  }
0x22b7   : > { %7043 = vsyncadd (%p6666_p9), %s5868_s8, 4294967168  ;;  %p22_p13 = scmp.ge.s32.totalorder %s7193_s6, 4   ;;  %s8238_s18 = smov %s7050_s19 }
0x22b8   : > { %s8239_s19 = smov %s7054_s20  ;;  %s8240_s20 = smov %s7203_s10 }
0x22b9   : > { %s8241_s21 = smov %s7193_s6  ;;  %24 = sbr.rel (!%p22_p13) target bundleno = 11 (0xb), region = 110 }
0x22be   :  { %5873 = vsyncpa [#allocation3], 1 }
0x22bf   :  { %5875 = vsyncpa [#allocation3 + $0x1], 1 }
0x22c0   :  { %5876 = vsyncpa [#allocation6], 1 }
0x22c1   :  { %5878 = vsyncpa [#allocation6 + $0x1], 1 }
0x22c2   :  { %5879 = vsyncpa [#allocation9], 1 }
0x22c3   :  { %5880 = vsyncpa [#allocation4], 1 }
0x22c4   :  { %5882 = vsyncpa [#allocation4 + $0x1], 1 }

</bundles_post_ra>
